<compile_context>
chip_gen: v7x
topology: tpu7x:2x2x1
jax: 0.10.0
libtpu: 0.0.40
codegen_flags: <defaults>
</compile_context>

<pallas_src>
import functools

import numpy as np
import jax
import jax.numpy as jnp
from jax.experimental import pallas as pl
from jax.experimental.pallas import tpu as pltpu

_PADL = 2          # left zero-pad columns inside every input row block
_LANE = 128


def _rup(v, m):
    return ((v + m - 1) // m) * m


@functools.lru_cache(maxsize=None)
def _vmem_capacity_bytes():
    """Physical VMEM per core; conservative 64 MiB (v7x size) if unknown."""
    try:
        cap = getattr(pltpu.get_tpu_info(), "vmem_capacity_bytes", None)
        if cap:
            return int(cap)
    except Exception:
        pass
    return 64 * 1024 * 1024


@functools.lru_cache(maxsize=None)
def _pltpu_roll_mode():
    """One-time probe: (pltpu.roll usable, direction flipped vs np.roll)."""
    try:
        def k(x_ref, o_ref):
            o_ref[...] = pltpu.roll(x_ref[...], 1, axis=0)

        x = jnp.arange(8 * 128, dtype=jnp.float32).reshape(8, 128)
        out = np.asarray(
            pl.pallas_call(k, out_shape=jax.ShapeDtypeStruct((8, 128),
                                                             jnp.float32))(x))
        if (out == np.asarray(jnp.roll(x, 1, axis=0))).all():
            return True, False
        if (out == np.asarray(jnp.roll(x, -1, axis=0))).all():
            return True, True
    except Exception:
        pass
    return False, False


def _shift_rows(v, shift, use_roll, flip):
    """np.roll(v, shift, axis=0) for a 2D value with a static shift."""
    n = v.shape[0]
    shift = shift % n
    if shift == 0:
        return v
    if use_roll:
        amt = shift if not flip else (n - shift) % n
        return pltpu.roll(v, amt, axis=0)
    return jnp.roll(v, shift, axis=0)


def _block_vmem_bytes(TH, W, WP, C, ce, oe):
    """Rough per-grid-step VMEM footprint (lane/sublane padded), in bytes."""
    TH2, TH4 = TH + 2, TH + 4
    cl, c2l = _rup(C, _LANE), _rup(2 * C, _LANE)
    c3l, c6l = _rup(3 * C, _LANE), _rup(6 * C, _LANE)
    inp = 2 * TH4 * WP * cl * ce                      # double-buffered input
    out = 2 * TH * _rup(W, 8) * c2l * oe              # double-buffered output
    wgt = 2 * 3 * (_rup(3 * C, 8) * cl + _rup(6 * C, 8) * c2l) * ce
    y1 = TH2 * WP * cl * ce                           # conv1 act + halo scratch
    scope = max(TH2 * WP * c3l, TH * WP * c6l) * ce   # shared run_scoped staging
    live = 3 * TH2 * WP * c2l * 4                     # f32 matmul/accum temps
    return inp + out + wgt + y1 + scope + live


def _pick_row_tile(N, H, W, WP, C, ce, oe, budget, row_tile=None):
    """Largest divisor of H that fits the VMEM budget, preferring >=2 steps."""
    if row_tile is not None:
        if H % row_tile != 0:
            raise ValueError("row_tile must divide H")
        return row_tile
    divisors = sorted((d for d in range(1, H + 1) if H % d == 0), reverse=True)
    fitting = [d for d in divisors
               if _block_vmem_bytes(d, W, WP, C, ce, oe) <= budget]
    if not fitting:
        return 1                      # best effort; compiler reports overflow
    preferred = [d for d in fitting if N * (H // d) >= 2]   # megacore / pipeline
    return preferred[0] if preferred else fitting[0]


def _dense_block_kernel(x_ref, w1_ref, b1_ref, w2_ref, b2_ref, o_ref, y1_ref,
                        *, W, C, TH, WP, use_roll, flip):
    # x_ref : (1, TH+4, WP, C)  zero-padded input row block (2-row halo; image
    #                           column c lives at block column c + _PADL).
    # w1_ref: (3, 3C, C)        conv1 weight; w1_ref[kw] rows ordered (kh, cin).
    # w2_ref: (3, 6C, 2C)       conv2 weight; rows ordered (kh, [x | y1] chans).
    # b1/b2 : (1, C) / (1, 2C)  f32 biases.
    # o_ref : (1, TH, W, 2C)    output row block (NHWC).
    # y1_ref: (TH+2, WP, C)     conv1 activation + 1-pixel halo (VMEM only).
    r = pl.program_id(1)
    nr = pl.num_programs(1)
    TH2 = TH + 2
    C2 = 2 * C
    cdt = y1_ref.dtype

    # ---- conv1 + LeakyReLU on the (TH+2, WP) extended window --------------
    def conv1_scope(p1_ref):
        x = x_ref[0]
        # Stage only the 3 vertical taps: leading-dim row slices are
        # relayout-free.  (Column stores are unmasked when C % 128 == 0.)
        for kh in range(3):
            p1_ref[:, kh * C:(kh + 1) * C] = (
                x[kh:kh + TH2].reshape(TH2 * WP, C))
        acc = None
        for kw in range(3):
            t = jnp.dot(p1_ref[...], w1_ref[kw],
                        preferred_element_type=jnp.float32)
            # output col p needs the kh-stacked input at col p + kw - 1
            t = _shift_rows(t, 1 - kw, use_roll, flip)
            acc = t if acc is None else acc + t
        y1 = acc + b1_ref[...]
        y1 = jnp.where(y1 >= 0.0, y1, 0.2 * y1)            # leaky_relu(0.2)
        y1_ref[...] = y1.reshape(TH2, WP, C).astype(cdt)

    pl.run_scoped(conv1_scope, pltpu.VMEM((TH2 * WP, 3 * C), cdt))

    # Zero the ring of y1 that conv2 must see as the concat's zero padding:
    # the two out-of-image columns are compile-time static stores; the
    # out-of-image rows only exist for the first / last row block (pl.when),
    # so interior blocks do no masking work at all.
    y1_ref[:, _PADL - 1:_PADL, :] = jnp.zeros((TH2, 1, C), cdt)
    y1_ref[:, _PADL + W:, :] = jnp.zeros((TH2, WP - _PADL - W, C), cdt)

    @pl.when(r == 0)
    def _():
        y1_ref[0:1, :, :] = jnp.zeros((1, WP, C), cdt)

    @pl.when(r == nr - 1)
    def _():
        y1_ref[TH + 1:TH + 2, :, :] = jnp.zeros((1, WP, C), cdt)

    # ---- conv2 + LeakyReLU over the virtual concat [x, y1] -----------------
    # The (N, H, W, 2C) concatenated tensor never exists in HBM: its x half is
    # read straight from the input block and its y1 half from the VMEM scratch.
    def conv2_scope(p2_ref):
        x = x_ref[0]
        for kh in range(3):
            p2_ref[:, 2 * kh * C:(2 * kh + 1) * C] = (
                x[kh + 1:kh + 1 + TH].reshape(TH * WP, C))
            p2_ref[:, (2 * kh + 1) * C:(2 * kh + 2) * C] = (
                y1_ref[kh:kh + TH].reshape(TH * WP, C))
        acc = None
        for kw in range(3):
            t = jnp.dot(p2_ref[...], w2_ref[kw],
                        preferred_element_type=jnp.float32)
            # out col j needs the stacked concat at block col j + _PADL-1 + kw
            t = _shift_rows(t, -(_PADL - 1 + kw), use_roll, flip)
            acc = t if acc is None else acc + t
        y2 = acc + b2_ref[...]
        y2 = jnp.where(y2 >= 0.0, y2, 0.2 * y2)
        y2 = y2.reshape(TH, WP, C2)
        o_ref[0] = y2[:, :W, :].astype(o_ref.dtype)         # aligned (col 0) slice

    pl.run_scoped(conv2_scope, pltpu.VMEM((TH * WP, 6 * C), cdt))


@functools.partial(jax.jit,
                   static_argnames=("TH", "WP", "compute_dtype", "out_layout",
                                    "vmem_limit", "use_roll", "flip"))
def _dense_block_jit(x_nchw, params, *, TH, WP, compute_dtype, out_layout,
                     vmem_limit, use_roll, flip):
    N, C, H, W = x_nchw.shape
    R = H // TH
    C2 = 2 * C
    cdt = compute_dtype
    odt = x_nchw.dtype

    # Per-kw-tap weight layout: w*[kw] has rows ordered (kh, cin); cin follows
    # torch's concat order (x channels first, conv1 channels second).
    w1k = jnp.transpose(params["w1"], (3, 2, 1, 0)).reshape(3, 3 * C, C)
    w2k = jnp.transpose(params["w2"], (3, 2, 1, 0)).reshape(3, 3 * C2, C2)
    w1k = w1k.astype(cdt)
    w2k = w2k.astype(cdt)
    b1 = params["b1"].reshape(1, C).astype(jnp.float32)
    b2 = params["b2"].reshape(1, C2).astype(jnp.float32)

    # NCHW -> NHWC, zero pad (2 rows top/bottom, 2+slack cols), then gather
    # overlapping row blocks with a 2-row halo.  One fused XLA producer.
    # TODO(synk): replace the gather with element-offset input windows or a
    # manual double-buffered DMA so the kernel reads xp directly.
    xp = jnp.pad(jnp.transpose(x_nchw, (0, 2, 3, 1)).astype(cdt),
                 ((0, 0), (2, 2), (_PADL, WP - W - _PADL), (0, 0)))
    rows = jnp.arange(R)[:, None] * TH + jnp.arange(TH + 4)[None, :]
    x_blocks = xp[:, rows].reshape(N * R, TH + 4, WP, C)

    kernel = functools.partial(_dense_block_kernel, W=W, C=C, TH=TH, WP=WP,
                               use_roll=use_roll, flip=flip)
    out = pl.pallas_call(
        kernel,
        out_shape=jax.ShapeDtypeStruct((N, H, W, C2), odt),
        grid_spec=pltpu.PrefetchScalarGridSpec(
            num_scalar_prefetch=0,
            grid=(N, R),
            in_specs=[
                pl.BlockSpec((1, TH + 4, WP, C),
                             lambda n, r: (n * R + r, 0, 0, 0)),
                pl.BlockSpec((3, 3 * C, C), lambda n, r: (0, 0, 0)),
                pl.BlockSpec((1, C), lambda n, r: (0, 0)),
                pl.BlockSpec((3, 3 * C2, C2), lambda n, r: (0, 0, 0)),
                pl.BlockSpec((1, C2), lambda n, r: (0, 0)),
            ],
            out_specs=pl.BlockSpec((1, TH, W, C2), lambda n, r: (n, r, 0, 0)),
            scratch_shapes=[pltpu.VMEM((TH + 2, WP, C), cdt)],
        ),
        compiler_params=pltpu.CompilerParams(
            dimension_semantics=("parallel", "parallel"),
            vmem_limit_bytes=vmem_limit),
    )(x_blocks, w1k, b1, w2k, b2)

    if out_layout == "NHWC":
        return out
    # NCHW for interface parity with the PyTorch module.
    return jnp.transpose(out, (0, 3, 1, 2))


def dense_block_forward(x_nchw, params, row_tile=None, compute_dtype=None,
                        out_layout="NCHW"):
    """DenseBlock forward.  Input NCHW; output NCHW (or NHWC if requested)."""
    N, C, H, W = x_nchw.shape
    cdt = np.dtype(compute_dtype) if compute_dtype is not None else np.dtype(
        x_nchw.dtype)
    odt = np.dtype(x_nchw.dtype)
    WP = _rup(W + 4, 8)                       # padded block width (8-aligned)

    cap = _vmem_capacity_bytes()
    vmem_limit = int(cap * 0.85)              # scoped-VMEM limit for Mosaic
    budget = int(vmem_limit * 0.8)            # tile-picker budget (headroom)
    TH = _pick_row_tile(N, H, W, WP, C, cdt.itemsize, odt.itemsize, budget,
                        row_tile)
    use_roll, flip = _pltpu_roll_mode()
    return _dense_block_jit(x_nchw, params, TH=TH, WP=WP, compute_dtype=cdt,
                            out_layout=out_layout, vmem_limit=vmem_limit,
                            use_roll=use_roll, flip=flip)


def init_dense_block_params(key, channels):
    """Deterministic params mirroring nn.Conv2d default init shapes."""
    def conv_params(k, cin, cout):
        k1, k2 = jax.random.split(k)
        bound = 1.0 / jnp.sqrt(cin * 9.0)
        w = jax.random.uniform(k1, (cout, cin, 3, 3), jnp.float32,
                               minval=-bound, maxval=bound)
        b = jax.random.uniform(k2, (cout,), jnp.float32,
                               minval=-bound, maxval=bound)
        return w, b

    k1, k2 = jax.random.split(key)
    w1, b1 = conv_params(k1, channels, channels)
    w2, b2 = conv_params(k2, 2 * channels, 2 * channels)
    return {"w1": w1, "b1": b1, "w2": w2, "b2": b2}


def _reference_forward(x_nchw, params):
    """Pure-JAX reference (lax conv) for the correctness check."""
    def conv(x, w, b):
        y = jax.lax.conv_general_dilated(
            x, w, window_strides=(1, 1), padding=((1, 1), (1, 1)),
            dimension_numbers=("NCHW", "OIHW", "NCHW"))
        y = y + b[None, :, None, None]
        return jnp.where(y >= 0.0, y, 0.2 * y)

    y1 = conv(x_nchw, params["w1"], params["b1"])
    cat = jnp.concatenate([x_nchw, y1], axis=1)
    return conv(cat, params["w2"], params["b2"])


if __name__ == "__main__":
    batch, channels, spatial = 2, 4, 16
    key = jax.random.PRNGKey(0)
    k_x, k_p = jax.random.split(key)

    x = jax.random.normal(k_x, (batch, channels, spatial, spatial),
                          jnp.float32)
    params = init_dense_block_params(k_p, channels)
    ref = _reference_forward(x, params)

    # 1) Auto-picked row tile, f32 compute: tight check vs lax reference.
    out = jax.block_until_ready(dense_block_forward(x, params))
    assert out.shape == (batch, 2 * channels, spatial, spatial)
    err = float(jnp.max(jnp.abs(out - ref)))
    assert jnp.allclose(out, ref, atol=1e-3, rtol=1e-3), err

    # 2) Forced small row tile: exercises interior row blocks + cross-block
    #    halos and the pl.when edge masking.
    out4 = jax.block_until_ready(dense_block_forward(x, params, row_tile=4))
    err4 = float(jnp.max(jnp.abs(out4 - ref)))
    assert jnp.allclose(out4, ref, atol=1e-3, rtol=1e-3), err4

    # 3) bf16 MXU path (f32 accumulation): loose tolerance for bf16 operands.
    outb = jax.block_until_ready(
        dense_block_forward(x, params, compute_dtype=jnp.bfloat16))
    errb = float(jnp.max(jnp.abs(outb.astype(jnp.float32) - ref)))
    assert errb < 0.25, errb

    print("KERNEL_OK")
</pallas_src>

<mosaic_0001>
module attributes {stable_mosaic.version = 11 : i64} {
  func.func @k(%arg0: memref<8x128xf32, #tpu.memory_space<vmem>>, %arg1: memref<8x128xf32, #tpu.memory_space<vmem>>) attributes {dimension_semantics = [], scalar_prefetch = 0 : i64, scratch_operands = 0 : i64, tpu.core_type = #tpu.core_type<tc>} {
    %c0 = arith.constant 0 : index
    %c0_0 = arith.constant 0 : index
    %0 = vector.load %arg0[%c0, %c0_0] : memref<8x128xf32, #tpu.memory_space<vmem>>, vector<8x128xf32>
    %c1_i32 = arith.constant 1 : i32
    %1 = tpu.dynamic_rotate %0 by %c1_i32 dim 0 : vector<8x128xf32>, i32 -> vector<8x128xf32>
    %c0_1 = arith.constant 0 : index
    %c0_2 = arith.constant 0 : index
    %2 = vector.load %arg1[%c0_1, %c0_2] : memref<8x128xf32, #tpu.memory_space<vmem>>, vector<8x128xf32>
    tpu.vector_store %arg1[%c0_1, %c0_2], %1 {strides = array<i32>} : memref<8x128xf32, #tpu.memory_space<vmem>>, vector<8x128xf32>,
    return
  }
}

module attributes {stable_mosaic.version = 11 : i64} {
  func.func @_dense_block_kernel(%arg0: i32, %arg1: i32, %arg2: memref<1x20x24x4xf32, #tpu.memory_space<vmem>>, %arg3: memref<3x12x4xf32, #tpu.memory_space<vmem>>, %arg4: memref<1x4xf32, #tpu.memory_space<vmem>>, %arg5: memref<3x24x8xf32, #tpu.memory_space<vmem>>, %arg6: memref<1x8xf32, #tpu.memory_space<vmem>>, %arg7: memref<1x16x16x8xf32, #tpu.memory_space<vmem>>, %arg8: memref<18x24x4xf32, #tpu.memory_space<vmem>>) attributes {dimension_semantics = [#tpu.dimension_semantics<parallel>, #tpu.dimension_semantics<parallel>], iteration_bounds = array<i64: 2, 1>, scalar_prefetch = 0 : i64, scratch_operands = 1 : i64, tpu.core_type = #tpu.core_type<tc>, window_params = [{transform_indices = @transform_0, window_bounds = array<i64: 1, 20, 24, 4>}, {pipeline_mode = #tpu.pipeline_mode<synchronous>, transform_indices = @transform_1, window_bounds = array<i64: 3, 12, 4>}, {pipeline_mode = #tpu.pipeline_mode<synchronous>, transform_indices = @transform_2, window_bounds = array<i64: 1, 4>}, {pipeline_mode = #tpu.pipeline_mode<synchronous>, transform_indices = @transform_3, window_bounds = array<i64: 3, 24, 8>}, {pipeline_mode = #tpu.pipeline_mode<synchronous>, transform_indices = @transform_4, window_bounds = array<i64: 1, 8>}, {transform_indices = @transform_5, window_bounds = array<i64: 1, 16, 16, 8>}]} {
    "tpu.region"() ({
      %alloca = memref.alloca() : memref<432x12xf32, #tpu.memory_space<vmem>>
      %c0_7 = arith.constant 0 : index
      %c0_8 = arith.constant 0 : index
      %c0_9 = arith.constant 0 : index
      %c0_10 = arith.constant 0 : index
      %10 = vector.load %arg2[%c0_7, %c0_8, %c0_9, %c0_10] : memref<1x20x24x4xf32, #tpu.memory_space<vmem>>, vector<1x20x24x4xf32>
      %11 = vector.shape_cast %10 : vector<1x20x24x4xf32> to vector<20x24x4xf32>
      %12 = vector.extract_strided_slice %11 {offsets = [0, 0, 0], sizes = [18, 24, 4], strides = [1, 1, 1]} : vector<20x24x4xf32> to vector<18x24x4xf32>
      %13 = vector.shape_cast %12 : vector<18x24x4xf32> to vector<432x4xf32>
      %c0_11 = arith.constant 0 : index
      %c0_12 = arith.constant 0 : index
      %14 = vector.load %alloca[%c0_11, %c0_12] : memref<432x12xf32, #tpu.memory_space<vmem>>, vector<432x4xf32>
      tpu.vector_store %alloca[%c0_11, %c0_12], %13 {strides = array<i32>} : memref<432x12xf32, #tpu.memory_space<vmem>>, vector<432x4xf32>,
      %15 = vector.extract_strided_slice %11 {offsets = [1, 0, 0], sizes = [18, 24, 4], strides = [1, 1, 1]} : vector<20x24x4xf32> to vector<18x24x4xf32>
      %16 = vector.shape_cast %15 : vector<18x24x4xf32> to vector<432x4xf32>
      %c0_13 = arith.constant 0 : index
      %c4 = arith.constant 4 : index
      %17 = vector.load %alloca[%c0_13, %c4] : memref<432x12xf32, #tpu.memory_space<vmem>>, vector<432x4xf32>
      tpu.vector_store %alloca[%c0_13, %c4], %16 {strides = array<i32>} : memref<432x12xf32, #tpu.memory_space<vmem>>, vector<432x4xf32>,
      %18 = vector.extract_strided_slice %11 {offsets = [2, 0, 0], sizes = [18, 24, 4], strides = [1, 1, 1]} : vector<20x24x4xf32> to vector<18x24x4xf32>
      %19 = vector.shape_cast %18 : vector<18x24x4xf32> to vector<432x4xf32>
      %c0_14 = arith.constant 0 : index
      %c8 = arith.constant 8 : index
      %20 = vector.load %alloca[%c0_14, %c8] : memref<432x12xf32, #tpu.memory_space<vmem>>, vector<432x4xf32>
      tpu.vector_store %alloca[%c0_14, %c8], %19 {strides = array<i32>} : memref<432x12xf32, #tpu.memory_space<vmem>>, vector<432x4xf32>,
      %c0_15 = arith.constant 0 : index
      %c0_16 = arith.constant 0 : index
      %21 = vector.load %alloca[%c0_15, %c0_16] : memref<432x12xf32, #tpu.memory_space<vmem>>, vector<432x12xf32>
      %c0_17 = arith.constant 0 : index
      %c0_18 = arith.constant 0 : index
      %c0_19 = arith.constant 0 : index
      %22 = vector.load %arg3[%c0_17, %c0_18, %c0_19] : memref<3x12x4xf32, #tpu.memory_space<vmem>>, vector<1x12x4xf32>
      %23 = vector.shape_cast %22 : vector<1x12x4xf32> to vector<12x4xf32>
      %cst_20 = arith.constant dense<0.000000e+00> : vector<432x4xf32>
      %24 = tpu.matmul %21, %23, %cst_20 {dimension_numbers = #tpu.dot_dimension_numbers<[1], [0], [0], [1], [0, 0, 1, 1], [], []>} : vector<432x12xf32>, vector<12x4xf32>, vector<432x4xf32> -> vector<432x4xf32>
      %25 = vector.extract_strided_slice %24 {offsets = [431, 0], sizes = [1, 4], strides = [1, 1]} : vector<432x4xf32> to vector<1x4xf32>
      %26 = vector.extract_strided_slice %24 {offsets = [0, 0], sizes = [431, 4], strides = [1, 1]} : vector<432x4xf32> to vector<431x4xf32>
      %27 = tpu.concatenate %25, %26 in 0 : vector<1x4xf32>, vector<431x4xf32> -> vector<432x4xf32>
      %c0_21 = arith.constant 0 : index
      %c0_22 = arith.constant 0 : index
      %28 = vector.load %alloca[%c0_21, %c0_22] : memref<432x12xf32, #tpu.memory_space<vmem>>, vector<432x12xf32>
      %c1_23 = arith.constant 1 : index
      %c0_24 = arith.constant 0 : index
      %c0_25 = arith.constant 0 : index
      %29 = vector.load %arg3[%c1_23, %c0_24, %c0_25] : memref<3x12x4xf32, #tpu.memory_space<vmem>>, vector<1x12x4xf32>
      %30 = vector.shape_cast %29 : vector<1x12x4xf32> to vector<12x4xf32>
      %cst_26 = arith.constant dense<0.000000e+00> : vector<432x4xf32>
      %31 = tpu.matmul %28, %30, %cst_26 {dimension_numbers = #tpu.dot_dimension_numbers<[1], [0], [0], [1], [0, 0, 1, 1], [], []>} : vector<432x12xf32>, vector<12x4xf32>, vector<432x4xf32> -> vector<432x4xf32>
      %32 = arith.addf %27, %31 : vector<432x4xf32>
      %c0_27 = arith.constant 0 : index
      %c0_28 = arith.constant 0 : index
      %33 = vector.load %alloca[%c0_27, %c0_28] : memref<432x12xf32, #tpu.memory_space<vmem>>, vector<432x12xf32>
      %c2 = arith.constant 2 : index
      %c0_29 = arith.constant 0 : index
      %c0_30 = arith.constant 0 : index
      %34 = vector.load %arg3[%c2, %c0_29, %c0_30] : memref<3x12x4xf32, #tpu.memory_space<vmem>>, vector<1x12x4xf32>
      %35 = vector.shape_cast %34 : vector<1x12x4xf32> to vector<12x4xf32>
      %cst_31 = arith.constant dense<0.000000e+00> : vector<432x4xf32>
      %36 = tpu.matmul %33, %35, %cst_31 {dimension_numbers = #tpu.dot_dimension_numbers<[1], [0], [0], [1], [0, 0, 1, 1], [], []>} : vector<432x12xf32>, vector<12x4xf32>, vector<432x4xf32> -> vector<432x4xf32>
      %37 = vector.extract_strided_slice %36 {offsets = [1, 0], sizes = [431, 4], strides = [1, 1]} : vector<432x4xf32> to vector<431x4xf32>
      %38 = vector.extract_strided_slice %36 {offsets = [0, 0], sizes = [1, 4], strides = [1, 1]} : vector<432x4xf32> to vector<1x4xf32>
      %39 = tpu.concatenate %37, %38 in 0 : vector<431x4xf32>, vector<1x4xf32> -> vector<432x4xf32>
      %40 = arith.addf %32, %39 : vector<432x4xf32>
      %c0_32 = arith.constant 0 : index
      %c0_33 = arith.constant 0 : index
      %41 = vector.load %arg4[%c0_32, %c0_33] : memref<1x4xf32, #tpu.memory_space<vmem>>, vector<1x4xf32>
      %42 = vector.broadcast %41 : vector<1x4xf32> to vector<432x4xf32>
      %43 = arith.addf %40, %42 : vector<432x4xf32>
      %cst_34 = arith.constant 0.000000e+00 : f32
      %44 = vector.broadcast %cst_34 : f32 to vector<432x4xf32>
      %45 = arith.cmpf oge, %43, %44 : vector<432x4xf32>
      %cst_35 = arith.constant 2.000000e-01 : f32
      %46 = vector.broadcast %cst_35 : f32 to vector<432x4xf32>
      %47 = arith.mulf %46, %43 : vector<432x4xf32>
      %48 = arith.select %45, %43, %47 : vector<432x4xi1>, vector<432x4xf32>
      %49 = vector.shape_cast %48 : vector<432x4xf32> to vector<18x24x4xf32>
      %c0_36 = arith.constant 0 : index
      %c0_37 = arith.constant 0 : index
      %c0_38 = arith.constant 0 : index
      %50 = vector.load %arg8[%c0_36, %c0_37, %c0_38] : memref<18x24x4xf32, #tpu.memory_space<vmem>>, vector<18x24x4xf32>
      tpu.vector_store %arg8[%c0_36, %c0_37, %c0_38], %49 {strides = array<i32>} : memref<18x24x4xf32, #tpu.memory_space<vmem>>, vector<18x24x4xf32>,
      tpu.yield
    }) : () -> ()
    %cst = arith.constant 0.000000e+00 : f32
    %0 = vector.broadcast %cst : f32 to vector<18x1x4xf32>
    %c0 = arith.constant 0 : index
    %c1 = arith.constant 1 : index
    %c0_0 = arith.constant 0 : index
    %1 = vector.load %arg8[%c0, %c1, %c0_0] : memref<18x24x4xf32, #tpu.memory_space<vmem>>, vector<18x1x4xf32>
    tpu.vector_store %arg8[%c0, %c1, %c0_0], %0 {strides = array<i32>} : memref<18x24x4xf32, #tpu.memory_space<vmem>>, vector<18x1x4xf32>,
    %cst_1 = arith.constant 0.000000e+00 : f32
    %2 = vector.broadcast %cst_1 : f32 to vector<18x6x4xf32>
    %c0_2 = arith.constant 0 : index
    %c18 = arith.constant 18 : index
    %c0_3 = arith.constant 0 : index
    %3 = vector.load %arg8[%c0_2, %c18, %c0_3] : memref<18x24x4xf32, #tpu.memory_space<vmem>>, vector<18x6x4xf32>
    tpu.vector_store %arg8[%c0_2, %c18, %c0_3], %2 {strides = array<i32>} : memref<18x24x4xf32, #tpu.memory_space<vmem>>, vector<18x6x4xf32>,
    %c0_i32 = arith.constant 0 : i32
    %4 = arith.cmpi eq, %arg1, %c0_i32 : i32
    %5 = arith.extui %4 : i1 to i32
    %c0_i32_4 = arith.constant 0 : i32
    %6 = arith.cmpi ne, %5, %c0_i32_4 : i32
    scf.if %6 {
      %cst_7 = arith.constant 0.000000e+00 : f32
      %10 = vector.broadcast %cst_7 : f32 to vector<1x24x4xf32>
      %c0_8 = arith.constant 0 : index
      %c0_9 = arith.constant 0 : index
      %c0_10 = arith.constant 0 : index
      %11 = vector.load %arg8[%c0_8, %c0_9, %c0_10] : memref<18x24x4xf32, #tpu.memory_space<vmem>>, vector<1x24x4xf32>
      tpu.vector_store %arg8[%c0_8, %c0_9, %c0_10], %10 {strides = array<i32>} : memref<18x24x4xf32, #tpu.memory_space<vmem>>, vector<1x24x4xf32>,
    } else {
    }
    %c0_i32_5 = arith.constant 0 : i32
    %7 = arith.cmpi eq, %arg1, %c0_i32_5 : i32
    %8 = arith.extui %7 : i1 to i32
    %c0_i32_6 = arith.constant 0 : i32
    %9 = arith.cmpi ne, %8, %c0_i32_6 : i32
    scf.if %9 {
      %cst_7 = arith.constant 0.000000e+00 : f32
      %10 = vector.broadcast %cst_7 : f32 to vector<1x24x4xf32>
      %c17 = arith.constant 17 : index
      %c0_8 = arith.constant 0 : index
      %c0_9 = arith.constant 0 : index
      %11 = vector.load %arg8[%c17, %c0_8, %c0_9] : memref<18x24x4xf32, #tpu.memory_space<vmem>>, vector<1x24x4xf32>
      tpu.vector_store %arg8[%c17, %c0_8, %c0_9], %10 {strides = array<i32>} : memref<18x24x4xf32, #tpu.memory_space<vmem>>, vector<1x24x4xf32>,
    } else {
    }
    "tpu.region"() ({
      %alloca = memref.alloca() : memref<384x24xf32, #tpu.memory_space<vmem>>
      %c0_7 = arith.constant 0 : index
      %c0_8 = arith.constant 0 : index
      %c0_9 = arith.constant 0 : index
      %c0_10 = arith.constant 0 : index
      %10 = vector.load %arg2[%c0_7, %c0_8, %c0_9, %c0_10] : memref<1x20x24x4xf32, #tpu.memory_space<vmem>>, vector<1x20x24x4xf32>
      %11 = vector.shape_cast %10 : vector<1x20x24x4xf32> to vector<20x24x4xf32>
      %12 = vector.extract_strided_slice %11 {offsets = [1, 0, 0], sizes = [16, 24, 4], strides = [1, 1, 1]} : vector<20x24x4xf32> to vector<16x24x4xf32>
      %13 = vector.shape_cast %12 : vector<16x24x4xf32> to vector<384x4xf32>
      %c0_11 = arith.constant 0 : index
      %c0_12 = arith.constant 0 : index
      %14 = vector.load %alloca[%c0_11, %c0_12] : memref<384x24xf32, #tpu.memory_space<vmem>>, vector<384x4xf32>
      tpu.vector_store %alloca[%c0_11, %c0_12], %13 {strides = array<i32>} : memref<384x24xf32, #tpu.memory_space<vmem>>, vector<384x4xf32>,
      %c0_13 = arith.constant 0 : index
      %c0_14 = arith.constant 0 : index
      %c0_15 = arith.constant 0 : index
      %15 = vector.load %arg8[%c0_13, %c0_14, %c0_15] : memref<18x24x4xf32, #tpu.memory_space<vmem>>, vector<16x24x4xf32>
      %16 = vector.shape_cast %15 : vector<16x24x4xf32> to vector<384x4xf32>
      %c0_16 = arith.constant 0 : index
      %c4 = arith.constant 4 : index
      %17 = vector.load %alloca[%c0_16, %c4] : memref<384x24xf32, #tpu.memory_space<vmem>>, vector<384x4xf32>
      tpu.vector_store %alloca[%c0_16, %c4], %16 {strides = array<i32>} : memref<384x24xf32, #tpu.memory_space<vmem>>, vector<384x4xf32>,
      %18 = vector.extract_strided_slice %11 {offsets = [2, 0, 0], sizes = [16, 24, 4], strides = [1, 1, 1]} : vector<20x24x4xf32> to vector<16x24x4xf32>
      %19 = vector.shape_cast %18 : vector<16x24x4xf32> to vector<384x4xf32>
      %c0_17 = arith.constant 0 : index
      %c8 = arith.constant 8 : index
      %20 = vector.load %alloca[%c0_17, %c8] : memref<384x24xf32, #tpu.memory_space<vmem>>, vector<384x4xf32>
      tpu.vector_store %alloca[%c0_17, %c8], %19 {strides = array<i32>} : memref<384x24xf32, #tpu.memory_space<vmem>>, vector<384x4xf32>,
      %c1_18 = arith.constant 1 : index
      %c0_19 = arith.constant 0 : index
      %c0_20 = arith.constant 0 : index
      %21 = vector.load %arg8[%c1_18, %c0_19, %c0_20] : memref<18x24x4xf32, #tpu.memory_space<vmem>>, vector<16x24x4xf32>
      %22 = vector.shape_cast %21 : vector<16x24x4xf32> to vector<384x4xf32>
      %c0_21 = arith.constant 0 : index
      %c12 = arith.constant 12 : index
      %23 = vector.load %alloca[%c0_21, %c12] : memref<384x24xf32, #tpu.memory_space<vmem>>, vector<384x4xf32>
      tpu.vector_store %alloca[%c0_21, %c12], %22 {strides = array<i32>} : memref<384x24xf32, #tpu.memory_space<vmem>>, vector<384x4xf32>,
      %24 = vector.extract_strided_slice %11 {offsets = [3, 0, 0], sizes = [16, 24, 4], strides = [1, 1, 1]} : vector<20x24x4xf32> to vector<16x24x4xf32>
      %25 = vector.shape_cast %24 : vector<16x24x4xf32> to vector<384x4xf32>
      %c0_22 = arith.constant 0 : index
      %c16 = arith.constant 16 : index
      %26 = vector.load %alloca[%c0_22, %c16] : memref<384x24xf32, #tpu.memory_space<vmem>>, vector<384x4xf32>
      tpu.vector_store %alloca[%c0_22, %c16], %25 {strides = array<i32>} : memref<384x24xf32, #tpu.memory_space<vmem>>, vector<384x4xf32>,
      %c2 = arith.constant 2 : index
      %c0_23 = arith.constant 0 : index
      %c0_24 = arith.constant 0 : index
      %27 = vector.load %arg8[%c2, %c0_23, %c0_24] : memref<18x24x4xf32, #tpu.memory_space<vmem>>, vector<16x24x4xf32>
      %28 = vector.shape_cast %27 : vector<16x24x4xf32> to vector<384x4xf32>
      %c0_25 = arith.constant 0 : index
      %c20 = arith.constant 20 : index
      %29 = vector.load %alloca[%c0_25, %c20] : memref<384x24xf32, #tpu.memory_space<vmem>>, vector<384x4xf32>
      tpu.vector_store %alloca[%c0_25, %c20], %28 {strides = array<i32>} : memref<384x24xf32, #tpu.memory_space<vmem>>, vector<384x4xf32>,
      %c0_26 = arith.constant 0 : index
      %c0_27 = arith.constant 0 : index
      %30 = vector.load %alloca[%c0_26, %c0_27] : memref<384x24xf32, #tpu.memory_space<vmem>>, vector<384x24xf32>
      %c0_28 = arith.constant 0 : index
      %c0_29 = arith.constant 0 : index
      %c0_30 = arith.constant 0 : index
      %31 = vector.load %arg5[%c0_28, %c0_29, %c0_30] : memref<3x24x8xf32, #tpu.memory_space<vmem>>, vector<1x24x8xf32>
      %32 = vector.shape_cast %31 : vector<1x24x8xf32> to vector<24x8xf32>
      %cst_31 = arith.constant dense<0.000000e+00> : vector<384x8xf32>
      %33 = tpu.matmul %30, %32, %cst_31 {dimension_numbers = #tpu.dot_dimension_numbers<[1], [0], [0], [1], [0, 0, 1, 1], [], []>} : vector<384x24xf32>, vector<24x8xf32>, vector<384x8xf32> -> vector<384x8xf32>
      %34 = vector.extract_strided_slice %33 {offsets = [1, 0], sizes = [383, 8], strides = [1, 1]} : vector<384x8xf32> to vector<383x8xf32>
      %35 = vector.extract_strided_slice %33 {offsets = [0, 0], sizes = [1, 8], strides = [1, 1]} : vector<384x8xf32> to vector<1x8xf32>
      %36 = tpu.concatenate %34, %35 in 0 : vector<383x8xf32>, vector<1x8xf32> -> vector<384x8xf32>
      %c0_32 = arith.constant 0 : index
      %c0_33 = arith.constant 0 : index
      %37 = vector.load %alloca[%c0_32, %c0_33] : memref<384x24xf32, #tpu.memory_space<vmem>>, vector<384x24xf32>
      %c1_34 = arith.constant 1 : index
      %c0_35 = arith.constant 0 : index
      %c0_36 = arith.constant 0 : index
      %38 = vector.load %arg5[%c1_34, %c0_35, %c0_36] : memref<3x24x8xf32, #tpu.memory_space<vmem>>, vector<1x24x8xf32>
      %39 = vector.shape_cast %38 : vector<1x24x8xf32> to vector<24x8xf32>
      %cst_37 = arith.constant dense<0.000000e+00> : vector<384x8xf32>
      %40 = tpu.matmul %37, %39, %cst_37 {dimension_numbers = #tpu.dot_dimension_numbers<[1], [0], [0], [1], [0, 0, 1, 1], [], []>} : vector<384x24xf32>, vector<24x8xf32>, vector<384x8xf32> -> vector<384x8xf32>
      %41 = vector.extract_strided_slice %40 {offsets = [2, 0], sizes = [382, 8], strides = [1, 1]} : vector<384x8xf32> to vector<382x8xf32>
      %42 = vector.extract_strided_slice %40 {offsets = [0, 0], sizes = [2, 8], strides = [1, 1]} : vector<384x8xf32> to vector<2x8xf32>
      %43 = tpu.concatenate %41, %42 in 0 : vector<382x8xf32>, vector<2x8xf32> -> vector<384x8xf32>
      %44 = arith.addf %36, %43 : vector<384x8xf32>
      %c0_38 = arith.constant 0 : index
      %c0_39 = arith.constant 0 : index
      %45 = vector.load %alloca[%c0_38, %c0_39] : memref<384x24xf32, #tpu.memory_space<vmem>>, vector<384x24xf32>
      %c2_40 = arith.constant 2 : index
      %c0_41 = arith.constant 0 : index
      %c0_42 = arith.constant 0 : index
      %46 = vector.load %arg5[%c2_40, %c0_41, %c0_42] : memref<3x24x8xf32, #tpu.memory_space<vmem>>, vector<1x24x8xf32>
      %47 = vector.shape_cast %46 : vector<1x24x8xf32> to vector<24x8xf32>
      %cst_43 = arith.constant dense<0.000000e+00> : vector<384x8xf32>
      %48 = tpu.matmul %45, %47, %cst_43 {dimension_numbers = #tpu.dot_dimension_numbers<[1], [0], [0], [1], [0, 0, 1, 1], [], []>} : vector<384x24xf32>, vector<24x8xf32>, vector<384x8xf32> -> vector<384x8xf32>
      %49 = vector.extract_strided_slice %48 {offsets = [3, 0], sizes = [381, 8], strides = [1, 1]} : vector<384x8xf32> to vector<381x8xf32>
      %50 = vector.extract_strided_slice %48 {offsets = [0, 0], sizes = [3, 8], strides = [1, 1]} : vector<384x8xf32> to vector<3x8xf32>
      %51 = tpu.concatenate %49, %50 in 0 : vector<381x8xf32>, vector<3x8xf32> -> vector<384x8xf32>
      %52 = arith.addf %44, %51 : vector<384x8xf32>
      %c0_44 = arith.constant 0 : index
      %c0_45 = arith.constant 0 : index
      %53 = vector.load %arg6[%c0_44, %c0_45] : memref<1x8xf32, #tpu.memory_space<vmem>>, vector<1x8xf32>
      %54 = vector.broadcast %53 : vector<1x8xf32> to vector<384x8xf32>
      %55 = arith.addf %52, %54 : vector<384x8xf32>
      %cst_46 = arith.constant 0.000000e+00 : f32
      %56 = vector.broadcast %cst_46 : f32 to vector<384x8xf32>
      %57 = arith.cmpf oge, %55, %56 : vector<384x8xf32>
      %cst_47 = arith.constant 2.000000e-01 : f32
      %58 = vector.broadcast %cst_47 : f32 to vector<384x8xf32>
      %59 = arith.mulf %58, %55 : vector<384x8xf32>
      %60 = arith.select %57, %55, %59 : vector<384x8xi1>, vector<384x8xf32>
      %61 = vector.shape_cast %60 : vector<384x8xf32> to vector<16x24x8xf32>
      %62 = vector.extract_strided_slice %61 {offsets = [0, 0, 0], sizes = [16, 16, 8], strides = [1, 1, 1]} : vector<16x24x8xf32> to vector<16x16x8xf32>
      %c0_48 = arith.constant 0 : index
      %c0_49 = arith.constant 0 : index
      %c0_50 = arith.constant 0 : index
      %c0_51 = arith.constant 0 : index
      %63 = vector.load %arg7[%c0_48, %c0_49, %c0_50, %c0_51] : memref<1x16x16x8xf32, #tpu.memory_space<vmem>>, vector<1x16x16x8xf32>
      %64 = vector.shape_cast %63 : vector<1x16x16x8xf32> to vector<16x16x8xf32>
      %65 = vector.shape_cast %62 : vector<16x16x8xf32> to vector<1x16x16x8xf32>
      tpu.vector_store %arg7[%c0_48, %c0_49, %c0_50, %c0_51], %65 {strides = array<i32>} : memref<1x16x16x8xf32, #tpu.memory_space<vmem>>, vector<1x16x16x8xf32>,
      tpu.yield
    }) : () -> ()
    return
  }
  func.func @transform_0(%arg0: i32, %arg1: i32) -> (i32, i32, i32, i32) {
    %c1_i32 = arith.constant 1 : i32
    %0 = arith.muli %arg0, %c1_i32 : i32
    %1 = arith.addi %0, %arg1 : i32
    %c0_i32 = arith.constant 0 : i32
    %c0_i32_0 = arith.constant 0 : i32
    %c0_i32_1 = arith.constant 0 : i32
    %c0_i32_2 = arith.constant 0 : i32
    return %1, %c0_i32, %c0_i32_0, %c0_i32_1 : i32, i32, i32, i32
  }
  func.func @transform_1(%arg0: i32, %arg1: i32) -> (i32, i32, i32) {
    %c0_i32 = arith.constant 0 : i32
    %c0_i32_0 = arith.constant 0 : i32
    %c0_i32_1 = arith.constant 0 : i32
    %c0_i32_2 = arith.constant 0 : i32
    return %c0_i32, %c0_i32_0, %c0_i32_1 : i32, i32, i32
  }
  func.func @transform_2(%arg0: i32, %arg1: i32) -> (i32, i32) {
    %c0_i32 = arith.constant 0 : i32
    %c0_i32_0 = arith.constant 0 : i32
    %c0_i32_1 = arith.constant 0 : i32
    return %c0_i32, %c0_i32_0 : i32, i32
  }
  func.func @transform_3(%arg0: i32, %arg1: i32) -> (i32, i32, i32) {
    %c0_i32 = arith.constant 0 : i32
    %c0_i32_0 = arith.constant 0 : i32
    %c0_i32_1 = arith.constant 0 : i32
    %c0_i32_2 = arith.constant 0 : i32
    return %c0_i32, %c0_i32_0, %c0_i32_1 : i32, i32, i32
  }
  func.func @transform_4(%arg0: i32, %arg1: i32) -> (i32, i32) {
    %c0_i32 = arith.constant 0 : i32
    %c0_i32_0 = arith.constant 0 : i32
    %c0_i32_1 = arith.constant 0 : i32
    return %c0_i32, %c0_i32_0 : i32, i32
  }
  func.func @transform_5(%arg0: i32, %arg1: i32) -> (i32, i32, i32, i32) {
    %c0_i32 = arith.constant 0 : i32
    %c0_i32_0 = arith.constant 0 : i32
    %c0_i32_1 = arith.constant 0 : i32
    return %arg0, %arg1, %c0_i32, %c0_i32_0 : i32, i32, i32, i32
  }
}

</mosaic_0001>

<bundles_post_ra>
// kernel: tpu_custom_call.1
= control target key start
LH: loop header
LB: loop body
LE: loop exit
PB: predicated region body
PF: predicated region fallthrough
CT: control target
= control target key end

     0   :  { %6 = vsyncpa [#allocation3], 0  ;;  %s125_s0 = inlined_call_operand.hbm [shape: f32[8,128], index: 0, kind: input, shape index: {}]   ;;  %s126_s1 = inlined_call_operand.hbm [shape: f32[8,128], index: 1, kind: output, shape index: {}]  }
   0x1   :  { %7 = vsyncpa [#allocation4], 0  ;;  %s89_s6 = smov [#allocation2]   ;;  %s41_s10 = scalar_lea.hbm %s125_s0, 128 }
   0x2   :  { %s14_s7 = sshll.u32 %s89_s6, 4  ;;  %p42_p0 = scmp.ne.s32.totalorder %s125_s0, %s41_s10  ;;  %s15_s7 = int_to_ptr.vmem [resolvable:$true] %s14_s7 }
   0x3   :  { %p45_p1 = scmp.lt.u32.totalorder %s41_s10, %s125_s0 }
   0x5   :  { %p47_p2 = pnand %p45_p1, %p42_p0 }
   0x7   :  { %50 = shalt.err (!%p47_p2)
}
   0x8   :  { %s51_s15 = scalar_lea.vmem %s15_s7, 128  ;;  %p56_p4 = scmp.lt.s32.totalorder %s15_s7, %s15_s7 }
   0x9   :  { %p52_p3 = scmp.ne.s32.totalorder %s15_s7, %s51_s15  ;;  %p57_p5 = scmp.lt.s32.totalorder %s51_s15, %s51_s15 }
   0xb   :  { %p58_p6 = por %p57_p5, %p56_p4 }
   0xd   :  { %p59_p7 = pnand %p58_p6, %p52_p3 }
   0xf   :  { %62 = shalt.err (!%p59_p7)
}
  0x10   :  { %17 = dma.hbm_to_vmem [thread:$0]  %s125_s0, 128, %s15_s7, [#allocation3]  }
  0x11   :  { %85 = dma.done.wait [#allocation3], 128  }
  0x12   :  { %86 = vsyncadd [#allocation3], 4294967168  ;;  %s90_s18 = smov [#allocation5]   ;;  %v21_v0 = vld [vmem:[#allocation2] sm:$0xff] }
  0x13   :  { %s30_s19 = sshll.u32 %s90_s18, 4  ;;  %v22_v1 = vrot.slane %v21_v0, 7  ;;  %s31_s19 = int_to_ptr.vmem [resolvable:$true] %s30_s19 }
  0x14   :  { %s63_s20 = scalar_lea.vmem %s31_s19, 128  ;;  %p68_p9 = scmp.lt.s32.totalorder %s31_s19, %s31_s19 }
  0x15   :  { %23 = vst [vmem:[#allocation5] sm:$0xff] %v22_v1  ;;  %p64_p8 = scmp.ne.s32.totalorder %s31_s19, %s63_s20  ;;  %p69_p10 = scmp.lt.s32.totalorder %s63_s20, %s63_s20 }
  0x17   :  { %p70_p11 = por %p69_p10, %p68_p9 }
  0x19   :  { %p71_p12 = pnand %p70_p11, %p64_p8 }
  0x1b   :  { %74 = shalt.err (!%p71_p12)
}
  0x1c   :  { %s75_s23 = scalar_lea.hbm %s126_s1, 128 }
  0x1d   :  { %p76_p13 = scmp.ne.s32.totalorder %s126_s1, %s75_s23  ;;  %p79_p0 = scmp.lt.u32.totalorder %s75_s23, %s126_s1 }
  0x1f   :  { %p81_p1 = pnand %p79_p0, %p76_p13 }
  0x21   :  { %84 = shalt.err (!%p81_p1)
}
  0x22   :  { %33 = dma.vmem_to_hbm [thread:$0]  %s31_s19, 128, %s126_s1, [#allocation4]  }
  0x23   :  { %87 = dma.done.wait [#allocation4], 128  }
  0x24   :  { %88 = vsyncadd [#allocation4], 4294967168 }
  0x25   :  { %37 = vsyncpa [#allocation3], 1 }
  0x26   :  { %38 = vsyncpa [#allocation4], 1 }

// kernel: _dense_block_jit.1
= control target key start
LH: loop header
LB: loop body
LE: loop exit
PB: predicated region body
PF: predicated region fallthrough
CT: control target
= control target key end

     0   :  { %s7601_s18 = smov 0   ;;  %s7603_s19 = smov 0   ;;  %s10793_s0 = inlined_call_operand.vmem [shape: f32[2,20,24,4], index: 0, kind: input, shape index: {}]   ;;  %s10794_s1 = inlined_call_operand.vmem [shape: f32[3,12,4], index: 1, kind: input, shape index: {}]   ;;  %s10795_s2 = inlined_call_operand.vmem [shape: f32[1,4], index: 2, kind: input, shape index: {}]   ;;  %s10796_s3 = inlined_call_operand.vmem [shape: f32[3,24,8], index: 3, kind: input, shape index: {}]   ;;  %s10797_s4 = inlined_call_operand.vmem [shape: f32[1,8], index: 4, kind: input, shape index: {}]   ;;  %s10798_s5 = inlined_call_operand.vmem [shape: f32[2,16,16,8], index: 5, kind: output, shape index: {}]  }
   0x1   :  { %s7605_s20 = smov 0  }
   0x2 LB: > { %s27_s21 = sadd.s32 1, %s7556_s19  ;;  %p6308_p0 = scmp.ge.s32.totalorder %s7560_s20, 1  ;;  %s7560_s20 = sphi %s7605_s20, %s15_s20   ;;  %s7556_s19 = sphi %s7603_s19, %s10863_s19   ;;  %s7552_s18 = sphi %s7601_s18, %s10862_s18  }
   0x3   : > { %p29_p1 = scmp.ge.s32.totalorder %s27_s21, 2  ;;  %p205_p2 = scmp.lt.s32.totalorder %s7560_s20, 3 }
   0x5   : > { %s10865_s21 = smov (%p29_p1, %s27_s21), 0  ;;  %p206_p3 = pnand %p6308_p0, %p205_p2 }
   0x6   : > { %p240_p4 = scmp.lt.s32.totalorder (!%p206_p3), %s7552_s18, 1 }
   0x7   : > { %209 = sbr.rel (%p206_p3) target bundleno = 1632 (0x660), region = 40 }
   0xe   : > { %s10867_s18 = smov (!%p240_p4, %s7552_s18), 1 }
   0xf   : > { %s7478_s22 = smul.u32 480, %s10867_s18  ;;  %s6635_s23 = sshll.u32 %s10867_s18, 8 }
  0x10   : > { %s7622_s26 = scalar_lea.vmem %s10798_s5, %s6635_s23 }
  0x11   : > { %s7627_s29 = scalar_lea.vmem %s10793_s0, %s7478_s22 }
  0x12   : > { %v263_v0 = vld [vmem:[%s7627_s29 + $0x30] sm:$0xff]  ;;  %v260_v1 = vld [vmem:[%s7627_s29 + $0x18] sm:$0xff]  ;;  %vm317_vm0 = vcmask 31744   ;;  %s7562_s30 = smov 8   ;;  %s7563_s6 = smov 4   ;;  %v261_v3 = vld [vmem:[%s7627_s29 + $0x20] sm:$0xff] }
  0x13   : > { %v7632_v2 = vld [vmem:[%s7627_s29 + $0x38] sm:$0xff]  ;;  %646 = vrot.lane.b32.xlu1 %v263_v0, %s7562_s30  ;;  %426 = vrot.lane.b32.xlu0 %v260_v1, %s7563_s6  ;;  %321 = vst.msk [vmem:[#allocation3 + $0x18] sm:$0xff] %vm317_vm0, %v260_v1  ;;  %324 = vst.msk [vmem:[#allocation3 + $0x30] sm:$0xff] %vm317_vm0, %v263_v0  ;;  %v262_v4 = vld [vmem:[%s7627_s29 + $0x28] sm:$0xff]  ;;  %vm1082_vm1 = vcmask 1043456   ;;  %vm7564_vm2 = vmmov 1  }
  0x14   : > { %325 = vst.msk [vmem:[#allocation3 + $0x38] sm:$0xff] %vm317_vm0, %v7632_v2  ;;  %322 = vst.msk [vmem:[#allocation3 + $0x20] sm:$0xff] %vm317_vm0, %v261_v3  ;;  %v7645_v5 = vld [vmem:[%s7627_s29 + $0x48] sm:$0xff]  ;;  %v7648_v6 = vld [vmem:[%s7627_s29 + $0x40] sm:$0xff]  ;;  %vm588_vm4 = vcmask 64544   ;;  %vm808_vm5 = vcmask 97344  }
  0x15   : > { %323 = vst.msk [vmem:[#allocation3 + $0x28] sm:$0xff] %vm317_vm0, %v262_v4  ;;  %v7651_v7 = vld [vmem:[%s7627_s29 + $0x58] sm:$0xff]  ;;  %327 = vst.msk [vmem:[#allocation3 + $0x48] sm:$0xff] %vm317_vm0, %v7645_v5  ;;  %v7660_v8 = vld [vmem:[%s7627_s29 + $0x50] sm:$0xff]  ;;  %vm919_vm6 = vcmask 97280   ;;  %vm1477_vm7 = vcmask 1040384  }
  0x16   : > { %326 = vst.msk [vmem:[#allocation3 + $0x40] sm:$0xff] %vm317_vm0, %v7648_v6  ;;  %329 = vst.msk [vmem:[#allocation3 + $0x58] sm:$0xff] %vm317_vm0, %v7651_v7  ;;  %v7663_v9 = vld [vmem:[%s7627_s29 + $0x68] sm:$0xff]  ;;  %v7666_v10 = vld [vmem:[%s7627_s29 + $0x60] sm:$0xff]  ;;  %vm2429_vm8 = vcmask 1046528  }
  0x17   : > { %328 = vst.msk [vmem:[#allocation3 + $0x50] sm:$0xff] %vm317_vm0, %v7660_v8  ;;  %331 = vst.msk [vmem:[#allocation3 + $0x68] sm:$0xff] %vm317_vm0, %v7663_v9  ;;  %v7675_v11 = vld [vmem:[%s7627_s29 + $0x78] sm:$0xff]  ;;  %v7678_v12 = vld [vmem:[%s7627_s29 + $0x70] sm:$0xff]  ;;  %648 = vrot.lane.b32.xlu1 %v7632_v2, %s7562_s30  ;;  %428 = vrot.lane.b32.xlu0 %v261_v3, %s7563_s6 }
  0x18   : > { %330 = vst.msk [vmem:[#allocation3 + $0x60] sm:$0xff] %vm317_vm0, %v7666_v10  ;;  %v7681_v13 = vld [vmem:[%s7627_s29 + $0x88] sm:$0xff]  ;;  %333 = vst.msk [vmem:[#allocation3 + $0x78] sm:$0xff] %vm317_vm0, %v7675_v11  ;;  %v7693_v14 = vld [vmem:[%s7627_s29 + $0x80] sm:$0xff] }
  0x19   : > { %332 = vst.msk [vmem:[#allocation3 + $0x70] sm:$0xff] %vm317_vm0, %v7678_v12  ;;  %335 = vst.msk [vmem:[#allocation3 + $0x88] sm:$0xff] %vm317_vm0, %v7681_v13  ;;  %v7696_v15 = vld [vmem:[%s7627_s29 + $0x98] sm:$0xff]  ;;  %v7703_v16 = vld [vmem:[%s7627_s29 + $0x90] sm:$0xff] }
  0x1a   : > { %334 = vst.msk [vmem:[#allocation3 + $0x80] sm:$0xff] %vm317_vm0, %v7693_v14  ;;  %337 = vst.msk [vmem:[#allocation3 + $0x98] sm:$0xff] %vm317_vm0, %v7696_v15  ;;  %v7706_v17 = vld [vmem:[%s7627_s29 + $0xa8] sm:$0xff]  ;;  %v7709_v18 = vld [vmem:[%s7627_s29 + $0xa0] sm:$0xff] }
  0x1b   : > { %336 = vst.msk [vmem:[#allocation3 + $0x90] sm:$0xff] %vm317_vm0, %v7703_v16  ;;  %339 = vst.msk [vmem:[#allocation3 + $0xa8] sm:$0xff] %vm317_vm0, %v7706_v17  ;;  %v7718_v19 = vld [vmem:[%s7627_s29 + $0xb8] sm:$0xff]  ;;  %v7721_v20 = vld [vmem:[%s7627_s29 + $0xb0] sm:$0xff]  ;;  %432 = vrot.lane.b32.xlu1 %v263_v0, %s7563_s6  ;;  %430 = vrot.lane.b32.xlu0 %v262_v4, %s7563_s6 }
  0x1c   : > { %338 = vst.msk [vmem:[#allocation3 + $0xa0] sm:$0xff] %vm317_vm0, %v7709_v18  ;;  %v7724_v21 = vld [vmem:[%s7627_s29 + $0xc8] sm:$0xff]  ;;  %341 = vst.msk [vmem:[#allocation3 + $0xb8] sm:$0xff] %vm317_vm0, %v7718_v19  ;;  %v7733_v22 = vld [vmem:[%s7627_s29 + $0xc0] sm:$0xff] }
  0x1d   : > { %340 = vst.msk [vmem:[#allocation3 + $0xb0] sm:$0xff] %vm317_vm0, %v7721_v20  ;;  %343 = vst.msk [vmem:[#allocation3 + $0xc8] sm:$0xff] %vm317_vm0, %v7724_v21  ;;  %v7736_v23 = vld [vmem:[%s7627_s29 + $0xd8] sm:$0xff]  ;;  %v7739_v24 = vld [vmem:[%s7627_s29 + $0xd0] sm:$0xff] }
  0x1e   : > { %342 = vst.msk [vmem:[#allocation3 + $0xc0] sm:$0xff] %vm317_vm0, %v7733_v22  ;;  %345 = vst.msk [vmem:[#allocation3 + $0xd8] sm:$0xff] %vm317_vm0, %v7736_v23  ;;  %v7750_v25 = vld [vmem:[%s7627_s29 + $0xe8] sm:$0xff]  ;;  %v7753_v26 = vld [vmem:[%s7627_s29 + $0xe0] sm:$0xff] }
  0x1f   : > { %344 = vst.msk [vmem:[#allocation3 + $0xd0] sm:$0xff] %vm317_vm0, %v7739_v24  ;;  %347 = vst.msk [vmem:[#allocation3 + $0xe8] sm:$0xff] %vm317_vm0, %v7750_v25  ;;  %v7760_v27 = vld [vmem:[%s7627_s29 + $0xf8] sm:$0xff]  ;;  %v7763_v28 = vld [vmem:[%s7627_s29 + $0xf0] sm:$0xff]  ;;  %652 = vrot.lane.b32.xlu1 %v7645_v5, %s7562_s30  ;;  %650 = vrot.lane.b32.xlu0 %v7648_v6, %s7562_s30 }
  0x20   : > { %346 = vst.msk [vmem:[#allocation3 + $0xe0] sm:$0xff] %vm317_vm0, %v7753_v26  ;;  %v7766_v29 = vld [vmem:[%s7627_s29 + $0x108] sm:$0xff]  ;;  %349 = vst.msk [vmem:[#allocation3 + $0xf8] sm:$0xff] %vm317_vm0, %v7760_v27  ;;  %v7775_v30 = vld [vmem:[%s7627_s29 + $0x100] sm:$0xff] }
  0x21   : > { %348 = vst.msk [vmem:[#allocation3 + $0xf0] sm:$0xff] %vm317_vm0, %v7763_v28  ;;  %351 = vst.msk [vmem:[#allocation3 + $0x108] sm:$0xff] %vm317_vm0, %v7766_v29  ;;  %v257_v31 = vld [vmem:[%s7627_s29] sm:$0xff]  ;;  %v7779_v32 = vld [vmem:[%s7627_s29 + $0x118] sm:$0xff] }
  0x22   : > { %350 = vst.msk [vmem:[#allocation3 + $0x100] sm:$0xff] %vm317_vm0, %v7775_v30  ;;  %318 = vst.msk [vmem:[#allocation3] sm:$0xff] %vm317_vm0, %v257_v31  ;;  %v7787_v33 = vld [vmem:[%s7627_s29 + $0x110] sm:$0xff]  ;;  %v258_v34 = vld [vmem:[%s7627_s29 + $0x8] sm:$0xff] }
  0x23   : > { %353 = vst.msk [vmem:[#allocation3 + $0x118] sm:$0xff] %vm317_vm0, %v7779_v32  ;;  %v259_v35 = vld [vmem:[%s7627_s29 + $0x10] sm:$0xff]  ;;  %352 = vst.msk [vmem:[#allocation3 + $0x110] sm:$0xff] %vm317_vm0, %v7787_v33  ;;  %v917_v36 = vld [vmem:[%s10794_s1] sm:$0xff]  ;;  %436 = vrot.lane.b32.xlu1 %v7648_v6, %s7563_s6  ;;  %434 = vrot.lane.b32.xlu0 %v7632_v2, %s7563_s6 }
  0x24   : > { %319 = vst.msk [vmem:[#allocation3 + $0x8] sm:$0xff] %vm317_vm0, %v258_v34  ;;  %320 = vst.msk [vmem:[#allocation3 + $0x10] sm:$0xff] %vm317_vm0, %v259_v35  ;;  %v918_v37 = vld [vmem:[%s10794_s1 + $0x8] sm:$0xf]  ;;  %v7814_v41 = vld [vmem:[%s7627_s29 + $0x120] sm:$0xff] }
  0x25   : > { %vm7806_vm3 = vmpackc.low %vm1082_vm1, %vm7564_vm2  ;;  %v7446_v39 = vpack.c.bf16 %v918_v37, %v917_v36  ;;  %v7811_v40 = vld [vmem:[%s7627_s29 + $0x128] sm:$0xff]  ;;  %v7817_v42 = vld [vmem:[%s7627_s29 + $0x138] sm:$0xff]  ;;  %354 = vst.msk [vmem:[#allocation3 + $0x120] sm:$0xff] %vm317_vm0, %v7814_v41 }
  0x26   : > { %355 = vst.msk [vmem:[#allocation3 + $0x128] sm:$0xff] %vm317_vm0, %v7811_v40  ;;  %357 = vst.msk [vmem:[#allocation3 + $0x138] sm:$0xff] %vm317_vm0, %v7817_v42  ;;  %v7826_v43 = vld [vmem:[%s7627_s29 + $0x130] sm:$0xff]  ;;  %v7829_v44 = vld [vmem:[%s7627_s29 + $0x148] sm:$0xff] }
  0x27   : > { %v7832_v45 = vld [vmem:[%s7627_s29 + $0x140] sm:$0xff]  ;;  %7448 = vmatprep.subr.msk.bf16.mxu0 %vm7806_vm3, %v7446_v39  ;;  %356 = vst.msk [vmem:[#allocation3 + $0x130] sm:$0xff] %vm317_vm0, %v7826_v43  ;;  %359 = vst.msk [vmem:[#allocation3 + $0x148] sm:$0xff] %vm317_vm0, %v7829_v44  ;;  %7476 = vmatprep.subr.msk.bf16.mxu1 %vm7806_vm3, %v7446_v39  ;;  %v7853_v46 = vld [vmem:[%s7627_s29 + $0x158] sm:$0xff] }
  0x28   : > { %358 = vst.msk [vmem:[#allocation3 + $0x140] sm:$0xff] %vm317_vm0, %v7832_v45  ;;  %7451 = vmatpush3.bf16.msk.msra.mxu0 %vm7806_vm3, %v7446_v39  ;;  %7477 = vmatpush3.bf16.msk.msra.mxu1 %vm7806_vm3, %v7446_v39  ;;  %361 = vst.msk [vmem:[#allocation3 + $0x158] sm:$0xff] %vm317_vm0, %v7853_v46  ;;  %v7862_v47 = vld [vmem:[%s7627_s29 + $0x150] sm:$0xff]  ;;  %v7871_v48 = vld [vmem:[%s7627_s29 + $0x168] sm:$0xff] }
  0x29   : > { %656 = vrot.lane.b32.xlu1 %v7651_v7, %s7562_s30  ;;  %654 = vrot.lane.b32.xlu0 %v7660_v8, %s7562_s30  ;;  %360 = vst.msk [vmem:[#allocation3 + $0x150] sm:$0xff] %vm317_vm0, %v7862_v47  ;;  %363 = vst.msk [vmem:[#allocation3 + $0x168] sm:$0xff] %vm317_vm0, %v7871_v48  ;;  %v7880_v49 = vld [vmem:[%s7627_s29 + $0x160] sm:$0xff]  ;;  %v7889_v50 = vld [vmem:[%s7627_s29 + $0x178] sm:$0xff] }
  0x2a   : > { %362 = vst.msk [vmem:[#allocation3 + $0x160] sm:$0xff] %vm317_vm0, %v7880_v49  ;;  %365 = vst.msk [vmem:[#allocation3 + $0x178] sm:$0xff] %vm317_vm0, %v7889_v50  ;;  %v7898_v51 = vld [vmem:[%s7627_s29 + $0x170] sm:$0xff]  ;;  %v7907_v52 = vld [vmem:[%s7627_s29 + $0x188] sm:$0xff] }
  0x2b   : > { %364 = vst.msk [vmem:[#allocation3 + $0x170] sm:$0xff] %vm317_vm0, %v7898_v51  ;;  %367 = vst.msk [vmem:[#allocation3 + $0x188] sm:$0xff] %vm317_vm0, %v7907_v52  ;;  %v7916_v53 = vld [vmem:[%s7627_s29 + $0x180] sm:$0xff]  ;;  %v7925_v54 = vld [vmem:[%s7627_s29 + $0x198] sm:$0xff] }
  0x2c   : > { %366 = vst.msk [vmem:[#allocation3 + $0x180] sm:$0xff] %vm317_vm0, %v7916_v53  ;;  %369 = vst.msk [vmem:[#allocation3 + $0x198] sm:$0xff] %vm317_vm0, %v7925_v54  ;;  %v7934_v55 = vld [vmem:[%s7627_s29 + $0x190] sm:$0xff]  ;;  %v7943_v56 = vld [vmem:[%s7627_s29 + $0x1a8] sm:$0xff] }
  0x2d   : > { %440 = vrot.lane.b32.xlu1 %v7660_v8, %s7563_s6  ;;  %438 = vrot.lane.b32.xlu0 %v7645_v5, %s7563_s6  ;;  %368 = vst.msk [vmem:[#allocation3 + $0x190] sm:$0xff] %vm317_vm0, %v7934_v55  ;;  %371 = vst.msk [vmem:[#allocation3 + $0x1a8] sm:$0xff] %vm317_vm0, %v7943_v56  ;;  %v7952_v57 = vld [vmem:[%s7627_s29 + $0x1a0] sm:$0xff]  ;;  %v6425_v59 = vld [vmem:[%s10794_s1 + $0x28] sm:$0xf] }
  0x2e   : > { %370 = vst.msk [vmem:[#allocation3 + $0x1a0] sm:$0xff] %vm317_vm0, %v7952_v57  ;;  %v6424_v58 = vld [vmem:[%s10794_s1 + $0x20] sm:$0xff] }
  0x2f   : > { %v7458_v60 = vpack.c.bf16 %v6425_v59, %v6424_v58  ;;  %v312_v59 = vld [vmem:[%s7627_s29 + $0x1b8] sm:$0xff] }
  0x31   : > { %660 = vrot.lane.b32.xlu1 %v7663_v9, %s7562_s30  ;;  %658 = vrot.lane.b32.xlu0 %v7666_v10, %s7562_s30 }
  0x32   : > { %7460 = vmatprep.subr.msk.bf16.mxu0 %vm7806_vm3, %v7458_v60 }
  0x35   : > { %444 = vrot.lane.b32.xlu1 %v7666_v10, %s7563_s6  ;;  %442 = vrot.lane.b32.xlu0 %v7651_v7, %s7563_s6 }
  0x39   : > { %664 = vrot.lane.b32.xlu1 %v7675_v11, %s7562_s30  ;;  %662 = vrot.lane.b32.xlu0 %v7678_v12, %s7562_s30 }
  0x3d   : > { %448 = vrot.lane.b32.xlu1 %v7678_v12, %s7563_s6  ;;  %446 = vrot.lane.b32.xlu0 %v7663_v9, %s7563_s6 }
  0x41   : > { %668 = vrot.lane.b32.xlu1 %v7681_v13, %s7562_s30  ;;  %666 = vrot.lane.b32.xlu0 %v7693_v14, %s7562_s30 }
  0x45   : > { %452 = vrot.lane.b32.xlu1 %v7693_v14, %s7563_s6  ;;  %450 = vrot.lane.b32.xlu0 %v7675_v11, %s7563_s6 }
  0x49   : > { %672 = vrot.lane.b32.xlu1 %v7696_v15, %s7562_s30  ;;  %670 = vrot.lane.b32.xlu0 %v7703_v16, %s7562_s30 }
  0x4d   : > { %456 = vrot.lane.b32.xlu1 %v7703_v16, %s7563_s6  ;;  %454 = vrot.lane.b32.xlu0 %v7681_v13, %s7563_s6 }
  0x51   : > { %676 = vrot.lane.b32.xlu1 %v7706_v17, %s7562_s30  ;;  %674 = vrot.lane.b32.xlu0 %v7709_v18, %s7562_s30 }
  0x55   : > { %460 = vrot.lane.b32.xlu1 %v7709_v18, %s7563_s6  ;;  %458 = vrot.lane.b32.xlu0 %v7696_v15, %s7563_s6 }
  0x59   : > { %680 = vrot.lane.b32.xlu1 %v7718_v19, %s7562_s30  ;;  %678 = vrot.lane.b32.xlu0 %v7721_v20, %s7562_s30 }
  0x5d   : > { %464 = vrot.lane.b32.xlu1 %v7721_v20, %s7563_s6  ;;  %462 = vrot.lane.b32.xlu0 %v7706_v17, %s7563_s6 }
  0x61   : > { %684 = vrot.lane.b32.xlu1 %v7724_v21, %s7562_s30  ;;  %682 = vrot.lane.b32.xlu0 %v7733_v22, %s7562_s30 }
  0x65   : > { %468 = vrot.lane.b32.xlu1 %v7733_v22, %s7563_s6  ;;  %466 = vrot.lane.b32.xlu0 %v7718_v19, %s7563_s6 }
  0x69   : > { %688 = vrot.lane.b32.xlu1 %v7736_v23, %s7562_s30  ;;  %686 = vrot.lane.b32.xlu0 %v7739_v24, %s7562_s30 }
  0x6d   : > { %472 = vrot.lane.b32.xlu1 %v7739_v24, %s7563_s6  ;;  %470 = vrot.lane.b32.xlu0 %v7724_v21, %s7563_s6 }
  0x71   : > { %692 = vrot.lane.b32.xlu1 %v7750_v25, %s7562_s30  ;;  %690 = vrot.lane.b32.xlu0 %v7753_v26, %s7562_s30 }
  0x75   : > { %476 = vrot.lane.b32.xlu1 %v7753_v26, %s7563_s6  ;;  %474 = vrot.lane.b32.xlu0 %v7736_v23, %s7563_s6 }
  0x79   : > { %696 = vrot.lane.b32.xlu1 %v7760_v27, %s7562_s30  ;;  %694 = vrot.lane.b32.xlu0 %v7763_v28, %s7562_s30 }
  0x7d   : > { %480 = vrot.lane.b32.xlu1 %v7763_v28, %s7563_s6  ;;  %478 = vrot.lane.b32.xlu0 %v7750_v25, %s7563_s6 }
  0x81   : > { %700 = vrot.lane.b32.xlu1 %v7766_v29, %s7562_s30  ;;  %698 = vrot.lane.b32.xlu0 %v7775_v30, %s7562_s30 }
  0x85   : > { %484 = vrot.lane.b32.xlu1 %v7775_v30, %s7563_s6  ;;  %482 = vrot.lane.b32.xlu0 %v7760_v27, %s7563_s6  ;;  %v647_v61 = vpop.permute.xlu1 %646  ;;  %v427_v62 = vpop.permute.xlu0 %426 }
  0x86   : > { %589 = vst.msk [vmem:[#allocation3] sm:$0xff] %vm588_vm4, %v427_v62 }
  0x87   : > { %809 = vst.msk [vmem:[#allocation3] sm:$0xff] %vm808_vm5, %v647_v61 }
  0x89   : > { %704 = vrot.lane.b32.xlu1 %v7779_v32, %s7562_s30  ;;  %702 = vrot.lane.b32.xlu0 %v7787_v33, %s7562_s30  ;;  %v649_v63 = vpop.permute.xlu1 %648  ;;  %v429_v0 = vpop.permute.xlu0 %428 }
  0x8a   : > { %590 = vst.msk [vmem:[#allocation3 + $0x8] sm:$0xff] %vm588_vm4, %v429_v0 }
  0x8b   : > { %810 = vst.msk [vmem:[#allocation3 + $0x8] sm:$0xff] %vm808_vm5, %v649_v63 }
  0x8d   : > { %488 = vrot.lane.b32.xlu1 %v7787_v33, %s7563_s6  ;;  %486 = vrot.lane.b32.xlu0 %v7766_v29, %s7563_s6  ;;  %v433_v1 = vpop.permute.xlu1 %432  ;;  %v431_v2 = vpop.permute.xlu0 %430 }
  0x8e   : > { %592 = vst.msk [vmem:[#allocation3 + $0x18] sm:$0xff] %vm588_vm4, %v433_v1  ;;  %591 = vst.msk [vmem:[#allocation3 + $0x10] sm:$0xff] %vm588_vm4, %v431_v2  ;;  %v8030_v3 = vld [vmem:[#allocation3] sm:$0xff]  ;;  %v313_v1 = vld [vmem:[%s7627_s29 + $0x1c0] sm:$0xff] }
  0x8f   : > { %6961 = vmatprep.mubr.msk.f32.mxu0 %vm919_vm6, %v8030_v3 }
  0x91   : > { %708 = vrot.lane.b32.xlu1 %v7811_v40, %s7562_s30  ;;  %706 = vrot.lane.b32.xlu0 %v7814_v41, %s7562_s30  ;;  %v653_v4 = vpop.permute.xlu1 %652  ;;  %v651_v5 = vpop.permute.xlu0 %650 }
  0x92   : > { %812 = vst.msk [vmem:[#allocation3 + $0x18] sm:$0xff] %vm808_vm5, %v653_v4  ;;  %811 = vst.msk [vmem:[#allocation3 + $0x10] sm:$0xff] %vm808_vm5, %v651_v5  ;;  %v8040_v6 = vld [vmem:[#allocation3 + $0x8] sm:$0xff]  ;;  %v314_v5 = vld [vmem:[%s7627_s29 + $0x1c8] sm:$0xff] }
  0x93   : > { %6962 = vmatmul.mubr.msk.f32.vlgmr.msra.gmra.mrb[0].mxu0 %vm919_vm6, %v8040_v6 }
  0x94   : > { %7463 = vmatpush3.bf16.msk.msra.mxu0 %vm7806_vm3, %v7458_v60  ;;  %v311_v60 = vld [vmem:[%s7627_s29 + $0x1b0] sm:$0xff] }
  0x95   : > { %492 = vrot.lane.b32.xlu1 %v7814_v41, %s7563_s6  ;;  %490 = vrot.lane.b32.xlu0 %v7779_v32, %s7563_s6  ;;  %v437_v7 = vpop.permute.xlu1 %436  ;;  %v435_v8 = vpop.permute.xlu0 %434 }
  0x96   : > { %594 = vst.msk [vmem:[#allocation3 + $0x28] sm:$0xff] %vm588_vm4, %v437_v7  ;;  %593 = vst.msk [vmem:[#allocation3 + $0x20] sm:$0xff] %vm588_vm4, %v435_v8 }
  0x99   : > { %712 = vrot.lane.b32.xlu1 %v7817_v42, %s7562_s30  ;;  %710 = vrot.lane.b32.xlu0 %v7826_v43, %s7562_s30  ;;  %v8056_v11 = vld [vmem:[#allocation3 + $0x10] sm:$0xff]  ;;  %v8058_v12 = vld [vmem:[#allocation3 + $0x18] sm:$0xff] }
  0x9a   : > { %6964 = vmatprep.mubr.msk.f32.mxu0 %vm919_vm6, %v8056_v11 }
  0x9b   : > { %v657_v9 = vpop.permute.xlu1 %656  ;;  %v655_v10 = vpop.permute.xlu0 %654  ;;  %6965 = vmatmul.mubr.msk.f32.gmra.mrb[2].mxu0 %vm919_vm6, %v8058_v12 }
  0x9c   : > { %814 = vst.msk [vmem:[#allocation3 + $0x28] sm:$0xff] %vm808_vm5, %v657_v9  ;;  %813 = vst.msk [vmem:[#allocation3 + $0x20] sm:$0xff] %vm808_vm5, %v655_v10  ;;  %v6367_v10 = vld [vmem:[%s10794_s1 + $0x10] sm:$0xff] }
  0x9d   : > { %496 = vrot.lane.b32.xlu1 %v7826_v43, %s7563_s6  ;;  %494 = vrot.lane.b32.xlu0 %v7811_v40, %s7563_s6 }
  0x9f   : > { %v441_v13 = vpop.permute.xlu1 %440  ;;  %v439_v14 = vpop.permute.xlu0 %438 }
  0xa0   : > { %596 = vst.msk [vmem:[#allocation3 + $0x38] sm:$0xff] %vm588_vm4, %v441_v13  ;;  %595 = vst.msk [vmem:[#allocation3 + $0x30] sm:$0xff] %vm588_vm4, %v439_v14  ;;  %v6368_v13 = vld [vmem:[%s10794_s1 + $0x18] sm:$0xf] }
  0xa1   : > { %716 = vrot.lane.b32.xlu1 %v7829_v44, %s7562_s30  ;;  %714 = vrot.lane.b32.xlu0 %v7832_v45, %s7562_s30  ;;  %v8251_v14 = vpack.c.bf16 %v6368_v13, %v6367_v10 }
  0xa3   : > { %v661_v15 = vpop.permute.xlu1 %660  ;;  %v659_v16 = vpop.permute.xlu0 %658  ;;  %v8076_v17 = vld [vmem:[#allocation3 + $0x20] sm:$0xff]  ;;  %v8078_v18 = vld [vmem:[#allocation3 + $0x28] sm:$0xff]  ;;  %7454 = vmatprep.subr.msk.bf16.mxu1 %vm7806_vm3, %v8251_v14 }
  0xa4   : > { %816 = vst.msk [vmem:[#allocation3 + $0x38] sm:$0xff] %vm808_vm5, %v661_v15  ;;  %815 = vst.msk [vmem:[#allocation3 + $0x30] sm:$0xff] %vm808_vm5, %v659_v16  ;;  %6967 = vmatprep.mubr.msk.f32.mxu0 %vm919_vm6, %v8076_v17  ;;  %v315_v15 = vld [vmem:[%s7627_s29 + $0x1d0] sm:$0xff]  ;;  %v316_v16 = vld [vmem:[%s7627_s29 + $0x1d8] sm:$0xff] }
  0xa5   : > { %500 = vrot.lane.b32.xlu1 %v7832_v45, %s7563_s6  ;;  %498 = vrot.lane.b32.xlu0 %v7817_v42, %s7563_s6 }
  0xa6   : > { %6968 = vmatmul.mubr.msk.f32.gmra.mrb[4].mxu0 %vm919_vm6, %v8078_v18 }
  0xa7   : > { %v445_v19 = vpop.permute.xlu1 %444  ;;  %v443_v20 = vpop.permute.xlu0 %442 }
  0xa8   : > { %598 = vst.msk [vmem:[#allocation3 + $0x48] sm:$0xff] %vm588_vm4, %v445_v19  ;;  %597 = vst.msk [vmem:[#allocation3 + $0x40] sm:$0xff] %vm588_vm4, %v443_v20 }
  0xa9   : > { %720 = vrot.lane.b32.xlu1 %v7853_v46, %s7562_s30  ;;  %718 = vrot.lane.b32.xlu0 %v7862_v47, %s7562_s30 }
  0xab   : > { %v665_v21 = vpop.permute.xlu1 %664  ;;  %v663_v22 = vpop.permute.xlu0 %662  ;;  %v8096_v23 = vld [vmem:[#allocation3 + $0x30] sm:$0xff]  ;;  %v8098_v24 = vld [vmem:[#allocation3 + $0x38] sm:$0xff] }
  0xac   : > { %818 = vst.msk [vmem:[#allocation3 + $0x48] sm:$0xff] %vm808_vm5, %v665_v21  ;;  %817 = vst.msk [vmem:[#allocation3 + $0x40] sm:$0xff] %vm808_vm5, %v663_v22  ;;  %6970 = vmatprep.mubr.msk.f32.mxu0 %vm919_vm6, %v8096_v23 }
  0xad   : > { %504 = vrot.lane.b32.xlu1 %v7862_v47, %s7563_s6  ;;  %502 = vrot.lane.b32.xlu0 %v7829_v44, %s7563_s6 }
  0xae   : > { %6971 = vmatmul.mubr.msk.f32.gmra.mrb[6].mxu0 %vm919_vm6, %v8098_v24 }
  0xaf   : > { %v449_v25 = vpop.permute.xlu1 %448  ;;  %v447_v26 = vpop.permute.xlu0 %446 }
  0xb0   : > { %600 = vst.msk [vmem:[#allocation3 + $0x58] sm:$0xff] %vm588_vm4, %v449_v25  ;;  %599 = vst.msk [vmem:[#allocation3 + $0x50] sm:$0xff] %vm588_vm4, %v447_v26 }
  0xb1   : > { %724 = vrot.lane.b32.xlu1 %v7871_v48, %s7562_s30  ;;  %722 = vrot.lane.b32.xlu0 %v7880_v49, %s7562_s30 }
  0xb3   : > { %v669_v27 = vpop.permute.xlu1 %668  ;;  %v667_v28 = vpop.permute.xlu0 %666  ;;  %v8116_v29 = vld [vmem:[#allocation3 + $0x40] sm:$0xff]  ;;  %v8118_v30 = vld [vmem:[#allocation3 + $0x48] sm:$0xff] }
  0xb4   : > { %820 = vst.msk [vmem:[#allocation3 + $0x58] sm:$0xff] %vm808_vm5, %v669_v27  ;;  %819 = vst.msk [vmem:[#allocation3 + $0x50] sm:$0xff] %vm808_vm5, %v667_v28  ;;  %6973 = vmatprep.mubr.msk.f32.mxu0 %vm919_vm6, %v8116_v29 }
  0xb5   : > { %508 = vrot.lane.b32.xlu1 %v7880_v49, %s7563_s6  ;;  %506 = vrot.lane.b32.xlu0 %v7853_v46, %s7563_s6 }
  0xb6   : > { %6974 = vmatmul.mubr.msk.f32.gmra.mrb[8].mxu0 %vm919_vm6, %v8118_v30 }
  0xb7   : > { %v453_v31 = vpop.permute.xlu1 %452  ;;  %v451_v32 = vpop.permute.xlu0 %450 }
  0xb8   : > { %602 = vst.msk [vmem:[#allocation3 + $0x68] sm:$0xff] %vm588_vm4, %v453_v31  ;;  %601 = vst.msk [vmem:[#allocation3 + $0x60] sm:$0xff] %vm588_vm4, %v451_v32 }
  0xb9   : > { %728 = vrot.lane.b32.xlu1 %v7889_v50, %s7562_s30  ;;  %726 = vrot.lane.b32.xlu0 %v7898_v51, %s7562_s30 }
  0xbb   : > { %v673_v33 = vpop.permute.xlu1 %672  ;;  %v671_v34 = vpop.permute.xlu0 %670  ;;  %v8136_v35 = vld [vmem:[#allocation3 + $0x50] sm:$0xff]  ;;  %v8138_v36 = vld [vmem:[#allocation3 + $0x58] sm:$0xff] }
  0xbc   : > { %822 = vst.msk [vmem:[#allocation3 + $0x68] sm:$0xff] %vm808_vm5, %v673_v33  ;;  %821 = vst.msk [vmem:[#allocation3 + $0x60] sm:$0xff] %vm808_vm5, %v671_v34  ;;  %6976 = vmatprep.mubr.msk.f32.mxu0 %vm919_vm6, %v8136_v35 }
  0xbd   : > { %512 = vrot.lane.b32.xlu1 %v7898_v51, %s7563_s6  ;;  %510 = vrot.lane.b32.xlu0 %v7871_v48, %s7563_s6 }
  0xbe   : > { %6977 = vmatmul.mubr.msk.f32.gmra.mrb[10].mxu0 %vm919_vm6, %v8138_v36 }
  0xbf   : > { %v457_v37 = vpop.permute.xlu1 %456  ;;  %v455_v39 = vpop.permute.xlu0 %454 }
  0xc0   : > { %604 = vst.msk [vmem:[#allocation3 + $0x78] sm:$0xff] %vm588_vm4, %v457_v37  ;;  %603 = vst.msk [vmem:[#allocation3 + $0x70] sm:$0xff] %vm588_vm4, %v455_v39 }
  0xc1   : > { %732 = vrot.lane.b32.xlu1 %v7907_v52, %s7562_s30  ;;  %730 = vrot.lane.b32.xlu0 %v7916_v53, %s7562_s30 }
  0xc3   : > { %v677_v40 = vpop.permute.xlu1 %676  ;;  %v675_v41 = vpop.permute.xlu0 %674  ;;  %v8156_v42 = vld [vmem:[#allocation3 + $0x60] sm:$0xff]  ;;  %v8158_v43 = vld [vmem:[#allocation3 + $0x68] sm:$0xff] }
  0xc4   : > { %824 = vst.msk [vmem:[#allocation3 + $0x78] sm:$0xff] %vm808_vm5, %v677_v40  ;;  %823 = vst.msk [vmem:[#allocation3 + $0x70] sm:$0xff] %vm808_vm5, %v675_v41  ;;  %6979 = vmatprep.mubr.msk.f32.mxu0 %vm919_vm6, %v8156_v42 }
  0xc5   : > { %516 = vrot.lane.b32.xlu1 %v7916_v53, %s7563_s6  ;;  %514 = vrot.lane.b32.xlu0 %v7889_v50, %s7563_s6 }
  0xc6   : > { %6980 = vmatmul.mubr.msk.f32.gmra.mrb[12].mxu0 %vm919_vm6, %v8158_v43 }
  0xc7   : > { %v461_v44 = vpop.permute.xlu1 %460  ;;  %v459_v45 = vpop.permute.xlu0 %458 }
  0xc8   : > { %606 = vst.msk [vmem:[#allocation3 + $0x88] sm:$0xff] %vm588_vm4, %v461_v44  ;;  %605 = vst.msk [vmem:[#allocation3 + $0x80] sm:$0xff] %vm588_vm4, %v459_v45 }
  0xc9   : > { %736 = vrot.lane.b32.xlu1 %v7925_v54, %s7562_s30  ;;  %734 = vrot.lane.b32.xlu0 %v7934_v55, %s7562_s30 }
  0xcb   : > { %v681_v46 = vpop.permute.xlu1 %680  ;;  %v679_v47 = vpop.permute.xlu0 %678  ;;  %v8176_v48 = vld [vmem:[#allocation3 + $0x70] sm:$0xff]  ;;  %v8178_v49 = vld [vmem:[#allocation3 + $0x78] sm:$0xff] }
  0xcc   : > { %826 = vst.msk [vmem:[#allocation3 + $0x88] sm:$0xff] %vm808_vm5, %v681_v46  ;;  %825 = vst.msk [vmem:[#allocation3 + $0x80] sm:$0xff] %vm808_vm5, %v679_v47  ;;  %6982 = vmatprep.mubr.msk.f32.mxu0 %vm919_vm6, %v8176_v48 }
  0xcd   : > { %520 = vrot.lane.b32.xlu1 %v7934_v55, %s7563_s6  ;;  %518 = vrot.lane.b32.xlu0 %v7907_v52, %s7563_s6 }
  0xce   : > { %6983 = vmatmul.mubr.msk.f32.gmra.mrb[14].mxu0 %vm919_vm6, %v8178_v49 }
  0xcf   : > { %v465_v50 = vpop.permute.xlu1 %464  ;;  %v463_v51 = vpop.permute.xlu0 %462 }
  0xd0   : > { %608 = vst.msk [vmem:[#allocation3 + $0x98] sm:$0xff] %vm588_vm4, %v465_v50  ;;  %607 = vst.msk [vmem:[#allocation3 + $0x90] sm:$0xff] %vm588_vm4, %v463_v51 }
  0xd1   : > { %740 = vrot.lane.b32.xlu1 %v7943_v56, %s7562_s30  ;;  %738 = vrot.lane.b32.xlu0 %v7952_v57, %s7562_s30 }
  0xd3   : > { %v685_v53 = vpop.permute.xlu1 %684  ;;  %v683_v55 = vpop.permute.xlu0 %682  ;;  %v8196_v52 = vld [vmem:[#allocation3 + $0x80] sm:$0xff]  ;;  %v8198_v58 = vld [vmem:[#allocation3 + $0x88] sm:$0xff] }
  0xd4   : > { %828 = vst.msk [vmem:[#allocation3 + $0x98] sm:$0xff] %vm808_vm5, %v685_v53  ;;  %827 = vst.msk [vmem:[#allocation3 + $0x90] sm:$0xff] %vm808_vm5, %v683_v55  ;;  %6985 = vmatprep.mubr.msk.f32.mxu0 %vm919_vm6, %v8196_v52 }
  0xd5   : > { %524 = vrot.lane.b32.xlu1 %v7952_v57, %s7563_s6  ;;  %522 = vrot.lane.b32.xlu0 %v7925_v54, %s7563_s6 }
  0xd6   : > { %6986 = vmatmul.mubr.msk.f32.gmra.mrb[16].mxu0 %vm919_vm6, %v8198_v58 }
  0xd7   : > { %v469_v61 = vpop.permute.xlu1 %468  ;;  %v467_v62 = vpop.permute.xlu0 %466 }
  0xd8   : > { %610 = vst.msk [vmem:[#allocation3 + $0xa8] sm:$0xff] %vm588_vm4, %v469_v61  ;;  %609 = vst.msk [vmem:[#allocation3 + $0xa0] sm:$0xff] %vm588_vm4, %v467_v62 }
  0xd9   : > { %744 = vrot.lane.b32.xlu1 %v312_v59, %s7562_s30  ;;  %742 = vrot.lane.b32.xlu0 %v311_v60, %s7562_s30 }
  0xdb   : > { %v689_v57 = vpop.permute.xlu1 %688  ;;  %v687_v63 = vpop.permute.xlu0 %686  ;;  %v8216_v54 = vld [vmem:[#allocation3 + $0x90] sm:$0xff]  ;;  %v8218_v0 = vld [vmem:[#allocation3 + $0x98] sm:$0xff] }
  0xdc   : > { %830 = vst.msk [vmem:[#allocation3 + $0xa8] sm:$0xff] %vm808_vm5, %v689_v57  ;;  %829 = vst.msk [vmem:[#allocation3 + $0xa0] sm:$0xff] %vm808_vm5, %v687_v63  ;;  %6988 = vmatprep.mubr.msk.f32.mxu0 %vm919_vm6, %v8216_v54 }
  0xdd   : > { %528 = vrot.lane.b32.xlu1 %v311_v60, %s7563_s6  ;;  %526 = vrot.lane.b32.xlu0 %v7943_v56, %s7563_s6 }
  0xde   : > { %6989 = vmatmul.mubr.msk.f32.gmra.mrb[18].mxu0 %vm919_vm6, %v8218_v0 }
  0xdf   : > { %v473_v2 = vpop.permute.xlu1 %472  ;;  %v471_v4 = vpop.permute.xlu0 %470 }
  0xe0   : > { %612 = vst.msk [vmem:[#allocation3 + $0xb8] sm:$0xff] %vm588_vm4, %v473_v2  ;;  %611 = vst.msk [vmem:[#allocation3 + $0xb0] sm:$0xff] %vm588_vm4, %v471_v4 }
  0xe1   : > { %746 = vrot.lane.b32.xlu1 %v313_v1, %s7562_s30  ;;  %530 = vrot.lane.b32.xlu0 %v312_v59, %s7563_s6 }
  0xe3   : > { %v693_v7 = vpop.permute.xlu1 %692  ;;  %v691_v8 = vpop.permute.xlu0 %690  ;;  %v8235_v56 = vld [vmem:[#allocation3 + $0xa0] sm:$0xff]  ;;  %v8237_v9 = vld [vmem:[#allocation3 + $0xa8] sm:$0xff] }
  0xe4   : > { %832 = vst.msk [vmem:[#allocation3 + $0xb8] sm:$0xff] %vm808_vm5, %v693_v7  ;;  %831 = vst.msk [vmem:[#allocation3 + $0xb0] sm:$0xff] %vm808_vm5, %v691_v8  ;;  %6991 = vmatprep.mubr.msk.f32.mxu0 %vm919_vm6, %v8235_v56 }
  0xe5   : > { %748 = vrot.lane.b32.xlu1 %v314_v5, %s7562_s30  ;;  %532 = vrot.lane.b32.xlu0 %v313_v1, %s7563_s6 }
  0xe6   : > { %6992 = vmatmul.mubr.msk.f32.gmra.mrb[20].mxu0 %vm919_vm6, %v8237_v9 }
  0xe7   : > { %v477_v19 = vpop.permute.xlu1 %476  ;;  %v475_v20 = vpop.permute.xlu0 %474 }
  0xe8   : > { %614 = vst.msk [vmem:[#allocation3 + $0xc8] sm:$0xff] %vm588_vm4, %v477_v19  ;;  %613 = vst.msk [vmem:[#allocation3 + $0xc0] sm:$0xff] %vm588_vm4, %v475_v20 }
  0xe9   : > { %750 = vrot.lane.b32.xlu0 %v315_v15, %s7562_s30  ;;  %752 = vrot.lane.b32.xlu1 %v316_v16, %s7562_s30 }
  0xeb   : > { %v697_v21 = vpop.permute.xlu1 %696  ;;  %v695_v22 = vpop.permute.xlu0 %694  ;;  %v8264_v25 = vld [vmem:[#allocation3 + $0xb0] sm:$0xff]  ;;  %v8266_v26 = vld [vmem:[#allocation3 + $0xb8] sm:$0xff] }
  0xec   : > { %834 = vst.msk [vmem:[#allocation3 + $0xc8] sm:$0xff] %vm808_vm5, %v697_v21  ;;  %833 = vst.msk [vmem:[#allocation3 + $0xc0] sm:$0xff] %vm808_vm5, %v695_v22  ;;  %6994 = vmatprep.mubr.msk.f32.mxu0 %vm919_vm6, %v8264_v25 }
  0xed   : > { %6995 = vmatmul.mubr.msk.f32.gmra.mrb[22].mxu0 %vm919_vm6, %v8266_v26 }
  0xef   : > { %v481_v27 = vpop.permute.xlu1 %480  ;;  %v479_v28 = vpop.permute.xlu0 %478 }
  0xf0   : > { %616 = vst.msk [vmem:[#allocation3 + $0xd8] sm:$0xff] %vm588_vm4, %v481_v27  ;;  %615 = vst.msk [vmem:[#allocation3 + $0xd0] sm:$0xff] %vm588_vm4, %v479_v28 }
  0xf3   : > { %v701_v31 = vpop.permute.xlu1 %700  ;;  %v699_v32 = vpop.permute.xlu0 %698  ;;  %v8276_v33 = vld [vmem:[#allocation3 + $0xc0] sm:$0xff]  ;;  %v8278_v34 = vld [vmem:[#allocation3 + $0xc8] sm:$0xff] }
  0xf4   : > { %836 = vst.msk [vmem:[#allocation3 + $0xd8] sm:$0xff] %vm808_vm5, %v701_v31  ;;  %835 = vst.msk [vmem:[#allocation3 + $0xd0] sm:$0xff] %vm808_vm5, %v699_v32  ;;  %6997 = vmatprep.mubr.msk.f32.mxu0 %vm919_vm6, %v8276_v33 }
  0xf5   : > { %6998 = vmatmul.mubr.msk.f32.gmra.mrb[24].mxu0 %vm919_vm6, %v8278_v34 }
  0xf7   : > { %v485_v37 = vpop.permute.xlu1 %484  ;;  %v483_v39 = vpop.permute.xlu0 %482 }
  0xf8   : > { %618 = vst.msk [vmem:[#allocation3 + $0xe8] sm:$0xff] %vm588_vm4, %v485_v37  ;;  %617 = vst.msk [vmem:[#allocation3 + $0xe0] sm:$0xff] %vm588_vm4, %v483_v39 }
  0xfb   : > { %v705_v40 = vpop.permute.xlu1 %704  ;;  %v703_v41 = vpop.permute.xlu0 %702  ;;  %v8288_v44 = vld [vmem:[#allocation3 + $0xd0] sm:$0xff]  ;;  %v8290_v45 = vld [vmem:[#allocation3 + $0xd8] sm:$0xff] }
  0xfc   : > { %838 = vst.msk [vmem:[#allocation3 + $0xe8] sm:$0xff] %vm808_vm5, %v705_v40  ;;  %837 = vst.msk [vmem:[#allocation3 + $0xe0] sm:$0xff] %vm808_vm5, %v703_v41  ;;  %7000 = vmatprep.mubr.msk.f32.mxu0 %vm919_vm6, %v8288_v44 }
  0xfd   : > { %7001 = vmatmul.mubr.msk.f32.gmra.mrb[26].mxu0 %vm919_vm6, %v8290_v45 }
  0xff   : > { %v489_v46 = vpop.permute.xlu1 %488  ;;  %v487_v47 = vpop.permute.xlu0 %486 }
 0x100   : > { %620 = vst.msk [vmem:[#allocation3 + $0xf8] sm:$0xff] %vm588_vm4, %v489_v46  ;;  %619 = vst.msk [vmem:[#allocation3 + $0xf0] sm:$0xff] %vm588_vm4, %v487_v47 }
 0x103   : > { %v709_v50 = vpop.permute.xlu1 %708  ;;  %v707_v51 = vpop.permute.xlu0 %706  ;;  %v8300_v53 = vld [vmem:[#allocation3 + $0xe0] sm:$0xff]  ;;  %v8302_v55 = vld [vmem:[#allocation3 + $0xe8] sm:$0xff] }
 0x104   : > { %840 = vst.msk [vmem:[#allocation3 + $0xf8] sm:$0xff] %vm808_vm5, %v709_v50  ;;  %839 = vst.msk [vmem:[#allocation3 + $0xf0] sm:$0xff] %vm808_vm5, %v707_v51  ;;  %7003 = vmatprep.mubr.msk.f32.mxu0 %vm919_vm6, %v8300_v53 }
 0x105   : > { %7004 = vmatmul.mubr.msk.f32.gmra.mrb[28].mxu0 %vm919_vm6, %v8302_v55 }
 0x107   : > { %v493_v59 = vpop.permute.xlu1 %492  ;;  %v491_v60 = vpop.permute.xlu0 %490 }
 0x108   : > { %622 = vst.msk [vmem:[#allocation3 + $0x108] sm:$0xff] %vm588_vm4, %v493_v59  ;;  %621 = vst.msk [vmem:[#allocation3 + $0x100] sm:$0xff] %vm588_vm4, %v491_v60 }
 0x10b   : > { %v713_v61 = vpop.permute.xlu1 %712  ;;  %v711_v62 = vpop.permute.xlu0 %710  ;;  %v8312_v57 = vld [vmem:[#allocation3 + $0xf0] sm:$0xff]  ;;  %v8314_v63 = vld [vmem:[#allocation3 + $0xf8] sm:$0xff] }
 0x10c   : > { %842 = vst.msk [vmem:[#allocation3 + $0x108] sm:$0xff] %vm808_vm5, %v713_v61  ;;  %841 = vst.msk [vmem:[#allocation3 + $0x100] sm:$0xff] %vm808_vm5, %v711_v62  ;;  %7006 = vmatprep.mubr.msk.f32.mxu0 %vm919_vm6, %v8312_v57 }
 0x10d   : > { %7007 = vmatmul.mubr.msk.f32.gmra.mrb[30].mxu0 %vm919_vm6, %v8314_v63 }
 0x10f   : > { %v497_v1 = vpop.permute.xlu1 %496  ;;  %v495_v2 = vpop.permute.xlu0 %494 }
 0x110   : > { %624 = vst.msk [vmem:[#allocation3 + $0x118] sm:$0xff] %vm588_vm4, %v497_v1  ;;  %623 = vst.msk [vmem:[#allocation3 + $0x110] sm:$0xff] %vm588_vm4, %v495_v2 }
 0x113   : > { %v717_v4 = vpop.permute.xlu1 %716  ;;  %v715_v5 = vpop.permute.xlu0 %714  ;;  %v8324_v7 = vld [vmem:[#allocation3 + $0x100] sm:$0xff]  ;;  %v8326_v8 = vld [vmem:[#allocation3 + $0x108] sm:$0xff] }
 0x114   : > { %844 = vst.msk [vmem:[#allocation3 + $0x118] sm:$0xff] %vm808_vm5, %v717_v4  ;;  %843 = vst.msk [vmem:[#allocation3 + $0x110] sm:$0xff] %vm808_vm5, %v715_v5  ;;  %7009 = vmatprep.mubr.msk.f32.mxu0 %vm919_vm6, %v8324_v7 }
 0x115   : > { %7010 = vmatmul.mubr.msk.f32.gmra.mrb[32].mxu0 %vm919_vm6, %v8326_v8 }
 0x117   : > { %v501_v10 = vpop.permute.xlu1 %500  ;;  %v499_v13 = vpop.permute.xlu0 %498 }
 0x118   : > { %626 = vst.msk [vmem:[#allocation3 + $0x128] sm:$0xff] %vm588_vm4, %v501_v10  ;;  %625 = vst.msk [vmem:[#allocation3 + $0x120] sm:$0xff] %vm588_vm4, %v499_v13 }
 0x11b   : > { %v721_v15 = vpop.permute.xlu1 %720  ;;  %v719_v16 = vpop.permute.xlu0 %718  ;;  %v8336_v19 = vld [vmem:[#allocation3 + $0x110] sm:$0xff]  ;;  %v8338_v20 = vld [vmem:[#allocation3 + $0x118] sm:$0xff] }
 0x11c   : > { %846 = vst.msk [vmem:[#allocation3 + $0x128] sm:$0xff] %vm808_vm5, %v721_v15  ;;  %845 = vst.msk [vmem:[#allocation3 + $0x120] sm:$0xff] %vm808_vm5, %v719_v16  ;;  %7012 = vmatprep.mubr.msk.f32.mxu0 %vm919_vm6, %v8336_v19 }
 0x11d   : > { %7013 = vmatmul.mubr.msk.f32.gmra.mrb[34].mxu0 %vm919_vm6, %v8338_v20 }
 0x11f   : > { %v505_v21 = vpop.permute.xlu1 %504  ;;  %v503_v22 = vpop.permute.xlu0 %502 }
 0x120   : > { %628 = vst.msk [vmem:[#allocation3 + $0x138] sm:$0xff] %vm588_vm4, %v505_v21  ;;  %627 = vst.msk [vmem:[#allocation3 + $0x130] sm:$0xff] %vm588_vm4, %v503_v22 }
 0x123   : > { %v725_v27 = vpop.permute.xlu1 %724  ;;  %v723_v28 = vpop.permute.xlu0 %722  ;;  %v8348_v31 = vld [vmem:[#allocation3 + $0x120] sm:$0xff]  ;;  %v8350_v32 = vld [vmem:[#allocation3 + $0x128] sm:$0xff] }
 0x124   : > { %848 = vst.msk [vmem:[#allocation3 + $0x138] sm:$0xff] %vm808_vm5, %v725_v27  ;;  %847 = vst.msk [vmem:[#allocation3 + $0x130] sm:$0xff] %vm808_vm5, %v723_v28  ;;  %7015 = vmatprep.mubr.msk.f32.mxu0 %vm919_vm6, %v8348_v31 }
 0x125   : > { %7016 = vmatmul.mubr.msk.f32.gmra.mrb[36].mxu0 %vm919_vm6, %v8350_v32 }
 0x127   : > { %v509_v37 = vpop.permute.xlu1 %508  ;;  %v507_v39 = vpop.permute.xlu0 %506 }
 0x128   : > { %630 = vst.msk [vmem:[#allocation3 + $0x148] sm:$0xff] %vm588_vm4, %v509_v37  ;;  %629 = vst.msk [vmem:[#allocation3 + $0x140] sm:$0xff] %vm588_vm4, %v507_v39 }
 0x12b   : > { %v729_v40 = vpop.permute.xlu1 %728  ;;  %v727_v41 = vpop.permute.xlu0 %726  ;;  %v8360_v46 = vld [vmem:[#allocation3 + $0x130] sm:$0xff]  ;;  %v8362_v47 = vld [vmem:[#allocation3 + $0x138] sm:$0xff] }
 0x12c   : > { %850 = vst.msk [vmem:[#allocation3 + $0x148] sm:$0xff] %vm808_vm5, %v729_v40  ;;  %849 = vst.msk [vmem:[#allocation3 + $0x140] sm:$0xff] %vm808_vm5, %v727_v41  ;;  %7018 = vmatprep.mubr.msk.f32.mxu0 %vm919_vm6, %v8360_v46 }
 0x12d   : > { %7019 = vmatmul.mubr.msk.f32.gmra.mrb[38].mxu0 %vm919_vm6, %v8362_v47 }
 0x12f   : > { %v513_v50 = vpop.permute.xlu1 %512  ;;  %v511_v51 = vpop.permute.xlu0 %510 }
 0x130   : > { %632 = vst.msk [vmem:[#allocation3 + $0x158] sm:$0xff] %vm588_vm4, %v513_v50  ;;  %631 = vst.msk [vmem:[#allocation3 + $0x150] sm:$0xff] %vm588_vm4, %v511_v51 }
 0x133   : > { %v733_v59 = vpop.permute.xlu1 %732  ;;  %v731_v60 = vpop.permute.xlu0 %730  ;;  %v8372_v61 = vld [vmem:[#allocation3 + $0x140] sm:$0xff]  ;;  %v8374_v62 = vld [vmem:[#allocation3 + $0x148] sm:$0xff] }
 0x134   : > { %852 = vst.msk [vmem:[#allocation3 + $0x158] sm:$0xff] %vm808_vm5, %v733_v59  ;;  %851 = vst.msk [vmem:[#allocation3 + $0x150] sm:$0xff] %vm808_vm5, %v731_v60  ;;  %7021 = vmatprep.mubr.msk.f32.mxu0 %vm919_vm6, %v8372_v61 }
 0x135   : > { %7022 = vmatmul.mubr.msk.f32.gmra.mrb[40].mxu0 %vm919_vm6, %v8374_v62 }
 0x137   : > { %v517_v1 = vpop.permute.xlu1 %516  ;;  %v515_v2 = vpop.permute.xlu0 %514 }
 0x138   : > { %634 = vst.msk [vmem:[#allocation3 + $0x168] sm:$0xff] %vm588_vm4, %v517_v1  ;;  %633 = vst.msk [vmem:[#allocation3 + $0x160] sm:$0xff] %vm588_vm4, %v515_v2 }
 0x13b   : > { %v737_v4 = vpop.permute.xlu1 %736  ;;  %v735_v5 = vpop.permute.xlu0 %734  ;;  %v8384_v10 = vld [vmem:[#allocation3 + $0x150] sm:$0xff]  ;;  %v8386_v13 = vld [vmem:[#allocation3 + $0x158] sm:$0xff] }
 0x13c   : > { %854 = vst.msk [vmem:[#allocation3 + $0x168] sm:$0xff] %vm808_vm5, %v737_v4  ;;  %853 = vst.msk [vmem:[#allocation3 + $0x160] sm:$0xff] %vm808_vm5, %v735_v5  ;;  %7024 = vmatprep.mubr.msk.f32.mxu0 %vm919_vm6, %v8384_v10 }
 0x13d   : > { %7025 = vmatmul.mubr.msk.f32.gmra.mrb[42].mxu0 %vm919_vm6, %v8386_v13 }
 0x13f   : > { %v521_v15 = vpop.permute.xlu1 %520  ;;  %v519_v16 = vpop.permute.xlu0 %518 }
 0x140   : > { %636 = vst.msk [vmem:[#allocation3 + $0x178] sm:$0xff] %vm588_vm4, %v521_v15  ;;  %635 = vst.msk [vmem:[#allocation3 + $0x170] sm:$0xff] %vm588_vm4, %v519_v16 }
 0x143   : > { %v741_v21 = vpop.permute.xlu1 %740  ;;  %v739_v22 = vpop.permute.xlu0 %738  ;;  %v8396_v27 = vld [vmem:[#allocation3 + $0x160] sm:$0xff]  ;;  %v8398_v28 = vld [vmem:[#allocation3 + $0x168] sm:$0xff] }
 0x144   : > { %856 = vst.msk [vmem:[#allocation3 + $0x178] sm:$0xff] %vm808_vm5, %v741_v21  ;;  %855 = vst.msk [vmem:[#allocation3 + $0x170] sm:$0xff] %vm808_vm5, %v739_v22  ;;  %7027 = vmatprep.mubr.msk.f32.mxu0 %vm919_vm6, %v8396_v27 }
 0x145   : > { %7028 = vmatmul.mubr.msk.f32.gmra.mrb[44].mxu0 %vm919_vm6, %v8398_v28 }
 0x147   : > { %v525_v37 = vpop.permute.xlu1 %524  ;;  %v523_v39 = vpop.permute.xlu0 %522 }
 0x148   : > { %638 = vst.msk [vmem:[#allocation3 + $0x188] sm:$0xff] %vm588_vm4, %v525_v37  ;;  %637 = vst.msk [vmem:[#allocation3 + $0x180] sm:$0xff] %vm588_vm4, %v523_v39 }
 0x14b   : > { %v745_v40 = vpop.permute.xlu1 %744  ;;  %v743_v41 = vpop.permute.xlu0 %742  ;;  %v8408_v50 = vld [vmem:[#allocation3 + $0x170] sm:$0xff]  ;;  %v8410_v51 = vld [vmem:[#allocation3 + $0x178] sm:$0xff] }
 0x14c   : > { %858 = vst.msk [vmem:[#allocation3 + $0x188] sm:$0xff] %vm808_vm5, %v745_v40  ;;  %857 = vst.msk [vmem:[#allocation3 + $0x180] sm:$0xff] %vm808_vm5, %v743_v41  ;;  %7030 = vmatprep.mubr.msk.f32.mxu0 %vm919_vm6, %v8408_v50 }
 0x14d   : > { %7031 = vmatmul.mubr.msk.f32.gmra.mrb[46].mxu0 %vm919_vm6, %v8410_v51 }
 0x14f   : > { %v529_v59 = vpop.permute.xlu1 %528  ;;  %v527_v60 = vpop.permute.xlu0 %526 }
 0x150   : > { %640 = vst.msk [vmem:[#allocation3 + $0x198] sm:$0xff] %vm588_vm4, %v529_v59  ;;  %639 = vst.msk [vmem:[#allocation3 + $0x190] sm:$0xff] %vm588_vm4, %v527_v60 }
 0x153   : > { %v747_v1 = vpop.permute.xlu1 %746  ;;  %v531_v2 = vpop.permute.xlu0 %530  ;;  %v8420_v4 = vld [vmem:[#allocation3 + $0x180] sm:$0xff]  ;;  %v8422_v5 = vld [vmem:[#allocation3 + $0x188] sm:$0xff] }
 0x154   : > { %859 = vst.msk [vmem:[#allocation3 + $0x190] sm:$0xff] %vm808_vm5, %v747_v1  ;;  %7033 = vmatprep.mubr.msk.f32.mxu0 %vm919_vm6, %v8420_v4 }
 0x155   : > { %641 = vst.msk [vmem:[#allocation3 + $0x1a0] sm:$0xff] %vm588_vm4, %v531_v2  ;;  %7034 = vmatmul.mubr.msk.f32.gmra.mrb[48].mxu0 %vm919_vm6, %v8422_v5 }
 0x157   : > { %v749_v15 = vpop.permute.xlu1 %748  ;;  %v533_v16 = vpop.permute.xlu0 %532 }
 0x158   : > { %860 = vst.msk [vmem:[#allocation3 + $0x198] sm:$0xff] %vm808_vm5, %v749_v15 }
 0x159   : > { %642 = vst.msk [vmem:[#allocation3 + $0x1a8] sm:$0xff] %vm588_vm4, %v533_v16 }
 0x15b   : > { %v751_v21 = vpop.permute.xlu0 %750  ;;  %v753_v22 = vpop.permute.xlu1 %752  ;;  %v8432_v37 = vld [vmem:[#allocation3 + $0x190] sm:$0xff] }
 0x15c   : > { %861 = vst.msk [vmem:[#allocation3 + $0x1a0] sm:$0xff] %vm808_vm5, %v751_v21  ;;  %862 = vst.msk [vmem:[#allocation3 + $0x1a8] sm:$0xff] %vm808_vm5, %v753_v22  ;;  %7036 = vmatprep.mubr.msk.f32.mxu0 %vm919_vm6, %v8432_v37 }
 0x15f   : > { %v8438_v39 = vld [vmem:[#allocation3 + $0x198] sm:$0xff] }
 0x160   : > { %7037 = vmatmul.mubr.msk.f32.gmra.mrb[50].mxu0 %vm919_vm6, %v8438_v39 }
 0x161   : > { %7131 = vmatprep.mubr.msk.f32.mxu0 %vm919_vm6, %v8030_v3 }
 0x163   : > { %v8444_v40 = vld [vmem:[#allocation3 + $0x1a0] sm:$0xff]  ;;  %v8446_v41 = vld [vmem:[#allocation3 + $0x1a8] sm:$0xff] }
 0x164   : > { %7039 = vmatprep.mubr.msk.f32.mxu1 %vm919_vm6, %v8444_v40  ;;  %7132 = vmatmul.mubr.msk.f32.vlgmr.msra.gmra.mrb[52].mxu0 %vm919_vm6, %v8040_v6 }
 0x165   : > { %7040 = vmatmul.mubr.msk.f32.vlgmr.msra.gmra.mrb[0].mxu1 %vm919_vm6, %v8446_v41  ;;  %7134 = vmatprep.mubr.msk.f32.mxu0 %vm919_vm6, %v8056_v11 }
 0x166   : > { %7457 = vmatpush3.bf16.msk.msra.mxu1 %vm7806_vm3, %v8251_v14  ;;  %7046 = vmatprep.mubr.msk.f32.mxu1 %vm919_vm6, %v8030_v3  ;;  %v6963_v59 = vpop.f32.mrb[0].mxu0 }
 0x167   : > { %v1479_v60 = vrot.slane %v6963_v59, 7  ;;  %v8467_v1 = vpop.f32.mrb[1].mxu0 }
 0x168   : > { %7135 = vmatmul.mubr.msk.f32.gmra.mrb[54].mxu0 %vm919_vm6, %v8058_v12  ;;  %v10799_v38 = vrot.slane %v8467_v1, 7 }
 0x169   : > { %7047 = vmatmul.mubr.msk.f32.vlgmr.msra.gmra.mrb[2].mxu1 %vm919_vm6, %v8040_v6  ;;  %7137 = vmatprep.mubr.msk.f32.mxu0 %vm919_vm6, %v8076_v17 }
 0x16a   : > { %7049 = vmatprep.mubr.msk.f32.mxu1 %vm919_vm6, %v8056_v11  ;;  %v8481_v3 = vsel %vm1477_vm7, %v10799_v38, %v1479_v60 }
 0x16c   : > { %7138 = vmatmul.mubr.msk.f32.gmra.mrb[56].mxu0 %vm919_vm6, %v8078_v18 }
 0x16d   : > { %7050 = vmatmul.mubr.msk.f32.gmra.mrb[4].mxu1 %vm919_vm6, %v8058_v12  ;;  %7140 = vmatprep.mubr.msk.f32.mxu0 %vm919_vm6, %v8096_v23 }
 0x16e   : > { %7052 = vmatprep.mubr.msk.f32.mxu1 %vm919_vm6, %v8076_v17  ;;  %v6966_v6 = vpop.f32.mrb[2].mxu0 }
 0x16f   : > { %v1483_v11 = vrot.slane %v6966_v6, 7  ;;  %v1162_v12 = vpop.f32.mrb[3].mxu0 }
 0x170   : > { %7141 = vmatmul.mubr.msk.f32.gmra.mrb[58].mxu0 %vm919_vm6, %v8098_v24  ;;  %v1481_v14 = vrot.slane %v1162_v12, 7 }
 0x171   : > { %7053 = vmatmul.mubr.msk.f32.gmra.mrb[6].mxu1 %vm919_vm6, %v8078_v18  ;;  %7143 = vmatprep.mubr.msk.f32.mxu0 %vm919_vm6, %v8116_v29 }
 0x172   : > { %7055 = vmatprep.mubr.msk.f32.mxu1 %vm919_vm6, %v8096_v23  ;;  %v8500_v17 = vsel %vm1477_vm7, %v1481_v14, %v1483_v11  ;;  %v8503_v18 = vsel %vm1477_vm7, %v1479_v60, %v1481_v14 }
 0x174   : > { %7144 = vmatmul.mubr.msk.f32.gmra.mrb[60].mxu0 %vm919_vm6, %v8118_v30 }
 0x175   : > { %7056 = vmatmul.mubr.msk.f32.gmra.mrb[8].mxu1 %vm919_vm6, %v8098_v24  ;;  %7146 = vmatprep.mubr.msk.f32.mxu0 %vm919_vm6, %v8136_v35 }
 0x176   : > { %7058 = vmatprep.mubr.msk.f32.mxu1 %vm919_vm6, %v8116_v29 }
 0x178   : > { %7147 = vmatmul.mubr.msk.f32.gmra.mrb[62].mxu0 %vm919_vm6, %v8138_v36 }
 0x179   : > { %v6969_v23 = vpop.f32.mrb[4].mxu0  ;;  %7059 = vmatmul.mubr.msk.f32.gmra.mrb[10].mxu1 %vm919_vm6, %v8118_v30  ;;  %7149 = vmatprep.mubr.msk.f32.mxu0 %vm919_vm6, %v8156_v42 }
 0x17a   : > { %v1487_v24 = vrot.slane %v6969_v23, 7  ;;  %v1172_v2 = vpop.f32.mrb[5].mxu0  ;;  %7061 = vmatprep.mubr.msk.f32.mxu1 %vm919_vm6, %v8136_v35 }
 0x17b   : > { %v1485_v15 = vrot.slane %v1172_v2, 7 }
 0x17c   : > { %7150 = vmatmul.mubr.msk.f32.gmra.mrb[64].mxu0 %vm919_vm6, %v8158_v43 }
 0x17d   : > { %7062 = vmatmul.mubr.msk.f32.gmra.mrb[12].mxu1 %vm919_vm6, %v8138_v36  ;;  %7152 = vmatprep.mubr.msk.f32.mxu0 %vm919_vm6, %v8176_v48  ;;  %v8522_v29 = vsel %vm1477_vm7, %v1485_v15, %v1487_v24  ;;  %v8525_v30 = vsel %vm1477_vm7, %v1483_v11, %v1485_v15 }
 0x17e   : > { %7064 = vmatprep.mubr.msk.f32.mxu1 %vm919_vm6, %v8156_v42 }
 0x180   : > { %7153 = vmatmul.mubr.msk.f32.gmra.mrb[66].mxu0 %vm919_vm6, %v8178_v49 }
 0x181   : > { %v6972_v35 = vpop.f32.mrb[6].mxu0  ;;  %7065 = vmatmul.mubr.msk.f32.gmra.mrb[14].mxu1 %vm919_vm6, %v8158_v43  ;;  %7155 = vmatprep.mubr.msk.f32.mxu0 %vm919_vm6, %v8196_v52 }
 0x182   : > { %v1491_v36 = vrot.slane %v6972_v35, 7  ;;  %v1182_v16 = vpop.f32.mrb[7].mxu0  ;;  %7067 = vmatprep.mubr.msk.f32.mxu1 %vm919_vm6, %v8176_v48 }
 0x183   : > { %v1489_v21 = vrot.slane %v1182_v16, 7 }
 0x184   : > { %7156 = vmatmul.mubr.msk.f32.gmra.mrb[68].mxu0 %vm919_vm6, %v8198_v58 }
 0x185   : > { %7068 = vmatmul.mubr.msk.f32.gmra.mrb[16].mxu1 %vm919_vm6, %v8178_v49  ;;  %7158 = vmatprep.mubr.msk.f32.mxu0 %vm919_vm6, %v8216_v54  ;;  %v8544_v42 = vsel %vm1477_vm7, %v1489_v21, %v1491_v36  ;;  %v8547_v43 = vsel %vm1477_vm7, %v1487_v24, %v1489_v21 }
 0x186   : > { %7070 = vmatprep.mubr.msk.f32.mxu1 %vm919_vm6, %v8196_v52 }
 0x188   : > { %7159 = vmatmul.mubr.msk.f32.gmra.mrb[70].mxu0 %vm919_vm6, %v8218_v0 }
 0x189   : > { %v6975_v48 = vpop.f32.mrb[8].mxu0  ;;  %7071 = vmatmul.mubr.msk.f32.gmra.mrb[18].mxu1 %vm919_vm6, %v8198_v58  ;;  %7161 = vmatprep.mubr.msk.f32.mxu0 %vm919_vm6, %v8235_v56 }
 0x18a   : > { %v1495_v49 = vrot.slane %v6975_v48, 7  ;;  %v1192_v22 = vpop.f32.mrb[9].mxu0  ;;  %7073 = vmatprep.mubr.msk.f32.mxu1 %vm919_vm6, %v8216_v54 }
 0x18b   : > { %v1493_v59 = vrot.slane %v1192_v22, 7 }
 0x18c   : > { %7162 = vmatmul.mubr.msk.f32.gmra.mrb[72].mxu0 %vm919_vm6, %v8237_v9 }
 0x18d   : > { %7074 = vmatmul.mubr.msk.f32.gmra.mrb[20].mxu1 %vm919_vm6, %v8218_v0  ;;  %7164 = vmatprep.mubr.msk.f32.mxu0 %vm919_vm6, %v8264_v25  ;;  %v8566_v52 = vsel %vm1477_vm7, %v1493_v59, %v1495_v49  ;;  %v8569_v58 = vsel %vm1477_vm7, %v1491_v36, %v1493_v59 }
 0x18e   : > { %7076 = vmatprep.mubr.msk.f32.mxu1 %vm919_vm6, %v8235_v56 }
 0x190   : > { %7165 = vmatmul.mubr.msk.f32.gmra.mrb[74].mxu0 %vm919_vm6, %v8266_v26 }
 0x191   : > { %v6978_v54 = vpop.f32.mrb[10].mxu0  ;;  %7077 = vmatmul.mubr.msk.f32.gmra.mrb[22].mxu1 %vm919_vm6, %v8237_v9  ;;  %7167 = vmatprep.mubr.msk.f32.mxu0 %vm919_vm6, %v8276_v33 }
 0x192   : > { %v1499_v0 = vrot.slane %v6978_v54, 7  ;;  %v1202_v60 = vpop.f32.mrb[11].mxu0  ;;  %7079 = vmatprep.mubr.msk.f32.mxu1 %vm919_vm6, %v8264_v25 }
 0x193   : > { %v1497_v6 = vrot.slane %v1202_v60, 7 }
 0x194   : > { %7168 = vmatmul.mubr.msk.f32.gmra.mrb[76].mxu0 %vm919_vm6, %v8278_v34 }
 0x195   : > { %7080 = vmatmul.mubr.msk.f32.gmra.mrb[24].mxu1 %vm919_vm6, %v8266_v26  ;;  %7170 = vmatprep.mubr.msk.f32.mxu0 %vm919_vm6, %v8288_v44  ;;  %v8588_v56 = vsel %vm1477_vm7, %v1497_v6, %v1499_v0  ;;  %v8591_v9 = vsel %vm1477_vm7, %v1495_v49, %v1497_v6 }
 0x196   : > { %7082 = vmatprep.mubr.msk.f32.mxu1 %vm919_vm6, %v8276_v33 }
 0x198   : > { %7171 = vmatmul.mubr.msk.f32.gmra.mrb[78].mxu0 %vm919_vm6, %v8290_v45 }
 0x199   : > { %v6981_v25 = vpop.f32.mrb[12].mxu0  ;;  %7083 = vmatmul.mubr.msk.f32.gmra.mrb[26].mxu1 %vm919_vm6, %v8278_v34  ;;  %7173 = vmatprep.mubr.msk.f32.mxu0 %vm919_vm6, %v8300_v53 }
 0x19a   : > { %v1503_v26 = vrot.slane %v6981_v25, 7  ;;  %v1212_v11 = vpop.f32.mrb[13].mxu0  ;;  %7085 = vmatprep.mubr.msk.f32.mxu1 %vm919_vm6, %v8288_v44 }
 0x19b   : > { %v1501_v12 = vrot.slane %v1212_v11, 7 }
 0x19c   : > { %7174 = vmatmul.mubr.msk.f32.gmra.mrb[80].mxu0 %vm919_vm6, %v8302_v55 }
 0x19d   : > { %7086 = vmatmul.mubr.msk.f32.gmra.mrb[28].mxu1 %vm919_vm6, %v8290_v45  ;;  %7176 = vmatprep.mubr.msk.f32.mxu0 %vm919_vm6, %v8312_v57  ;;  %v8610_v33 = vsel %vm1477_vm7, %v1501_v12, %v1503_v26  ;;  %v8613_v34 = vsel %vm1477_vm7, %v1499_v0, %v1501_v12 }
 0x19e   : > { %7088 = vmatprep.mubr.msk.f32.mxu1 %vm919_vm6, %v8300_v53 }
 0x1a0   : > { %7177 = vmatmul.mubr.msk.f32.gmra.mrb[82].mxu0 %vm919_vm6, %v8314_v63 }
 0x1a1   : > { %v6984_v44 = vpop.f32.mrb[14].mxu0  ;;  %7089 = vmatmul.mubr.msk.f32.gmra.mrb[30].mxu1 %vm919_vm6, %v8302_v55  ;;  %7179 = vmatprep.mubr.msk.f32.mxu0 %vm919_vm6, %v8324_v7 }
 0x1a2   : > { %v1507_v45 = vrot.slane %v6984_v44, 7  ;;  %v1222_v14 = vpop.f32.mrb[15].mxu0  ;;  %7091 = vmatprep.mubr.msk.f32.mxu1 %vm919_vm6, %v8312_v57 }
 0x1a3   : > { %v1505_v23 = vrot.slane %v1222_v14, 7 }
 0x1a4   : > { %7180 = vmatmul.mubr.msk.f32.gmra.mrb[84].mxu0 %vm919_vm6, %v8326_v8 }
 0x1a5   : > { %7092 = vmatmul.mubr.msk.f32.gmra.mrb[32].mxu1 %vm919_vm6, %v8314_v63  ;;  %7182 = vmatprep.mubr.msk.f32.mxu0 %vm919_vm6, %v8336_v19  ;;  %v8632_v53 = vsel %vm1477_vm7, %v1505_v23, %v1507_v45  ;;  %v8635_v55 = vsel %vm1477_vm7, %v1503_v26, %v1505_v23 }
 0x1a6   : > { %7094 = vmatprep.mubr.msk.f32.mxu1 %vm919_vm6, %v8324_v7 }
 0x1a8   : > { %7183 = vmatmul.mubr.msk.f32.gmra.mrb[86].mxu0 %vm919_vm6, %v8338_v20 }
 0x1a9   : > { %v6987_v57 = vpop.f32.mrb[16].mxu0  ;;  %7095 = vmatmul.mubr.msk.f32.gmra.mrb[34].mxu1 %vm919_vm6, %v8326_v8  ;;  %7185 = vmatprep.mubr.msk.f32.mxu0 %vm919_vm6, %v8348_v31 }
 0x1aa   : > { %v1511_v63 = vrot.slane %v6987_v57, 7  ;;  %v1232_v24 = vpop.f32.mrb[17].mxu0  ;;  %7097 = vmatprep.mubr.msk.f32.mxu1 %vm919_vm6, %v8336_v19 }
 0x1ab   : > { %v1509_v2 = vrot.slane %v1232_v24, 7 }
 0x1ac   : > { %7186 = vmatmul.mubr.msk.f32.gmra.mrb[88].mxu0 %vm919_vm6, %v8350_v32 }
 0x1ad   : > { %7098 = vmatmul.mubr.msk.f32.gmra.mrb[36].mxu1 %vm919_vm6, %v8338_v20  ;;  %7188 = vmatprep.mubr.msk.f32.mxu0 %vm919_vm6, %v8360_v46  ;;  %v8654_v7 = vsel %vm1477_vm7, %v1509_v2, %v1511_v63  ;;  %v8657_v8 = vsel %vm1477_vm7, %v1507_v45, %v1509_v2 }
 0x1ae   : > { %7100 = vmatprep.mubr.msk.f32.mxu1 %vm919_vm6, %v8348_v31 }
 0x1b0   : > { %7189 = vmatmul.mubr.msk.f32.gmra.mrb[90].mxu0 %vm919_vm6, %v8362_v47 }
 0x1b1   : > { %v6990_v19 = vpop.f32.mrb[18].mxu0  ;;  %7101 = vmatmul.mubr.msk.f32.gmra.mrb[38].mxu1 %vm919_vm6, %v8350_v32  ;;  %7191 = vmatprep.mubr.msk.f32.mxu0 %vm919_vm6, %v8372_v61 }
 0x1b2   : > { %v1515_v20 = vrot.slane %v6990_v19, 7  ;;  %v1242_v15 = vpop.f32.mrb[19].mxu0  ;;  %7103 = vmatprep.mubr.msk.f32.mxu1 %vm919_vm6, %v8360_v46 }
 0x1b3   : > { %v1513_v35 = vrot.slane %v1242_v15, 7 }
 0x1b4   : > { %7192 = vmatmul.mubr.msk.f32.gmra.mrb[92].mxu0 %vm919_vm6, %v8374_v62 }
 0x1b5   : > { %7104 = vmatmul.mubr.msk.f32.gmra.mrb[40].mxu1 %vm919_vm6, %v8362_v47  ;;  %7194 = vmatprep.mubr.msk.f32.mxu0 %vm919_vm6, %v8384_v10  ;;  %v8676_v31 = vsel %vm1477_vm7, %v1513_v35, %v1515_v20  ;;  %v8679_v32 = vsel %vm1477_vm7, %v1511_v63, %v1513_v35 }
 0x1b6   : > { %7106 = vmatprep.mubr.msk.f32.mxu1 %vm919_vm6, %v8372_v61 }
 0x1b8   : > { %7195 = vmatmul.mubr.msk.f32.gmra.mrb[94].mxu0 %vm919_vm6, %v8386_v13 }
 0x1b9   : > { %v6993_v46 = vpop.f32.mrb[20].mxu0  ;;  %7107 = vmatmul.mubr.msk.f32.gmra.mrb[42].mxu1 %vm919_vm6, %v8374_v62  ;;  %7197 = vmatprep.mubr.msk.f32.mxu0 %vm919_vm6, %v8396_v27 }
 0x1ba   : > { %v1519_v47 = vrot.slane %v6993_v46, 7  ;;  %v1252_v36 = vpop.f32.mrb[21].mxu0  ;;  %7109 = vmatprep.mubr.msk.f32.mxu1 %vm919_vm6, %v8384_v10 }
 0x1bb   : > { %v1517_v16 = vrot.slane %v1252_v36, 7 }
 0x1bc   : > { %7198 = vmatmul.mubr.msk.f32.gmra.mrb[96].mxu0 %vm919_vm6, %v8398_v28 }
 0x1bd   : > { %7110 = vmatmul.mubr.msk.f32.gmra.mrb[44].mxu1 %vm919_vm6, %v8386_v13  ;;  %7200 = vmatprep.mubr.msk.f32.mxu0 %vm919_vm6, %v8408_v50  ;;  %v8698_v61 = vsel %vm1477_vm7, %v1517_v16, %v1519_v47  ;;  %v8701_v62 = vsel %vm1477_vm7, %v1515_v20, %v1517_v16 }
 0x1be   : > { %7112 = vmatprep.mubr.msk.f32.mxu1 %vm919_vm6, %v8396_v27 }
 0x1c0   : > { %v6996_v10 = vpop.f32.mrb[22].mxu0  ;;  %7201 = vmatmul.mubr.msk.f32.gmra.mrb[98].mxu0 %vm919_vm6, %v8410_v51 }
 0x1c1   : > { %v1523_v21 = vrot.slane %v6996_v10, 7  ;;  %v1262_v48 = vpop.f32.mrb[23].mxu0  ;;  %7113 = vmatmul.mubr.msk.f32.gmra.mrb[46].mxu1 %vm919_vm6, %v8398_v28  ;;  %7203 = vmatprep.mubr.msk.f32.mxu0 %vm919_vm6, %v8420_v4 }
 0x1c2   : > { %v1521_v13 = vrot.slane %v1262_v48, 7  ;;  %7115 = vmatprep.mubr.msk.f32.mxu1 %vm919_vm6, %v8408_v50 }
 0x1c4   : > { %7204 = vmatmul.mubr.msk.f32.gmra.mrb[100].mxu0 %vm919_vm6, %v8422_v5  ;;  %v8716_v27 = vsel %vm1477_vm7, %v1521_v13, %v1523_v21  ;;  %v8719_v49 = vsel %vm1477_vm7, %v1519_v47, %v1521_v13 }
 0x1c5   : > { %7116 = vmatmul.mubr.msk.f32.gmra.mrb[48].mxu1 %vm919_vm6, %v8410_v51  ;;  %7206 = vmatprep.mubr.msk.f32.mxu0 %vm919_vm6, %v8432_v37 }
 0x1c6   : > { %7118 = vmatprep.mubr.msk.f32.mxu1 %vm919_vm6, %v8420_v4 }
 0x1c8   : > { %v6999_v28 = vpop.f32.mrb[24].mxu0  ;;  %7207 = vmatmul.mubr.msk.f32.gmra.mrb[102].mxu0 %vm919_vm6, %v8438_v39 }
 0x1c9   : > { %v1527_v50 = vrot.slane %v6999_v28, 7  ;;  %v1272_v22 = vpop.f32.mrb[25].mxu0  ;;  %7119 = vmatmul.mubr.msk.f32.gmra.mrb[50].mxu1 %vm919_vm6, %v8422_v5  ;;  %7209 = vmatprep.mubr.msk.f32.mxu0 %vm919_vm6, %v8444_v40 }
 0x1ca   : > { %v1525_v59 = vrot.slane %v1272_v22, 7  ;;  %7121 = vmatprep.mubr.msk.f32.mxu1 %vm919_vm6, %v8432_v37 }
 0x1cc   : > { %7210 = vmatmul.mubr.msk.f32.gmra.mrb[104].mxu0 %vm919_vm6, %v8446_v41  ;;  %v8738_v51 = vsel %vm1477_vm7, %v1525_v59, %v1527_v50  ;;  %v8741_v4 = vsel %vm1477_vm7, %v1523_v21, %v1525_v59 }
 0x1cd   : > { %7122 = vmatmul.mubr.msk.f32.gmra.mrb[52].mxu1 %vm919_vm6, %v8438_v39 }
 0x1ce   : > { %7124 = vmatprep.mubr.msk.f32.mxu1 %vm919_vm6, %v8444_v40 }
 0x1d0   : > { %v7002_v5 = vpop.f32.mrb[26].mxu0 }
 0x1d1   : > { %v1531_v54 = vrot.slane %v7002_v5, 7  ;;  %v1282_v0 = vpop.f32.mrb[27].mxu0  ;;  %7125 = vmatmul.mubr.msk.f32.gmra.mrb[54].mxu1 %vm919_vm6, %v8446_v41 }
 0x1d2   : > { %v1529_v37 = vrot.slane %v1282_v0, 7 }
 0x1d4   : > { %v8750_v60 = vsel %vm1477_vm7, %v1529_v37, %v1531_v54  ;;  %v8753_v6 = vsel %vm1477_vm7, %v1527_v50, %v1529_v37 }
 0x1d8   : > { %v7005_v25 = vpop.f32.mrb[28].mxu0 }
 0x1d9   : > { %v1535_v26 = vrot.slane %v7005_v25, 7  ;;  %v1292_v11 = vpop.f32.mrb[29].mxu0 }
 0x1da   : > { %v1533_v39 = vrot.slane %v1292_v11, 7 }
 0x1dc   : > { %v8756_v12 = vsel %vm1477_vm7, %v1533_v39, %v1535_v26  ;;  %v8759_v40 = vsel %vm1477_vm7, %v1531_v54, %v1533_v39 }
 0x1e0   : > { %v7008_v44 = vpop.f32.mrb[30].mxu0 }
 0x1e1   : > { %v1539_v45 = vrot.slane %v7008_v44, 7  ;;  %v1302_v41 = vpop.f32.mrb[31].mxu0 }
 0x1e2   : > { %v1537_v14 = vrot.slane %v1302_v41, 7 }
 0x1e4   : > { %v8762_v23 = vsel %vm1477_vm7, %v1537_v14, %v1539_v45  ;;  %v8765_v57 = vsel %vm1477_vm7, %v1535_v26, %v1537_v14 }
 0x1e8   : > { %v7011_v63 = vpop.f32.mrb[32].mxu0 }
 0x1e9   : > { %v1543_v24 = vrot.slane %v7011_v63, 7  ;;  %v1312_v2 = vpop.f32.mrb[33].mxu0 }
 0x1ea   : > { %v1541_v19 = vrot.slane %v1312_v2, 7 }
 0x1ec   : > { %v8768_v20 = vsel %vm1477_vm7, %v1541_v19, %v1543_v24  ;;  %v8771_v15 = vsel %vm1477_vm7, %v1539_v45, %v1541_v19 }
 0x1f0   : > { %v7014_v35 = vpop.f32.mrb[34].mxu0 }
 0x1f1   : > { %v1547_v46 = vrot.slane %v7014_v35, 7  ;;  %v1322_v47 = vpop.f32.mrb[35].mxu0 }
 0x1f2   : > { %v1545_v36 = vrot.slane %v1322_v47, 7 }
 0x1f4   : > { %v8774_v16 = vsel %vm1477_vm7, %v1545_v36, %v1547_v46  ;;  %v8777_v10 = vsel %vm1477_vm7, %v1543_v24, %v1545_v36 }
 0x1f8   : > { %v7017_v21 = vpop.f32.mrb[36].mxu0 }
 0x1f9   : > { %v1551_v48 = vrot.slane %v7017_v21, 7  ;;  %v1332_v13 = vpop.f32.mrb[37].mxu0 }
 0x1fa   : > { %v1549_v28 = vrot.slane %v1332_v13, 7 }
 0x1fc   : > { %v8780_v50 = vsel %vm1477_vm7, %v1549_v28, %v1551_v48  ;;  %v8783_v22 = vsel %vm1477_vm7, %v1547_v46, %v1549_v28 }
 0x200   : > { %v7020_v59 = vpop.f32.mrb[38].mxu0 }
 0x201   : > { %v1555_v5 = vrot.slane %v7020_v59, 7  ;;  %v1342_v54 = vpop.f32.mrb[39].mxu0 }
 0x202   : > { %v1553_v0 = vrot.slane %v1342_v54, 7 }
 0x204   : > { %v8786_v37 = vsel %vm1477_vm7, %v1553_v0, %v1555_v5  ;;  %v8789_v25 = vsel %vm1477_vm7, %v1551_v48, %v1553_v0 }
 0x208   : > { %v7023_v26 = vpop.f32.mrb[40].mxu0 }
 0x209   : > { %v1559_v11 = vrot.slane %v7023_v26, 7  ;;  %v1352_v39 = vpop.f32.mrb[41].mxu0 }
 0x20a   : > { %v1557_v44 = vrot.slane %v1352_v39, 7 }
 0x20c   : > { %v8792_v45 = vsel %vm1477_vm7, %v1557_v44, %v1559_v11  ;;  %v8795_v41 = vsel %vm1477_vm7, %v1555_v5, %v1557_v44 }
 0x210   : > { %v7026_v14 = vpop.f32.mrb[42].mxu0 }
 0x211   : > { %v1563_v63 = vrot.slane %v7026_v14, 7  ;;  %v1362_v24 = vpop.f32.mrb[43].mxu0 }
 0x212   : > { %v1561_v2 = vrot.slane %v1362_v24, 7 }
 0x214   : > { %v8798_v19 = vsel %vm1477_vm7, %v1561_v2, %v1563_v63  ;;  %v8801_v35 = vsel %vm1477_vm7, %v1559_v11, %v1561_v2 }
 0x215   : > { %10803 = vst [vmem:[#allocation5_spill] sm:$0xff] %v8801_v35 }
 0x218   : > { %v7029_v46 = vpop.f32.mrb[44].mxu0 }
 0x219   : > { %v1567_v47 = vrot.slane %v7029_v46, 7  ;;  %v1372_v36 = vpop.f32.mrb[45].mxu0 }
 0x21a   : > { %v1565_v21 = vrot.slane %v1372_v36, 7 }
 0x21c   : > { %v8804_v48 = vsel %vm1477_vm7, %v1565_v21, %v1567_v47  ;;  %v8807_v13 = vsel %vm1477_vm7, %v1563_v63, %v1565_v21 }
 0x21d   : > { %10804 = vst [vmem:[#allocation6_spill] sm:$0xff] %v8804_v48  ;;  %10805 = vst [vmem:[#allocation7_spill] sm:$0xff] %v8807_v13 }
 0x220   : > { %v7032_v28 = vpop.f32.mrb[46].mxu0 }
 0x221   : > { %v1571_v59 = vrot.slane %v7032_v28, 7  ;;  %v1382_v5 = vpop.f32.mrb[47].mxu0 }
 0x222   : > { %v1569_v54 = vrot.slane %v1382_v5, 7 }
 0x224   : > { %v8810_v0 = vsel %vm1477_vm7, %v1569_v54, %v1571_v59  ;;  %v8813_v26 = vsel %vm1477_vm7, %v1567_v47, %v1569_v54 }
 0x225   : > { %10806 = vst [vmem:[#allocation8_spill] sm:$0xff] %v8810_v0  ;;  %10807 = vst [vmem:[#allocation9_spill] sm:$0xff] %v8813_v26 }
 0x228   : > { %v7035_v11 = vpop.f32.mrb[48].mxu0 }
 0x229   : > { %v1575_v39 = vrot.slane %v7035_v11, 7  ;;  %v1392_v44 = vpop.f32.mrb[49].mxu0 }
 0x22a   : > { %v1573_v14 = vrot.slane %v1392_v44, 7 }
 0x22c   : > { %v8816_v24 = vsel %vm1477_vm7, %v1573_v14, %v1575_v39  ;;  %v8819_v63 = vsel %vm1477_vm7, %v1571_v59, %v1573_v14 }
 0x22d   : > { %10808 = vst [vmem:[#allocation10_spill] sm:$0xff] %v8816_v24  ;;  %10809 = vst [vmem:[#allocation11_spill] sm:$0xff] %v8819_v63 }
 0x233   : > { %v7038_v2 = vpop.f32.mrb[50].mxu0 }
 0x234   : > { %v1579_v46 = vrot.slane %v7038_v2, 7  ;;  %v1402_v36 = vpop.f32.mrb[51].mxu0  ;;  %v10813_v2 = vrot.slane %v8467_v1, 7  ;;  %v8844_v1 = vld [vmem:[%s10795_s2] ss:$0 sm:$0xff] }
 0x235   : > { %v1577_v21 = vrot.slane %v1402_v36, 7 }
 0x237   : > { %v7133_v28 = vpop.f32.mrb[52].mxu0  ;;  %v8822_v5 = vsel %vm1477_vm7, %v1577_v21, %v1579_v46  ;;  %v8825_v47 = vsel %vm1477_vm7, %v1575_v39, %v1577_v21 }
 0x238   : > { %10810 = vst [vmem:[#allocation12_spill] sm:$0xff] %v8822_v5  ;;  %10811 = vst [vmem:[#allocation13_spill] sm:$0xff] %v8825_v47  ;;  %v7041_v54 = vpop.f32.mrb[0].mxu1  ;;  %v8827_v11 = vpop.f32.mrb[53].mxu0  ;;  %v2431_v26 = vrot.slane %v7133_v28, 1 }
 0x239   : > { %10812 = vst [vmem:[#allocation14_spill] sm:$0xff] %v8827_v11  ;;  %v1422_v44 = vrot.slane %v7041_v54, 7  ;;  %v1412_v38 = vpop.f32.mrb[1].mxu1 }
 0x23a   : > { %v1581_v24 = vrot.slane %v1412_v38, 7 }
 0x23b   : > { %v7136_v14 = vpop.f32.mrb[54].mxu0  ;;  %v1638_v36 = vsel %vm1477_vm7, %v1422_v44, %v10813_v2 }
 0x23c   : > { %v2435_v63 = vrot.slane %v7136_v14, 1  ;;  %v7048_v0 = vpop.f32.mrb[2].mxu1  ;;  %v2116_v5 = vpop.f32.mrb[55].mxu0  ;;  %v8834_v39 = vsel %vm1477_vm7, %v1581_v24, %v1422_v44  ;;  %v8837_v21 = vsel %vm1477_vm7, %v1579_v46, %v1581_v24  ;;  %v10816_v14 = vrot.slane %v8827_v11, 1 }
 0x23d   : > { %10814 = vst [vmem:[#allocation15_spill] sm:$0xff] %v8834_v39  ;;  %10815 = vst [vmem:[#allocation16_spill] sm:$0xff] %v8837_v21  ;;  %v1981_v38 = vadd.f32 %v7048_v0, %v8481_v3  ;;  %v2433_v28 = vrot.slane %v2116_v5, 1  ;;  %v1711_v54 = vpop.f32.mrb[3].mxu1 }
 0x23e   : > { %v1980_v59 = vadd.f32 %v1711_v54, %v1638_v36  ;;  %v2432_v44 = vsel %vm2429_vm8, %v10816_v14, %v2431_v26 }
 0x23f   : > { %v2434_v47 = vsel %vm2429_vm8, %v2431_v26, %v2433_v28  ;;  %v7139_v2 = vpop.f32.mrb[56].mxu0  ;;  %v2436_v24 = vsel %vm2429_vm8, %v2433_v28, %v2435_v63 }
 0x240   : > { %v2594_v46 = vadd.f32 %v2434_v47, %v1981_v38  ;;  %v2593_v21 = vadd.f32 %v2432_v44, %v1980_v59  ;;  %v2439_v3 = vrot.slane %v7139_v2, 1  ;;  %v7051_v0 = vpop.f32.mrb[4].mxu1  ;;  %v2126_v5 = vpop.f32.mrb[57].mxu0 }
 0x241   : > { %v1983_v36 = vadd.f32 %v7051_v0, %v8500_v17  ;;  %v2437_v54 = vrot.slane %v2126_v5, 1  ;;  %v1721_v39 = vpop.f32.mrb[5].mxu1 }
 0x242   : > { %v2655_v13 = vadd.f32 %v8844_v1, %v2594_v46  ;;  %v2654_v48 = vadd.f32 %v8844_v1, %v2593_v21  ;;  %v1982_v11 = vadd.f32 %v1721_v39, %v8503_v18 }
 0x243   : > { %v2438_v26 = vsel %vm2429_vm8, %v2435_v63, %v2437_v54  ;;  %v7142_v14 = vpop.f32.mrb[58].mxu0  ;;  %v2440_v28 = vsel %vm2429_vm8, %v2437_v54, %v2439_v3 }
 0x244   : > { %vm2709_vm9 = vcmp.ge.f32.partialorder %v2655_v13, 0.0  ;;  %v2763_v47 = vmul.f32 0.2, %v2655_v13  ;;  %vm2708_vm10 = vcmp.ge.f32.partialorder %v2654_v48, 0.0  ;;  %v2762_v59 = vmul.f32 0.2, %v2654_v48 }
 0x245   : > { %v2596_v38 = vadd.f32 %v2438_v26, %v1983_v36  ;;  %v2595_v44 = vadd.f32 %v2436_v24, %v1982_v11  ;;  %v2443_v17 = vrot.slane %v7142_v14, 1  ;;  %v7054_v2 = vpop.f32.mrb[6].mxu1  ;;  %v2136_v0 = vpop.f32.mrb[59].mxu0 }
 0x246   : > { %v2817_v5 = vsel %vm2709_vm9, %v2655_v13, %v2763_v47  ;;  %v2816_v46 = vsel %vm2708_vm10, %v2654_v48, %v2762_v59  ;;  %v1985_v21 = vadd.f32 %v7054_v2, %v8522_v29  ;;  %v2441_v35 = vrot.slane %v2136_v0, 1  ;;  %v1731_v18 = vpop.f32.mrb[7].mxu1 }
 0x247   : > { %2871 = vst.msk [vmem:[#allocation2 + $0x8] sm:$0xff] %vm317_vm0, %v2817_v5  ;;  %2870 = vst.msk [vmem:[#allocation2] sm:$0xff] %vm317_vm0, %v2816_v46  ;;  %v2657_v63 = vadd.f32 %v8844_v1, %v2596_v38  ;;  %v2656_v39 = vadd.f32 %v8844_v1, %v2595_v44  ;;  %v1984_v36 = vadd.f32 %v1731_v18, %v8525_v30  ;;  %v7145_v11 = vpop.f32.mrb[60].mxu0 }
 0x248   : > { %v2442_v24 = vsel %vm2429_vm8, %v2439_v3, %v2441_v35  ;;  %v7057_v54 = vpop.f32.mrb[8].mxu1  ;;  %v2146_v13 = vpop.f32.mrb[61].mxu0  ;;  %v2444_v48 = vsel %vm2429_vm8, %v2441_v35, %v2443_v17  ;;  %v2447_v30 = vrot.slane %v7145_v11, 1 }
 0x249   : > { %vm2711_vm11 = vcmp.ge.f32.partialorder %v2657_v63, 0.0  ;;  %v2765_v29 = vmul.f32 0.2, %v2657_v63  ;;  %vm2710_vm12 = vcmp.ge.f32.partialorder %v2656_v39, 0.0  ;;  %v2764_v26 = vmul.f32 0.2, %v2656_v39 }
 0x24a   : > { %v2598_v14 = vadd.f32 %v2442_v24, %v1985_v21  ;;  %v2597_v47 = vadd.f32 %v2440_v28, %v1984_v36  ;;  %v1987_v59 = vadd.f32 %v7057_v54, %v8544_v42  ;;  %v2445_v38 = vrot.slane %v2146_v13, 1  ;;  %v1741_v2 = vpop.f32.mrb[9].mxu1 }
 0x24b   : > { %v2819_v44 = vsel %vm2711_vm11, %v2657_v63, %v2765_v29  ;;  %v2818_v0 = vsel %vm2710_vm12, %v2656_v39, %v2764_v26  ;;  %v1986_v5 = vadd.f32 %v1741_v2, %v8547_v43  ;;  %v7148_v3 = vpop.f32.mrb[62].mxu0 }
 0x24c   : > { %2873 = vst.msk [vmem:[#allocation2 + $0x18] sm:$0xff] %vm317_vm0, %v2819_v44  ;;  %2872 = vst.msk [vmem:[#allocation2 + $0x10] sm:$0xff] %vm317_vm0, %v2818_v0  ;;  %v2659_v35 = vadd.f32 %v8844_v1, %v2598_v14  ;;  %v2658_v46 = vadd.f32 %v8844_v1, %v2597_v47  ;;  %v2446_v28 = vsel %vm2429_vm8, %v2443_v17, %v2445_v38  ;;  %v2451_v21 = vrot.slane %v7148_v3, 1  ;;  %v7060_v42 = vpop.f32.mrb[10].mxu1  ;;  %v2156_v18 = vpop.f32.mrb[63].mxu0 }
 0x24d   : > { %v2600_v36 = vadd.f32 %v2446_v28, %v1987_v59  ;;  %v2599_v63 = vadd.f32 %v2444_v48, %v1986_v5  ;;  %v1989_v39 = vadd.f32 %v7060_v42, %v8566_v52  ;;  %v2449_v11 = vrot.slane %v2156_v18, 1  ;;  %v1751_v43 = vpop.f32.mrb[11].mxu1 }
 0x24e   : > { %vm2713_vm13 = vcmp.ge.f32.partialorder %v2659_v35, 0.0  ;;  %v2767_v24 = vmul.f32 0.2, %v2659_v35  ;;  %vm2712_vm14 = vcmp.ge.f32.partialorder %v2658_v46, 0.0  ;;  %v2766_v54 = vmul.f32 0.2, %v2658_v46 }
 0x24f   : > { %v2661_v13 = vadd.f32 %v8844_v1, %v2600_v36  ;;  %v2660_v29 = vadd.f32 %v8844_v1, %v2599_v63  ;;  %v2450_v26 = vsel %vm2429_vm8, %v2447_v30, %v2449_v11  ;;  %v1988_v17 = vadd.f32 %v1751_v43, %v8569_v58  ;;  %v7151_v14 = vpop.f32.mrb[64].mxu0 }
 0x250   : > { %v2821_v47 = vsel %vm2713_vm13, %v2659_v35, %v2767_v24  ;;  %v2820_v59 = vsel %vm2712_vm14, %v2658_v46, %v2766_v54  ;;  %v2602_v48 = vadd.f32 %v2450_v26, %v1989_v39  ;;  %v2448_v52 = vsel %vm2429_vm8, %v2445_v38, %v2447_v30  ;;  %v7063_v2 = vpop.f32.mrb[12].mxu1  ;;  %v2166_v44 = vpop.f32.mrb[65].mxu0 }
 0x251   : > { %2875 = vst.msk [vmem:[#allocation2 + $0x28] sm:$0xff] %vm317_vm0, %v2821_v47  ;;  %2874 = vst.msk [vmem:[#allocation2 + $0x20] sm:$0xff] %vm317_vm0, %v2820_v59  ;;  %vm2715_vm15 = vcmp.ge.f32.partialorder %v2661_v13, 0.0  ;;  %v2769_v0 = vmul.f32 0.2, %v2661_v13  ;;  %vm2714_vm1 = vcmp.ge.f32.partialorder %v2660_v29, 0.0  ;;  %v2601_v28 = vadd.f32 %v2448_v52, %v1988_v17 }
 0x252   : > { %v2768_v5 = vmul.f32 0.2, %v2660_v29  ;;  %v2663_v3 = vadd.f32 %v8844_v1, %v2602_v48  ;;  %v2455_v58 = vrot.slane %v7151_v14, 1  ;;  %v1991_v35 = vadd.f32 %v7063_v2, %v8588_v56  ;;  %v1761_v46 = vpop.f32.mrb[13].mxu1 }
 0x253   : > { %v2823_v42 = vsel %vm2715_vm15, %v2661_v13, %v2769_v0  ;;  %v2453_v38 = vrot.slane %v2166_v44, 1  ;;  %v1990_v30 = vadd.f32 %v1761_v46, %v8591_v9  ;;  %v7154_v36 = vpop.f32.mrb[66].mxu0  ;;  %v2662_v39 = vadd.f32 %v8844_v1, %v2601_v28 }
 0x254   : > { %v2822_v18 = vsel %vm2714_vm1, %v2660_v29, %v2768_v5  ;;  %2877 = vst.msk [vmem:[#allocation2 + $0x38] sm:$0xff] %vm317_vm0, %v2823_v42  ;;  %vm2717_vm2 = vcmp.ge.f32.partialorder %v2663_v3, 0.0  ;;  %v2771_v63 = vmul.f32 0.2, %v2663_v3  ;;  %v2452_v43 = vsel %vm2429_vm8, %v2449_v11, %v2451_v21  ;;  %v7066_v24 = vpop.f32.mrb[14].mxu1  ;;  %v2176_v54 = vpop.f32.mrb[67].mxu0 }
 0x255   : > { %2876 = vst.msk [vmem:[#allocation2 + $0x30] sm:$0xff] %vm317_vm0, %v2822_v18  ;;  %v2454_v56 = vsel %vm2429_vm8, %v2451_v21, %v2453_v38  ;;  %v2603_v13 = vadd.f32 %v2452_v43, %v1990_v30  ;;  %v1993_v29 = vadd.f32 %v7066_v24, %v8610_v33  ;;  %v1771_v26 = vpop.f32.mrb[15].mxu1  ;;  %vm2716_vm3 = vcmp.ge.f32.partialorder %v2662_v39, 0.0 }
 0x256   : > { %v2825_v9 = vsel %vm2717_vm2, %v2663_v3, %v2771_v63  ;;  %v2770_v17 = vmul.f32 0.2, %v2662_v39  ;;  %v2604_v14 = vadd.f32 %v2454_v56, %v1991_v35  ;;  %v2457_v59 = vrot.slane %v2176_v54, 1 }
 0x257   : > { %2879 = vst.msk [vmem:[#allocation2 + $0x48] sm:$0xff] %vm317_vm0, %v2825_v9  ;;  %v2664_v47 = vadd.f32 %v8844_v1, %v2603_v13  ;;  %v1992_v48 = vadd.f32 %v1771_v26, %v8613_v34  ;;  %v2456_v11 = vsel %vm2429_vm8, %v2453_v38, %v2455_v58  ;;  %v7157_v52 = vpop.f32.mrb[68].mxu0  ;;  %v2459_v44 = vrot.slane %v7154_v36, 1 }
 0x258   : > { %v2824_v2 = vsel %vm2716_vm3, %v2662_v39, %v2770_v17  ;;  %v2665_v21 = vadd.f32 %v8844_v1, %v2604_v14  ;;  %v2463_v33 = vrot.slane %v7157_v52, 1  ;;  %v7069_v0 = vpop.f32.mrb[16].mxu1  ;;  %v2186_v5 = vpop.f32.mrb[69].mxu0  ;;  %v2458_v28 = vsel %vm2429_vm8, %v2455_v58, %v2457_v59 }
 0x259   : > { %2878 = vst.msk [vmem:[#allocation2 + $0x40] sm:$0xff] %vm317_vm0, %v2824_v2  ;;  %vm2718_vm6 = vcmp.ge.f32.partialorder %v2664_v47, 0.0  ;;  %v2772_v3 = vmul.f32 0.2, %v2664_v47  ;;  %v2605_v35 = vadd.f32 %v2456_v11, %v1992_v48  ;;  %v1781_v46 = vpop.f32.mrb[17].mxu1  ;;  %v2606_v42 = vadd.f32 %v2458_v28, %v1993_v29 }
 0x25a   : > { %vm2719_vm7 = vcmp.ge.f32.partialorder %v2665_v21, 0.0  ;;  %v2773_v34 = vmul.f32 0.2, %v2665_v21  ;;  %v1995_v18 = vadd.f32 %v7069_v0, %v8632_v53  ;;  %v2461_v36 = vrot.slane %v2186_v5, 1 }
 0x25b   : > { %v2826_v38 = vsel %vm2718_vm6, %v2664_v47, %v2772_v3  ;;  %v2666_v30 = vadd.f32 %v8844_v1, %v2605_v35  ;;  %v1994_v63 = vadd.f32 %v1781_v46, %v8635_v55  ;;  %v7160_v39 = vpop.f32.mrb[70].mxu0  ;;  %v2667_v24 = vadd.f32 %v8844_v1, %v2606_v42 }
 0x25c   : > { %v2827_v43 = vsel %vm2719_vm7, %v2665_v21, %v2773_v34  ;;  %2880 = vst.msk [vmem:[#allocation2 + $0x50] sm:$0xff] %vm317_vm0, %v2826_v38  ;;  %v2460_v58 = vsel %vm2429_vm8, %v2457_v59, %v2459_v44  ;;  %v2467_v54 = vrot.slane %v7160_v39, 1  ;;  %v7072_v56 = vpop.f32.mrb[18].mxu1  ;;  %v2196_v13 = vpop.f32.mrb[71].mxu0  ;;  %v2462_v29 = vsel %vm2429_vm8, %v2459_v44, %v2461_v36 }
 0x25d   : > { %2881 = vst.msk [vmem:[#allocation2 + $0x58] sm:$0xff] %vm317_vm0, %v2827_v43  ;;  %vm2720_vm9 = vcmp.ge.f32.partialorder %v2666_v30, 0.0  ;;  %v2774_v53 = vmul.f32 0.2, %v2666_v30  ;;  %v2607_v26 = vadd.f32 %v2460_v58, %v1994_v63  ;;  %v1791_v9 = vpop.f32.mrb[19].mxu1  ;;  %vm2721_vm10 = vcmp.ge.f32.partialorder %v2667_v24, 0.0 }
 0x25e   : > { %v2775_v55 = vmul.f32 0.2, %v2667_v24  ;;  %v2608_v17 = vadd.f32 %v2462_v29, %v1995_v18  ;;  %v1997_v14 = vadd.f32 %v7072_v56, %v8654_v7  ;;  %v2465_v59 = vrot.slane %v2196_v13, 1 }
 0x25f   : > { %v2828_v47 = vsel %vm2720_vm9, %v2666_v30, %v2774_v53  ;;  %v2668_v48 = vadd.f32 %v8844_v1, %v2607_v26  ;;  %v1996_v11 = vadd.f32 %v1791_v9, %v8657_v8  ;;  %v7163_v52 = vpop.f32.mrb[72].mxu0  ;;  %v2464_v44 = vsel %vm2429_vm8, %v2461_v36, %v2463_v33 }
 0x260   : > { %v2829_v2 = vsel %vm2721_vm10, %v2667_v24, %v2775_v55  ;;  %2882 = vst.msk [vmem:[#allocation2 + $0x60] sm:$0xff] %vm317_vm0, %v2828_v47  ;;  %v2669_v21 = vadd.f32 %v8844_v1, %v2608_v17  ;;  %v2471_v0 = vrot.slane %v7163_v52, 1  ;;  %v7075_v5 = vpop.f32.mrb[20].mxu1  ;;  %v2206_v3 = vpop.f32.mrb[73].mxu0  ;;  %v2466_v28 = vsel %vm2429_vm8, %v2463_v33, %v2465_v59 }
 0x261   : > { %2883 = vst.msk [vmem:[#allocation2 + $0x68] sm:$0xff] %vm317_vm0, %v2829_v2  ;;  %vm2722_vm11 = vcmp.ge.f32.partialorder %v2668_v48, 0.0  ;;  %v2776_v7 = vmul.f32 0.2, %v2668_v48  ;;  %v2609_v35 = vadd.f32 %v2464_v44, %v1996_v11  ;;  %v1801_v46 = vpop.f32.mrb[21].mxu1  ;;  %v2610_v34 = vadd.f32 %v2466_v28, %v1997_v14 }
 0x262   : > { %vm2723_vm12 = vcmp.ge.f32.partialorder %v2669_v21, 0.0  ;;  %v2777_v8 = vmul.f32 0.2, %v2669_v21  ;;  %v1999_v42 = vadd.f32 %v7075_v5, %v8676_v31  ;;  %v2469_v30 = vrot.slane %v2206_v3, 1 }
 0x263   : > { %v2830_v18 = vsel %vm2722_vm11, %v2668_v48, %v2776_v7  ;;  %v2670_v38 = vadd.f32 %v8844_v1, %v2609_v35  ;;  %v1998_v36 = vadd.f32 %v1801_v46, %v8679_v32  ;;  %v7166_v63 = vpop.f32.mrb[74].mxu0  ;;  %v2671_v43 = vadd.f32 %v8844_v1, %v2610_v34 }
 0x264   : > { %v2831_v39 = vsel %vm2723_vm12, %v2669_v21, %v2777_v8  ;;  %2884 = vst.msk [vmem:[#allocation2 + $0x70] sm:$0xff] %vm317_vm0, %v2830_v18  ;;  %v2468_v33 = vsel %vm2429_vm8, %v2465_v59, %v2467_v54  ;;  %v2475_v24 = vrot.slane %v7166_v63, 1  ;;  %v7078_v58 = vpop.f32.mrb[22].mxu1  ;;  %v2216_v56 = vpop.f32.mrb[75].mxu0  ;;  %v2470_v13 = vsel %vm2429_vm8, %v2467_v54, %v2469_v30 }
 0x265   : > { %2885 = vst.msk [vmem:[#allocation2 + $0x78] sm:$0xff] %vm317_vm0, %v2831_v39  ;;  %vm2724_vm13 = vcmp.ge.f32.partialorder %v2670_v38, 0.0  ;;  %v2778_v31 = vmul.f32 0.2, %v2670_v38  ;;  %v2611_v53 = vadd.f32 %v2468_v33, %v1998_v36  ;;  %v1811_v29 = vpop.f32.mrb[23].mxu1  ;;  %vm2725_vm14 = vcmp.ge.f32.partialorder %v2671_v43, 0.0 }
 0x266   : > { %v2779_v32 = vmul.f32 0.2, %v2671_v43  ;;  %v2612_v26 = vadd.f32 %v2470_v13, %v1999_v42  ;;  %v2001_v9 = vadd.f32 %v7078_v58, %v8698_v61  ;;  %v2473_v14 = vrot.slane %v2216_v56, 1 }
 0x267   : > { %v2832_v55 = vsel %vm2724_vm13, %v2670_v38, %v2778_v31  ;;  %v2672_v17 = vadd.f32 %v8844_v1, %v2611_v53  ;;  %v2000_v47 = vadd.f32 %v1811_v29, %v8701_v62  ;;  %v7169_v48 = vpop.f32.mrb[76].mxu0  ;;  %v2472_v54 = vsel %vm2429_vm8, %v2469_v30, %v2471_v0 }
 0x268   : > { %v2833_v59 = vsel %vm2725_vm14, %v2671_v43, %v2779_v32  ;;  %2886 = vst.msk [vmem:[#allocation2 + $0x80] sm:$0xff] %vm317_vm0, %v2832_v55  ;;  %v2673_v11 = vadd.f32 %v8844_v1, %v2612_v26  ;;  %v2479_v52 = vrot.slane %v7169_v48, 1  ;;  %v7081_v2 = vpop.f32.mrb[24].mxu1  ;;  %v2226_v21 = vpop.f32.mrb[77].mxu0  ;;  %v2474_v44 = vsel %vm2429_vm8, %v2471_v0, %v2473_v14 }
 0x269   : > { %2887 = vst.msk [vmem:[#allocation2 + $0x88] sm:$0xff] %vm317_vm0, %v2833_v59  ;;  %vm2726_vm15 = vcmp.ge.f32.partialorder %v2672_v17, 0.0  ;;  %v2780_v61 = vmul.f32 0.2, %v2672_v17  ;;  %v2613_v5 = vadd.f32 %v2472_v54, %v2000_v47  ;;  %v1821_v3 = vpop.f32.mrb[25].mxu1  ;;  %v2614_v7 = vadd.f32 %v2474_v44, %v2001_v9 }
 0x26a   : > { %vm2727_vm1 = vcmp.ge.f32.partialorder %v2673_v11, 0.0  ;;  %v2781_v62 = vmul.f32 0.2, %v2673_v11  ;;  %v2003_v28 = vadd.f32 %v7081_v2, %v8716_v27  ;;  %v2477_v8 = vrot.slane %v2226_v21, 1 }
 0x26b   : > { %v2834_v35 = vsel %vm2726_vm15, %v2672_v17, %v2780_v61  ;;  %v2674_v46 = vadd.f32 %v8844_v1, %v2613_v5  ;;  %v2002_v34 = vadd.f32 %v1821_v3, %v8719_v49  ;;  %v7172_v42 = vpop.f32.mrb[78].mxu0  ;;  %v2675_v38 = vadd.f32 %v8844_v1, %v2614_v7 }
 0x26c   : > { %v2835_v18 = vsel %vm2727_vm1, %v2673_v11, %v2781_v62  ;;  %2888 = vst.msk [vmem:[#allocation2 + $0x90] sm:$0xff] %vm317_vm0, %v2834_v35  ;;  %v2476_v0 = vsel %vm2429_vm8, %v2473_v14, %v2475_v24  ;;  %v2483_v30 = vrot.slane %v7172_v42, 1  ;;  %v7084_v36 = vpop.f32.mrb[26].mxu1  ;;  %v2236_v63 = vpop.f32.mrb[79].mxu0  ;;  %v2478_v39 = vsel %vm2429_vm8, %v2475_v24, %v2477_v8 }
 0x26d   : > { %2889 = vst.msk [vmem:[#allocation2 + $0x98] sm:$0xff] %vm317_vm0, %v2835_v18  ;;  %vm2728_vm2 = vcmp.ge.f32.partialorder %v2674_v46, 0.0  ;;  %v2782_v27 = vmul.f32 0.2, %v2674_v46  ;;  %v2615_v43 = vadd.f32 %v2476_v0, %v2002_v34  ;;  %v1831_v33 = vpop.f32.mrb[27].mxu1  ;;  %vm2729_vm3 = vcmp.ge.f32.partialorder %v2675_v38, 0.0 }
 0x26e   : > { %v2783_v49 = vmul.f32 0.2, %v2675_v38  ;;  %v2616_v58 = vadd.f32 %v2478_v39, %v2003_v28  ;;  %v2005_v56 = vadd.f32 %v7084_v36, %v8738_v51  ;;  %v2481_v53 = vrot.slane %v2236_v63, 1 }
 0x26f   : > { %v2836_v31 = vsel %vm2728_vm2, %v2674_v46, %v2782_v27  ;;  %v2676_v13 = vadd.f32 %v8844_v1, %v2615_v43  ;;  %v2004_v29 = vadd.f32 %v1831_v33, %v8741_v4  ;;  %v7175_v32 = vpop.f32.mrb[80].mxu0  ;;  %v2480_v24 = vsel %vm2429_vm8, %v2477_v8, %v2479_v52 }
 0x270   : > { %v2837_v26 = vsel %vm2729_vm3, %v2675_v38, %v2783_v49  ;;  %2890 = vst.msk [vmem:[#allocation2 + $0xa0] sm:$0xff] %vm317_vm0, %v2836_v31  ;;  %v2677_v9 = vadd.f32 %v8844_v1, %v2616_v58  ;;  %v2487_v55 = vrot.slane %v7175_v32, 1  ;;  %v7087_v17 = vpop.f32.mrb[28].mxu1  ;;  %v2246_v14 = vpop.f32.mrb[81].mxu0  ;;  %v2482_v47 = vsel %vm2429_vm8, %v2479_v52, %v2481_v53 }
 0x271   : > { %2891 = vst.msk [vmem:[#allocation2 + $0xa8] sm:$0xff] %vm317_vm0, %v2837_v26  ;;  %vm2730_vm6 = vcmp.ge.f32.partialorder %v2676_v13, 0.0  ;;  %v2784_v51 = vmul.f32 0.2, %v2676_v13  ;;  %v2617_v48 = vadd.f32 %v2480_v24, %v2004_v29  ;;  %v1841_v59 = vpop.f32.mrb[29].mxu1  ;;  %v2618_v11 = vadd.f32 %v2482_v47, %v2005_v56 }
 0x272   : > { %vm2731_vm7 = vcmp.ge.f32.partialorder %v2677_v9, 0.0  ;;  %v2785_v4 = vmul.f32 0.2, %v2677_v9  ;;  %v2007_v54 = vadd.f32 %v7087_v17, %v8750_v60  ;;  %v2485_v61 = vrot.slane %v2246_v14, 1 }
 0x273   : > { %v2838_v2 = vsel %vm2730_vm6, %v2676_v13, %v2784_v51  ;;  %v2678_v21 = vadd.f32 %v8844_v1, %v2617_v48  ;;  %v2006_v44 = vadd.f32 %v1841_v59, %v8753_v6  ;;  %v7178_v5 = vpop.f32.mrb[82].mxu0  ;;  %v2679_v62 = vadd.f32 %v8844_v1, %v2618_v11 }
 0x274   : > { %v2839_v3 = vsel %vm2731_vm7, %v2677_v9, %v2785_v4  ;;  %2892 = vst.msk [vmem:[#allocation2 + $0xb0] sm:$0xff] %vm317_vm0, %v2838_v2  ;;  %v2484_v52 = vsel %vm2429_vm8, %v2481_v53, %v2483_v30  ;;  %v2491_v7 = vrot.slane %v7178_v5, 1  ;;  %v7090_v28 = vpop.f32.mrb[30].mxu1  ;;  %v2256_v35 = vpop.f32.mrb[83].mxu0  ;;  %v2486_v46 = vsel %vm2429_vm8, %v2483_v30, %v2485_v61 }
 0x275   : > { %2893 = vst.msk [vmem:[#allocation2 + $0xb8] sm:$0xff] %vm317_vm0, %v2839_v3  ;;  %vm2732_vm9 = vcmp.ge.f32.partialorder %v2678_v21, 0.0  ;;  %v2786_v60 = vmul.f32 0.2, %v2678_v21  ;;  %v2619_v8 = vadd.f32 %v2484_v52, %v2006_v44  ;;  %v1851_v34 = vpop.f32.mrb[31].mxu1  ;;  %vm2733_vm10 = vcmp.ge.f32.partialorder %v2679_v62, 0.0 }
 0x276   : > { %v2787_v6 = vmul.f32 0.2, %v2679_v62  ;;  %v2620_v42 = vadd.f32 %v2486_v46, %v2007_v54  ;;  %v2009_v18 = vadd.f32 %v7090_v28, %v8756_v12  ;;  %v2489_v36 = vrot.slane %v2256_v35, 1 }
 0x277   : > { %v2840_v38 = vsel %vm2732_vm9, %v2678_v21, %v2786_v60  ;;  %v2680_v0 = vadd.f32 %v8844_v1, %v2619_v8  ;;  %v2008_v63 = vadd.f32 %v1851_v34, %v8759_v40  ;;  %v7181_v27 = vpop.f32.mrb[84].mxu0  ;;  %v2488_v30 = vsel %vm2429_vm8, %v2485_v61, %v2487_v55 }
 0x278   : > { %v2841_v39 = vsel %vm2733_vm10, %v2679_v62, %v2787_v6  ;;  %2894 = vst.msk [vmem:[#allocation2 + $0xc0] sm:$0xff] %vm317_vm0, %v2840_v38  ;;  %v2681_v43 = vadd.f32 %v8844_v1, %v2620_v42  ;;  %v2495_v33 = vrot.slane %v7181_v27, 1  ;;  %v7093_v49 = vpop.f32.mrb[32].mxu1  ;;  %v2266_v58 = vpop.f32.mrb[85].mxu0  ;;  %v2490_v56 = vsel %vm2429_vm8, %v2487_v55, %v2489_v36 }
 0x279   : > { %2895 = vst.msk [vmem:[#allocation2 + $0xc8] sm:$0xff] %vm317_vm0, %v2841_v39  ;;  %vm2734_vm11 = vcmp.ge.f32.partialorder %v2680_v0, 0.0  ;;  %v2788_v12 = vmul.f32 0.2, %v2680_v0  ;;  %v2621_v31 = vadd.f32 %v2488_v30, %v2008_v63  ;;  %v1861_v13 = vpop.f32.mrb[33].mxu1  ;;  %v2622_v53 = vadd.f32 %v2490_v56, %v2009_v18 }
 0x27a   : > { %vm2735_vm12 = vcmp.ge.f32.partialorder %v2681_v43, 0.0  ;;  %v2789_v40 = vmul.f32 0.2, %v2681_v43  ;;  %v2011_v29 = vadd.f32 %v7093_v49, %v8762_v23  ;;  %v2493_v9 = vrot.slane %v2266_v58, 1 }
 0x27b   : > { %v2842_v32 = vsel %vm2734_vm11, %v2680_v0, %v2788_v12  ;;  %v2682_v26 = vadd.f32 %v8844_v1, %v2621_v31  ;;  %v2010_v24 = vadd.f32 %v1861_v13, %v8765_v57  ;;  %v7184_v17 = vpop.f32.mrb[86].mxu0  ;;  %v2683_v51 = vadd.f32 %v8844_v1, %v2622_v53 }
 0x27c   : > { %v2843_v14 = vsel %vm2735_vm12, %v2681_v43, %v2789_v40  ;;  %2896 = vst.msk [vmem:[#allocation2 + $0xd0] sm:$0xff] %vm317_vm0, %v2842_v32  ;;  %v2492_v55 = vsel %vm2429_vm8, %v2489_v36, %v2491_v7  ;;  %v2499_v47 = vrot.slane %v7184_v17, 1  ;;  %v7096_v48 = vpop.f32.mrb[34].mxu1  ;;  %v2276_v59 = vpop.f32.mrb[87].mxu0  ;;  %v2494_v4 = vsel %vm2429_vm8, %v2491_v7, %v2493_v9 }
 0x27d   : > { %2897 = vst.msk [vmem:[#allocation2 + $0xd8] sm:$0xff] %vm317_vm0, %v2843_v14  ;;  %vm2736_vm13 = vcmp.ge.f32.partialorder %v2682_v26, 0.0  ;;  %v2790_v23 = vmul.f32 0.2, %v2682_v26  ;;  %v2623_v11 = vadd.f32 %v2492_v55, %v2010_v24  ;;  %v1871_v54 = vpop.f32.mrb[35].mxu1  ;;  %vm2737_vm14 = vcmp.ge.f32.partialorder %v2683_v51, 0.0 }
 0x27e   : > { %v2791_v57 = vmul.f32 0.2, %v2683_v51  ;;  %v2624_v2 = vadd.f32 %v2494_v4, %v2011_v29  ;;  %v2013_v21 = vadd.f32 %v7096_v48, %v8768_v20  ;;  %v2497_v5 = vrot.slane %v2276_v59, 1 }
 0x27f   : > { %v2844_v61 = vsel %vm2736_vm13, %v2682_v26, %v2790_v23  ;;  %v2684_v44 = vadd.f32 %v8844_v1, %v2623_v11  ;;  %v2012_v3 = vadd.f32 %v1871_v54, %v8771_v15  ;;  %v7187_v62 = vpop.f32.mrb[88].mxu0  ;;  %v2496_v7 = vsel %vm2429_vm8, %v2493_v9, %v2495_v33 }
 0x280   : > { %v2845_v52 = vsel %vm2737_vm14, %v2683_v51, %v2791_v57  ;;  %2898 = vst.msk [vmem:[#allocation2 + $0xe0] sm:$0xff] %vm317_vm0, %v2844_v61  ;;  %v2685_v28 = vadd.f32 %v8844_v1, %v2624_v2  ;;  %v2503_v35 = vrot.slane %v7187_v62, 1  ;;  %v7099_v60 = vpop.f32.mrb[36].mxu1  ;;  %v2286_v46 = vpop.f32.mrb[89].mxu0  ;;  %v2498_v8 = vsel %vm2429_vm8, %v2495_v33, %v2497_v5 }
 0x281   : > { %2899 = vst.msk [vmem:[#allocation2 + $0xe8] sm:$0xff] %vm317_vm0, %v2845_v52  ;;  %vm2738_vm15 = vcmp.ge.f32.partialorder %v2684_v44, 0.0  ;;  %v2792_v20 = vmul.f32 0.2, %v2684_v44  ;;  %v2625_v34 = vadd.f32 %v2496_v7, %v2012_v3  ;;  %v1881_v6 = vpop.f32.mrb[37].mxu1  ;;  %v2626_v42 = vadd.f32 %v2498_v8, %v2013_v21 }
 0x282   : > { %vm2739_vm1 = vcmp.ge.f32.partialorder %v2685_v28, 0.0  ;;  %v2793_v15 = vmul.f32 0.2, %v2685_v28  ;;  %v2015_v18 = vadd.f32 %v7099_v60, %v8774_v16  ;;  %v2501_v36 = vrot.slane %v2286_v46, 1 }
 0x283   : > { %v2846_v38 = vsel %vm2738_vm15, %v2684_v44, %v2792_v20  ;;  %v2686_v0 = vadd.f32 %v8844_v1, %v2625_v34  ;;  %v2014_v63 = vadd.f32 %v1881_v6, %v8777_v10  ;;  %v7190_v27 = vpop.f32.mrb[90].mxu0  ;;  %v2687_v43 = vadd.f32 %v8844_v1, %v2626_v42 }
 0x284   : > { %v2847_v39 = vsel %vm2739_vm1, %v2685_v28, %v2793_v15  ;;  %2900 = vst.msk [vmem:[#allocation2 + $0xf0] sm:$0xff] %vm317_vm0, %v2846_v38  ;;  %v2500_v30 = vsel %vm2429_vm8, %v2497_v5, %v2499_v47  ;;  %v2507_v33 = vrot.slane %v7190_v27, 1  ;;  %v7102_v49 = vpop.f32.mrb[38].mxu1  ;;  %v2296_v58 = vpop.f32.mrb[91].mxu0  ;;  %v2502_v12 = vsel %vm2429_vm8, %v2499_v47, %v2501_v36 }
 0x285   : > { %2901 = vst.msk [vmem:[#allocation2 + $0xf8] sm:$0xff] %vm317_vm0, %v2847_v39  ;;  %vm2740_vm2 = vcmp.ge.f32.partialorder %v2686_v0, 0.0  ;;  %v2794_v16 = vmul.f32 0.2, %v2686_v0  ;;  %v2627_v56 = vadd.f32 %v2500_v30, %v2014_v63  ;;  %v1891_v31 = vpop.f32.mrb[39].mxu1  ;;  %vm2741_vm3 = vcmp.ge.f32.partialorder %v2687_v43, 0.0 }
 0x286   : > { %v2795_v10 = vmul.f32 0.2, %v2687_v43  ;;  %v2628_v13 = vadd.f32 %v2502_v12, %v2015_v18  ;;  %v2017_v40 = vadd.f32 %v7102_v49, %v8780_v50  ;;  %v2505_v32 = vrot.slane %v2296_v58, 1 }
 0x287   : > { %v2848_v53 = vsel %vm2740_vm2, %v2686_v0, %v2794_v16  ;;  %v2688_v29 = vadd.f32 %v8844_v1, %v2627_v56  ;;  %v2016_v26 = vadd.f32 %v1891_v31, %v8783_v22  ;;  %v7193_v9 = vpop.f32.mrb[92].mxu0  ;;  %v2504_v14 = vsel %vm2429_vm8, %v2501_v36, %v2503_v35  ;;  %v10817_v56 = vld [vmem:[#allocation5_spill] sm:$0xff] }
 0x288   : > { %v2849_v24 = vsel %vm2741_vm3, %v2687_v43, %v2795_v10  ;;  %2902 = vst.msk [vmem:[#allocation2 + $0x100] sm:$0xff] %vm317_vm0, %v2848_v53  ;;  %v2689_v17 = vadd.f32 %v8844_v1, %v2628_v13  ;;  %v2511_v51 = vrot.slane %v7193_v9, 1  ;;  %v7105_v55 = vpop.f32.mrb[40].mxu1  ;;  %v2306_v47 = vpop.f32.mrb[93].mxu0  ;;  %v2506_v48 = vsel %vm2429_vm8, %v2503_v35, %v2505_v32 }
 0x289   : > { %2903 = vst.msk [vmem:[#allocation2 + $0x108] sm:$0xff] %vm317_vm0, %v2849_v24  ;;  %vm2742_vm6 = vcmp.ge.f32.partialorder %v2688_v29, 0.0  ;;  %v2796_v50 = vmul.f32 0.2, %v2688_v29  ;;  %v2629_v59 = vadd.f32 %v2504_v14, %v2016_v26  ;;  %v1901_v23 = vpop.f32.mrb[41].mxu1  ;;  %v2630_v4 = vadd.f32 %v2506_v48, %v2017_v40 }
 0x28a   : > { %vm2743_vm7 = vcmp.ge.f32.partialorder %v2689_v17, 0.0  ;;  %v2797_v22 = vmul.f32 0.2, %v2689_v17  ;;  %v2019_v11 = vadd.f32 %v7105_v55, %v8786_v37  ;;  %v2509_v2 = vrot.slane %v2306_v47, 1  ;;  %v10818_v55 = vld [vmem:[#allocation6_spill] sm:$0xff] }
 0x28b   : > { %v2850_v54 = vsel %vm2742_vm6, %v2688_v29, %v2796_v50  ;;  %v2690_v57 = vadd.f32 %v8844_v1, %v2629_v59  ;;  %v2018_v21 = vadd.f32 %v1901_v23, %v8789_v25  ;;  %v7196_v61 = vpop.f32.mrb[94].mxu0  ;;  %v2691_v5 = vadd.f32 %v8844_v1, %v2630_v4  ;;  %v10819_v23 = vld [vmem:[#allocation7_spill] sm:$0xff] }
 0x28c   : > { %v2851_v44 = vsel %vm2743_vm7, %v2689_v17, %v2797_v22  ;;  %2904 = vst.msk [vmem:[#allocation2 + $0x110] sm:$0xff] %vm317_vm0, %v2850_v54  ;;  %v2508_v3 = vsel %vm2429_vm8, %v2505_v32, %v2507_v33  ;;  %v2515_v62 = vrot.slane %v7196_v61, 1  ;;  %v7108_v52 = vpop.f32.mrb[42].mxu1  ;;  %v2316_v28 = vpop.f32.mrb[95].mxu0  ;;  %v2510_v7 = vsel %vm2429_vm8, %v2507_v33, %v2509_v2 }
 0x28d   : > { %2905 = vst.msk [vmem:[#allocation2 + $0x118] sm:$0xff] %vm317_vm0, %v2851_v44  ;;  %vm2744_vm9 = vcmp.ge.f32.partialorder %v2690_v57, 0.0  ;;  %v2798_v37 = vmul.f32 0.2, %v2690_v57  ;;  %v2631_v35 = vadd.f32 %v2508_v3, %v2018_v21  ;;  %v1911_v60 = vpop.f32.mrb[43].mxu1  ;;  %vm2745_vm10 = vcmp.ge.f32.partialorder %v2691_v5, 0.0 }
 0x28e   : > { %v2799_v25 = vmul.f32 0.2, %v2691_v5  ;;  %v2632_v46 = vadd.f32 %v2510_v7, %v2019_v11  ;;  %v2021_v20 = vadd.f32 %v7108_v52, %v8792_v45  ;;  %v2513_v6 = vrot.slane %v2316_v28, 1 }
 0x28f   : > { %v2852_v8 = vsel %vm2744_vm9, %v2690_v57, %v2798_v37  ;;  %v2692_v34 = vadd.f32 %v8844_v1, %v2631_v35  ;;  %v2020_v15 = vadd.f32 %v1911_v60, %v8795_v41  ;;  %v7199_v42 = vpop.f32.mrb[96].mxu0  ;;  %v2512_v0 = vsel %vm2429_vm8, %v2509_v2, %v2511_v51  ;;  %v10820_v37 = vld [vmem:[#allocation8_spill] sm:$0xff] }
 0x290   : > { %v2853_v18 = vsel %vm2745_vm10, %v2691_v5, %v2799_v25  ;;  %2906 = vst.msk [vmem:[#allocation2 + $0x120] sm:$0xff] %vm317_vm0, %v2852_v8  ;;  %v2693_v38 = vadd.f32 %v8844_v1, %v2632_v46  ;;  %v2519_v36 = vrot.slane %v7199_v42, 1  ;;  %v7111_v63 = vpop.f32.mrb[44].mxu1  ;;  %v2326_v27 = vpop.f32.mrb[97].mxu0  ;;  %v2514_v39 = vsel %vm2429_vm8, %v2511_v51, %v2513_v6  ;;  %v10821_v46 = vld [vmem:[#allocation9_spill] sm:$0xff] }
 0x291   : > { %2907 = vst.msk [vmem:[#allocation2 + $0x128] sm:$0xff] %vm317_vm0, %v2853_v18  ;;  %vm2746_vm11 = vcmp.ge.f32.partialorder %v2692_v34, 0.0  ;;  %v2800_v45 = vmul.f32 0.2, %v2692_v34  ;;  %v2633_v43 = vadd.f32 %v2512_v0, %v2020_v15  ;;  %v1921_v30 = vpop.f32.mrb[45].mxu1  ;;  %v2634_v33 = vadd.f32 %v2514_v39, %v2021_v20 }
 0x292   : > { %vm2747_vm12 = vcmp.ge.f32.partialorder %v2693_v38, 0.0  ;;  %v2801_v41 = vmul.f32 0.2, %v2693_v38  ;;  %v2023_v49 = vadd.f32 %v7111_v63, %v8798_v19  ;;  %v2517_v12 = vrot.slane %v2326_v27, 1 }
 0x293   : > { %v2854_v58 = vsel %vm2746_vm11, %v2692_v34, %v2800_v45  ;;  %v2694_v16 = vadd.f32 %v8844_v1, %v2633_v43  ;;  %v2022_v31 = vadd.f32 %v1921_v30, %v10817_v56  ;;  %v7202_v10 = vpop.f32.mrb[98].mxu0  ;;  %v2695_v40 = vadd.f32 %v8844_v1, %v2634_v33  ;;  %v10822_v43 = vld [vmem:[#allocation10_spill] sm:$0xff] }
 0x294   : > { %v2855_v13 = vsel %vm2747_vm12, %v2693_v38, %v2801_v41  ;;  %2908 = vst.msk [vmem:[#allocation2 + $0x130] sm:$0xff] %vm317_vm0, %v2854_v58  ;;  %v2516_v53 = vsel %vm2429_vm8, %v2513_v6, %v2515_v62  ;;  %v2523_v29 = vrot.slane %v7202_v10, 1  ;;  %v7114_v32 = vpop.f32.mrb[46].mxu1  ;;  %v2336_v26 = vpop.f32.mrb[99].mxu0  ;;  %v2518_v9 = vsel %vm2429_vm8, %v2515_v62, %v2517_v12  ;;  %v10823_v58 = vld [vmem:[#allocation11_spill] sm:$0xff] }
 0x295   : > { %2909 = vst.msk [vmem:[#allocation2 + $0x138] sm:$0xff] %vm317_vm0, %v2855_v13  ;;  %vm2748_vm13 = vcmp.ge.f32.partialorder %v2694_v16, 0.0  ;;  %v2802_v19 = vmul.f32 0.2, %v2694_v16  ;;  %v2635_v24 = vadd.f32 %v2516_v53, %v2022_v31  ;;  %v1931_v17 = vpop.f32.mrb[47].mxu1  ;;  %vm2749_vm14 = vcmp.ge.f32.partialorder %v2695_v40, 0.0 }
 0x296   : > { %v2803_v14 = vmul.f32 0.2, %v2695_v40  ;;  %v2636_v51 = vadd.f32 %v2518_v9, %v2023_v49  ;;  %v2025_v47 = vadd.f32 %v7114_v32, %v10818_v55  ;;  %v2521_v59 = vrot.slane %v2336_v26, 1 }
 0x297   : > { %v2856_v50 = vsel %vm2748_vm13, %v2694_v16, %v2802_v19  ;;  %v2696_v48 = vadd.f32 %v8844_v1, %v2635_v24  ;;  %v2024_v22 = vadd.f32 %v1931_v17, %v10819_v23  ;;  %v7205_v4 = vpop.f32.mrb[100].mxu0  ;;  %v2520_v57 = vsel %vm2429_vm8, %v2517_v12, %v2519_v36  ;;  %v10824_v17 = vld [vmem:[#allocation12_spill] sm:$0xff] }
 0x298   : > { %v2857_v11 = vsel %vm2749_vm14, %v2695_v40, %v2803_v14  ;;  %2910 = vst.msk [vmem:[#allocation2 + $0x140] sm:$0xff] %vm317_vm0, %v2856_v50  ;;  %v2697_v54 = vadd.f32 %v8844_v1, %v2636_v51  ;;  %v2527_v2 = vrot.slane %v7205_v4, 1  ;;  %v7117_v21 = vpop.f32.mrb[48].mxu1  ;;  %v2346_v61 = vpop.f32.mrb[101].mxu0  ;;  %v2522_v5 = vsel %vm2429_vm8, %v2519_v36, %v2521_v59  ;;  %v10825_v50 = vld [vmem:[#allocation13_spill] sm:$0xff] }
 0x299   : > { %2911 = vst.msk [vmem:[#allocation2 + $0x148] sm:$0xff] %vm317_vm0, %v2857_v11  ;;  %vm2750_vm15 = vcmp.ge.f32.partialorder %v2696_v48, 0.0  ;;  %v2804_v44 = vmul.f32 0.2, %v2696_v48  ;;  %v2637_v3 = vadd.f32 %v2520_v57, %v2024_v22  ;;  %v1941_v62 = vpop.f32.mrb[49].mxu1  ;;  %v2638_v28 = vadd.f32 %v2522_v5, %v2025_v47  ;;  %v10826_v11 = vld [vmem:[#allocation14_spill] sm:$0xff] }
 0x29a   : > { %vm2751_vm1 = vcmp.ge.f32.partialorder %v2697_v54, 0.0  ;;  %v2805_v52 = vmul.f32 0.2, %v2697_v54  ;;  %v2027_v7 = vadd.f32 %v7117_v21, %v10820_v37  ;;  %v2525_v25 = vrot.slane %v2346_v61, 1 }
 0x29b   : > { %v2858_v35 = vsel %vm2750_vm15, %v2696_v48, %v2804_v44  ;;  %v2698_v60 = vadd.f32 %v8844_v1, %v2637_v3  ;;  %v2026_v20 = vadd.f32 %v1941_v62, %v10821_v46  ;;  %v7208_v8 = vpop.f32.mrb[102].mxu0  ;;  %v2699_v6 = vadd.f32 %v8844_v1, %v2638_v28  ;;  %v7512_v1 = vld [vmem:[%s10795_s2] ss:$0 sm:$0xff]  ;;  %v10828_v62 = vld [vmem:[#allocation15_spill] sm:$0xff] }
 0x29c   : > { %v2859_v34 = vsel %vm2751_vm1, %v2697_v54, %v2805_v52  ;;  %2912 = vst.msk [vmem:[#allocation2 + $0x150] sm:$0xff] %vm317_vm0, %v2858_v35  ;;  %v2524_v15 = vsel %vm2429_vm8, %v2521_v59, %v2523_v29  ;;  %v2531_v42 = vrot.slane %v7208_v8, 1  ;;  %v7120_v18 = vpop.f32.mrb[50].mxu1  ;;  %v2356_v38 = vpop.f32.mrb[103].mxu0  ;;  %v2526_v36 = vsel %vm2429_vm8, %v2523_v29, %v2525_v25 }
 0x29d   : > { %2913 = vst.msk [vmem:[#allocation2 + $0x158] sm:$0xff] %vm317_vm0, %v2859_v34  ;;  %vm2752_vm2 = vcmp.ge.f32.partialorder %v2698_v60, 0.0  ;;  %v2806_v0 = vmul.f32 0.2, %v2698_v60  ;;  %v2639_v63 = vadd.f32 %v2524_v15, %v2026_v20  ;;  %v1951_v27 = vpop.f32.mrb[51].mxu1  ;;  %vm2753_vm3 = vcmp.ge.f32.partialorder %v2699_v6, 0.0 }
 0x29e   : > { %v2807_v45 = vmul.f32 0.2, %v2699_v6  ;;  %v2640_v39 = vadd.f32 %v2526_v36, %v2027_v7  ;;  %v2029_v30 = vadd.f32 %v7120_v18, %v10822_v43  ;;  %v2529_v49 = vrot.slane %v2356_v38, 1  ;;  %v10829_v7 = vld [vmem:[#allocation16_spill] sm:$0xff] }
 0x29f   : > { %v2860_v41 = vsel %vm2752_vm2, %v2698_v60, %v2806_v0  ;;  %v2700_v33 = vadd.f32 %v7512_v1, %v2639_v63  ;;  %v2028_v16 = vadd.f32 %v1951_v27, %v10823_v58  ;;  %v7211_v12 = vpop.f32.mrb[104].mxu0  ;;  %v2528_v10 = vsel %vm2429_vm8, %v2525_v25, %v2527_v2 }
 0x2a0   : > { %v2861_v56 = vsel %vm2753_vm3, %v2699_v6, %v2807_v45  ;;  %2914 = vst.msk [vmem:[#allocation2 + $0x160] sm:$0xff] %vm317_vm0, %v2860_v41  ;;  %v2701_v31 = vadd.f32 %v7512_v1, %v2640_v39  ;;  %v2535_v13 = vrot.slane %v7211_v12, 1  ;;  %v7123_v40 = vpop.f32.mrb[52].mxu1  ;;  %v2366_v53 = vpop.f32.mrb[105].mxu0  ;;  %v2530_v32 = vsel %vm2429_vm8, %v2527_v2, %v2529_v49 }
 0x2a1   : > { %2915 = vst.msk [vmem:[#allocation2 + $0x168] sm:$0xff] %vm317_vm0, %v2861_v56  ;;  %vm2754_vm6 = vcmp.ge.f32.partialorder %v2700_v33, 0.0  ;;  %v2808_v29 = vmul.f32 0.2, %v2700_v33  ;;  %v2641_v26 = vadd.f32 %v2528_v10, %v2028_v16  ;;  %v1961_v19 = vpop.f32.mrb[53].mxu1  ;;  %v2642_v24 = vadd.f32 %v2530_v32, %v2029_v30 }
 0x2a2   : > { %vm2755_vm7 = vcmp.ge.f32.partialorder %v2701_v31, 0.0  ;;  %v2809_v9 = vmul.f32 0.2, %v2701_v31  ;;  %v2031_v14 = vadd.f32 %v7123_v40, %v10824_v17  ;;  %v2533_v47 = vrot.slane %v2366_v53, 1 }
 0x2a3   : > { %v2862_v51 = vsel %vm2754_vm6, %v2700_v33, %v2808_v29  ;;  %v2702_v55 = vadd.f32 %v7512_v1, %v2641_v26  ;;  %v2030_v48 = vadd.f32 %v1961_v19, %v10825_v50  ;;  %v2703_v23 = vadd.f32 %v7512_v1, %v2642_v24 }
 0x2a4   : > { %v2863_v59 = vsel %vm2755_vm7, %v2701_v31, %v2809_v9  ;;  %2916 = vst.msk [vmem:[#allocation2 + $0x170] sm:$0xff] %vm317_vm0, %v2862_v51  ;;  %v2532_v22 = vsel %vm2429_vm8, %v2529_v49, %v2531_v42  ;;  %v7126_v4 = vpop.f32.mrb[54].mxu1  ;;  %v10827_v54 = vrot.slane %v10826_v11, 1  ;;  %v2534_v21 = vsel %vm2429_vm8, %v2531_v42, %v2533_v47 }
 0x2a5   : > { %2917 = vst.msk [vmem:[#allocation2 + $0x178] sm:$0xff] %vm317_vm0, %v2863_v59  ;;  %vm2756_vm9 = vcmp.ge.f32.partialorder %v2702_v55, 0.0  ;;  %v2810_v2 = vmul.f32 0.2, %v2702_v55  ;;  %v2643_v61 = vadd.f32 %v2532_v22, %v2030_v48  ;;  %v1971_v44 = vpop.f32.mrb[55].mxu1  ;;  %vm2757_vm10 = vcmp.ge.f32.partialorder %v2703_v23, 0.0 }
 0x2a6   : > { %v2592_v57 = vsel %vm2429_vm8, %v2535_v13, %v10827_v54  ;;  %v2811_v5 = vmul.f32 0.2, %v2703_v23  ;;  %v2644_v3 = vadd.f32 %v2534_v21, %v2031_v14  ;;  %v2033_v52 = vadd.f32 %v7126_v4, %v10828_v62 }
 0x2a7   : > { %v2864_v28 = vsel %vm2756_vm9, %v2702_v55, %v2810_v2  ;;  %v2704_v37 = vadd.f32 %v7512_v1, %v2643_v61  ;;  %v2032_v35 = vadd.f32 %v1971_v44, %v10829_v7  ;;  %v2536_v60 = vsel %vm2429_vm8, %v2533_v47, %v2535_v13 }
 0x2a8   : > { %v2865_v25 = vsel %vm2757_vm10, %v2703_v23, %v2811_v5  ;;  %2918 = vst.msk [vmem:[#allocation2 + $0x180] sm:$0xff] %vm317_vm0, %v2864_v28  ;;  %v2705_v46 = vadd.f32 %v7512_v1, %v2644_v3  ;;  %v2646_v20 = vadd.f32 %v2592_v57, %v2033_v52  ;;  %vm2924_vm15 = vcmask 24576  }
 0x2a9   : > { %2919 = vst.msk [vmem:[#allocation2 + $0x188] sm:$0xff] %vm317_vm0, %v2865_v25  ;;  %vm2758_vm11 = vcmp.ge.f32.partialorder %v2704_v37, 0.0  ;;  %v2812_v8 = vmul.f32 0.2, %v2704_v37  ;;  %v2645_v34 = vadd.f32 %v2536_v60, %v2032_v35  ;;  %vm2943_vm1 = vcmask 29696  }
 0x2aa   : > { %vm2759_vm12 = vcmp.ge.f32.partialorder %v2705_v46, 0.0  ;;  %v2813_v6 = vmul.f32 0.2, %v2705_v46  ;;  %v2707_v15 = vadd.f32 %v7512_v1, %v2646_v20  ;;  %v7565_v45 = vmov 0.0  }
 0x2ab   : > { %v2866_v42 = vsel %vm2758_vm11, %v2704_v37, %v2812_v8  ;;  %v2706_v18 = vadd.f32 %v7512_v1, %v2645_v34  ;;  %2925 = vst.msk [vmem:[#allocation2 + $0x1] sm:$0x1] %vm2924_vm15, %v7565_v45  ;;  %2926 = vst.msk [vmem:[#allocation2 + $0x19] sm:$0x1] %vm2924_vm15, %v7565_v45 }
 0x2ac   : > { %v2867_v38 = vsel %vm2759_vm12, %v2705_v46, %v2813_v6  ;;  %2920 = vst.msk [vmem:[#allocation2 + $0x190] sm:$0xff] %vm317_vm0, %v2866_v42  ;;  %vm2761_vm13 = vcmp.ge.f32.partialorder %v2707_v15, 0.0  ;;  %v2815_v0 = vmul.f32 0.2, %v2707_v15  ;;  %2968 = vst.msk [vmem:[#allocation2 + $0x8] sm:$0xff] %vm317_vm0, %v7565_v45 }
 0x2ad   : > { %2921 = vst.msk [vmem:[#allocation2 + $0x198] sm:$0xff] %vm317_vm0, %v2867_v38  ;;  %vm2760_vm14 = vcmp.ge.f32.partialorder %v2706_v18, 0.0  ;;  %v2814_v36 = vmul.f32 0.2, %v2706_v18  ;;  %2967 = vst.msk [vmem:[#allocation2] sm:$0xff] %vm317_vm0, %v7565_v45 }
 0x2ae   : > { %v2869_v63 = vsel %vm2761_vm13, %v2707_v15, %v2815_v0  ;;  %2927 = vst.msk [vmem:[#allocation2 + $0x31] sm:$0x1] %vm2924_vm15, %v7565_v45  ;;  %2928 = vst.msk [vmem:[#allocation2 + $0x49] sm:$0x1] %vm2924_vm15, %v7565_v45 }
 0x2af   : > { %2923 = vst.msk [vmem:[#allocation2 + $0x1a8] sm:$0xff] %vm317_vm0, %v2869_v63  ;;  %v2868_v27 = vsel %vm2760_vm14, %v2706_v18, %v2814_v36 }
 0x2b0   : > { %2922 = vst.msk [vmem:[#allocation2 + $0x1a0] sm:$0xff] %vm317_vm0, %v2868_v27 }
 0x2b1   : > { %2929 = vst.msk [vmem:[#allocation2 + $0x61] sm:$0x1] %vm2924_vm15, %v7565_v45  ;;  %2930 = vst.msk [vmem:[#allocation2 + $0x79] sm:$0x1] %vm2924_vm15, %v7565_v45 }
 0x2b2   : > { %2931 = vst.msk [vmem:[#allocation2 + $0x91] sm:$0x1] %vm2924_vm15, %v7565_v45  ;;  %2932 = vst.msk [vmem:[#allocation2 + $0xa9] sm:$0x1] %vm2924_vm15, %v7565_v45 }
 0x2b3   : > { %2933 = vst.msk [vmem:[#allocation2 + $0xc1] sm:$0x1] %vm2924_vm15, %v7565_v45  ;;  %2934 = vst.msk [vmem:[#allocation2 + $0xd9] sm:$0x1] %vm2924_vm15, %v7565_v45 }
 0x2b4   : > { %2935 = vst.msk [vmem:[#allocation2 + $0xf1] sm:$0x1] %vm2924_vm15, %v7565_v45  ;;  %2936 = vst.msk [vmem:[#allocation2 + $0x109] sm:$0x1] %vm2924_vm15, %v7565_v45 }
 0x2b5   : > { %2937 = vst.msk [vmem:[#allocation2 + $0x121] sm:$0x1] %vm2924_vm15, %v7565_v45  ;;  %2938 = vst.msk [vmem:[#allocation2 + $0x139] sm:$0x1] %vm2924_vm15, %v7565_v45 }
 0x2b6   : > { %2939 = vst.msk [vmem:[#allocation2 + $0x151] sm:$0x1] %vm2924_vm15, %v7565_v45  ;;  %2940 = vst.msk [vmem:[#allocation2 + $0x169] sm:$0x1] %vm2924_vm15, %v7565_v45 }
 0x2b7   : > { %2941 = vst.msk [vmem:[#allocation2 + $0x181] sm:$0x1] %vm2924_vm15, %v7565_v45  ;;  %2942 = vst.msk [vmem:[#allocation2 + $0x199] sm:$0x1] %vm2924_vm15, %v7565_v45 }
 0x2b8   : > { %2972 = vst.msk [vmem:[#allocation2 + $0x1a0] sm:$0xff] %vm317_vm0, %v7565_v45  ;;  %2971 = vst.msk [vmem:[#allocation2 + $0x198] sm:$0xff] %vm317_vm0, %v7565_v45 }
 0x2b9   : > { %2944 = vst.msk [vmem:[#allocation2 + $0x12] sm:$0x3f] %vm2943_vm1, %v7565_v45  ;;  %2945 = vst.msk [vmem:[#allocation2 + $0x2a] sm:$0x3f] %vm2943_vm1, %v7565_v45 }
 0x2ba   : > { %2946 = vst.msk [vmem:[#allocation2 + $0x42] sm:$0x3f] %vm2943_vm1, %v7565_v45  ;;  %2947 = vst.msk [vmem:[#allocation2 + $0x5a] sm:$0x3f] %vm2943_vm1, %v7565_v45 }
 0x2bb   : > { %2948 = vst.msk [vmem:[#allocation2 + $0x72] sm:$0x3f] %vm2943_vm1, %v7565_v45  ;;  %2949 = vst.msk [vmem:[#allocation2 + $0x8a] sm:$0x3f] %vm2943_vm1, %v7565_v45 }
 0x2bc   : > { %2950 = vst.msk [vmem:[#allocation2 + $0xa2] sm:$0x3f] %vm2943_vm1, %v7565_v45  ;;  %2951 = vst.msk [vmem:[#allocation2 + $0xba] sm:$0x3f] %vm2943_vm1, %v7565_v45 }
 0x2bd   : > { %2952 = vst.msk [vmem:[#allocation2 + $0xd2] sm:$0x3f] %vm2943_vm1, %v7565_v45  ;;  %2953 = vst.msk [vmem:[#allocation2 + $0xea] sm:$0x3f] %vm2943_vm1, %v7565_v45 }
 0x2be   : > { %2954 = vst.msk [vmem:[#allocation2 + $0x102] sm:$0x3f] %vm2943_vm1, %v7565_v45  ;;  %2955 = vst.msk [vmem:[#allocation2 + $0x11a] sm:$0x3f] %vm2943_vm1, %v7565_v45 }
 0x2bf   : > { %2956 = vst.msk [vmem:[#allocation2 + $0x132] sm:$0x3f] %vm2943_vm1, %v7565_v45  ;;  %2957 = vst.msk [vmem:[#allocation2 + $0x14a] sm:$0x3f] %vm2943_vm1, %v7565_v45 }
 0x2c0   : > { %2958 = vst.msk [vmem:[#allocation2 + $0x162] sm:$0x3f] %vm2943_vm1, %v7565_v45  ;;  %2959 = vst.msk [vmem:[#allocation2 + $0x17a] sm:$0x3f] %vm2943_vm1, %v7565_v45 }
 0x2c1   : > { %2960 = vst.msk [vmem:[#allocation2 + $0x192] sm:$0x3f] %vm2943_vm1, %v7565_v45  ;;  %2961 = vst.msk [vmem:[#allocation2 + $0x1aa] sm:$0x3f] %vm2943_vm1, %v7565_v45 }
 0x2c2   : > { %2969 = vst.msk [vmem:[#allocation2 + $0x10] sm:$0xff] %vm317_vm0, %v7565_v45  ;;  %2973 = vst.msk [vmem:[#allocation2 + $0x1a8] sm:$0xff] %vm317_vm0, %v7565_v45 }
 0x2c3   : > { %v3077_v39 = vld [vmem:[#allocation2] sm:$0xff]  ;;  %v2977_v43 = vld [vmem:[%s7627_s29 + $0x30] sm:$0xff]  ;;  %s7566_s27 = smov 4   ;;  %s7567_s28 = smov 8   ;;  %v2978_v30 = vld [vmem:[%s7627_s29 + $0x38] sm:$0xff]  ;;  %vm3848_vm2 = vcmask 130144  }
 0x2c4   : > { %3173 = vrot.lane.b32.xlu0 %v3077_v39, %s7566_s27  ;;  %3414 = vrot.lane.b32.xlu1 %v2977_v43, %s7567_s28  ;;  %3032 = vst.msk [vmem:[#allocation4 + $0x18] sm:$0xff] %vm317_vm0, %v2977_v43  ;;  %v3078_v41 = vld [vmem:[#allocation2 + $0x8] sm:$0xff]  ;;  %3033 = vst.msk [vmem:[#allocation4 + $0x20] sm:$0xff] %vm317_vm0, %v2978_v30  ;;  %v9110_v33 = vld [vmem:[%s7627_s29 + $0x50] sm:$0xff]  ;;  %s7568_s30 = smov 12   ;;  %s7569_s6 = smov 16  }
 0x2c5   : > { %v9107_v1 = vld [vmem:[%s7627_s29 + $0x48] sm:$0xff]  ;;  %3036 = vst.msk [vmem:[#allocation4 + $0x38] sm:$0xff] %vm317_vm0, %v9110_v33  ;;  %v2979_v49 = vld [vmem:[%s7627_s29 + $0x40] sm:$0xff]  ;;  %v9119_v58 = vld [vmem:[%s7627_s29 + $0x58] sm:$0xff]  ;;  %s7570_s15 = smov 20   ;;  %vm4044_vm3 = vcmask 162944  }
 0x2c6   : > { %3035 = vst.msk [vmem:[#allocation4 + $0x30] sm:$0xff] %vm317_vm0, %v9107_v1  ;;  %3034 = vst.msk [vmem:[#allocation4 + $0x28] sm:$0xff] %vm317_vm0, %v2979_v49  ;;  %v9122_v16 = vld [vmem:[%s7627_s29 + $0x60] sm:$0xff]  ;;  %v9131_v12 = vld [vmem:[%s7627_s29 + $0x68] sm:$0xff]  ;;  %vm4334_vm6 = vcmask 195744   ;;  %vm4434_vm7 = vcmask 195584  }
 0x2c7   : > { %3037 = vst.msk [vmem:[#allocation4 + $0x40] sm:$0xff] %vm317_vm0, %v9119_v58  ;;  %3038 = vst.msk [vmem:[#allocation4 + $0x48] sm:$0xff] %vm317_vm0, %v9122_v16  ;;  %v3608_v56 = vld [vmem:[#allocation2 + $0x18] sm:$0xff]  ;;  %v9133_v31 = vld [vmem:[#allocation2 + $0x20] sm:$0xff] }
 0x2c8   : > { %3175 = vrot.lane.b32.xlu0 %v3078_v41, %s7566_s27  ;;  %3416 = vrot.lane.b32.xlu1 %v2978_v30, %s7567_s28  ;;  %3039 = vst.msk [vmem:[#allocation4 + $0x50] sm:$0xff] %vm317_vm0, %v9131_v12  ;;  %v9138_v10 = vld [vmem:[%s7627_s29 + $0x70] sm:$0xff]  ;;  %v9143_v13 = vld [vmem:[%s7627_s29 + $0x78] sm:$0xff]  ;;  %v3610_v2 = vld [vmem:[#allocation2 + $0x28] sm:$0xff] }
 0x2c9   : > { %3040 = vst.msk [vmem:[#allocation4 + $0x58] sm:$0xff] %vm317_vm0, %v9138_v10  ;;  %v9146_v40 = vld [vmem:[%s7627_s29 + $0x80] sm:$0xff]  ;;  %3041 = vst.msk [vmem:[#allocation4 + $0x60] sm:$0xff] %vm317_vm0, %v9143_v13  ;;  %v9153_v53 = vld [vmem:[%s7627_s29 + $0x88] sm:$0xff] }
 0x2ca   : > { %3042 = vst.msk [vmem:[#allocation4 + $0x68] sm:$0xff] %vm317_vm0, %v9146_v40  ;;  %v9156_v29 = vld [vmem:[%s7627_s29 + $0x90] sm:$0xff]  ;;  %3043 = vst.msk [vmem:[#allocation4 + $0x70] sm:$0xff] %vm317_vm0, %v9153_v53  ;;  %v9166_v32 = vld [vmem:[%s7627_s29 + $0x98] sm:$0xff] }
 0x2cb   : > { %3044 = vst.msk [vmem:[#allocation4 + $0x78] sm:$0xff] %vm317_vm0, %v9156_v29  ;;  %v3079_v26 = vld [vmem:[#allocation2 + $0x10] sm:$0xff]  ;;  %3045 = vst.msk [vmem:[#allocation4 + $0x80] sm:$0xff] %vm317_vm0, %v9166_v32  ;;  %v2974_v19 = vld [vmem:[%s7627_s29 + $0x18] sm:$0xff] }
 0x2cc   : > { %3704 = vrot.lane.b32.xlu0 %v3608_v56, %s7568_s30  ;;  %3706 = vrot.lane.b32.xlu1 %v9133_v31, %s7568_s30  ;;  %v9172_v9 = vld [vmem:[%s7627_s29 + $0xa0] sm:$0xff]  ;;  %3029 = vst.msk [vmem:[#allocation4] sm:$0xff] %vm317_vm0, %v2974_v19  ;;  %v2976_v17 = vld [vmem:[%s7627_s29 + $0x28] sm:$0xff]  ;;  %v4094_v50 = vld [vmem:[#allocation2 + $0x30] sm:$0xff] }
 0x2cd   : > { %3046 = vst.msk [vmem:[#allocation4 + $0x88] sm:$0xff] %vm317_vm0, %v9172_v9  ;;  %v2975_v24 = vld [vmem:[%s7627_s29 + $0x20] sm:$0xff]  ;;  %3031 = vst.msk [vmem:[#allocation4 + $0x10] sm:$0xff] %vm317_vm0, %v2976_v17  ;;  %v9182_v14 = vld [vmem:[%s7627_s29 + $0xa8] sm:$0xff] }
 0x2ce   : > { %3030 = vst.msk [vmem:[#allocation4 + $0x8] sm:$0xff] %vm317_vm0, %v2975_v24  ;;  %v9185_v51 = vld [vmem:[%s7627_s29 + $0xb0] sm:$0xff]  ;;  %3047 = vst.msk [vmem:[#allocation4 + $0x90] sm:$0xff] %vm317_vm0, %v9182_v14  ;;  %v4431_v55 = vld [vmem:[%s10796_s3] sm:$0xff] }
 0x2cf   : > { %3048 = vst.msk [vmem:[#allocation4 + $0x98] sm:$0xff] %vm317_vm0, %v9185_v51  ;;  %v4432_v47 = vld [vmem:[%s10796_s3 + $0x8] sm:$0xff]  ;;  %v6581_v59 = vld [vmem:[%s10796_s3 + $0x30] sm:$0xff]  ;;  %v6582_v23 = vld [vmem:[%s10796_s3 + $0x38] sm:$0xff] }
 0x2d0   : > { %3900 = vrot.lane.b32.xlu0 %v9107_v1, %s7569_s6  ;;  %3177 = vrot.lane.b32.xlu1 %v3079_v26, %s7566_s27  ;;  %v7464_v48 = vpack.c.bf16 %v4432_v47, %v4431_v55  ;;  %v7472_v22 = vpack.c.bf16 %v6582_v23, %v6581_v59  ;;  %v4433_v4 = vld [vmem:[%s10796_s3 + $0x10] sm:$0xff]  ;;  %v6583_v11 = vld [vmem:[%s10796_s3 + $0x40] sm:$0xff]  ;;  %v4095_v54 = vld [vmem:[#allocation2 + $0x38] sm:$0xff] }
 0x2d1   : > { %v9218_v57 = vld [vmem:[%s7627_s29 + $0xb8] sm:$0xff]  ;;  %v9226_v21 = vld [vmem:[%s7627_s29 + $0xc0] sm:$0xff]  ;;  %v4097_v44 = vld [vmem:[#allocation2 + $0x48] sm:$0xff] }
 0x2d2   : > { %7465 = vmatprep.subr.bf16.mxu1 %v7464_v48  ;;  %7473 = vmatprep.subr.bf16.mxu0 %v7472_v22  ;;  %3049 = vst.msk [vmem:[#allocation4 + $0xa0] sm:$0xff] %vm317_vm0, %v9218_v57  ;;  %3050 = vst.msk [vmem:[#allocation4 + $0xa8] sm:$0xff] %vm317_vm0, %v9226_v21  ;;  %v4096_v61 = vld [vmem:[#allocation2 + $0x40] sm:$0xff]  ;;  %v9243_v5 = vld [vmem:[%s7627_s29 + $0xc8] sm:$0xff] }
 0x2d3   : > { %7467 = vmatpush3.bf16.msra.mxu1 %v7464_v48  ;;  %7475 = vmatpush3.bf16.msra.mxu0 %v7472_v22  ;;  %3051 = vst.msk [vmem:[#allocation4 + $0xb0] sm:$0xff] %vm317_vm0, %v9243_v5  ;;  %v9251_v3 = vld [vmem:[%s7627_s29 + $0xd0] sm:$0xff]  ;;  %v4099_v52 = vld [vmem:[#allocation2 + $0x58] sm:$0xff]  ;;  %v9275_v37 = vld [vmem:[%s7627_s29 + $0xe0] sm:$0xff] }
 0x2d4   : > { %3902 = vrot.lane.b32.xlu0 %v9110_v33, %s7569_s6  ;;  %4190 = vrot.lane.b32.xlu1 %v4094_v50, %s7570_s15  ;;  %3052 = vst.msk [vmem:[#allocation4 + $0xb8] sm:$0xff] %vm317_vm0, %v9251_v3  ;;  %v4098_v62 = vld [vmem:[#allocation2 + $0x50] sm:$0xff]  ;;  %v9267_v28 = vld [vmem:[%s7627_s29 + $0xd8] sm:$0xff]  ;;  %3054 = vst.msk [vmem:[#allocation4 + $0xc8] sm:$0xff] %vm317_vm0, %v9275_v37 }
 0x2d5   : > { %7216 = vmatprep.subr.mxu1 %v4433_v4  ;;  %7372 = vmatprep.subr.mxu0 %v6583_v11  ;;  %3053 = vst.msk [vmem:[#allocation4 + $0xc0] sm:$0xff] %vm317_vm0, %v9267_v28  ;;  %v4100_v7 = vld [vmem:[#allocation2 + $0x60] sm:$0xff]  ;;  %v4101_v35 = vld [vmem:[#allocation2 + $0x68] sm:$0xff]  ;;  %v9299_v25 = vld [vmem:[%s7627_s29 + $0xf0] sm:$0xff] }
 0x2d6   : > { %v9291_v60 = vld [vmem:[%s7627_s29 + $0xe8] sm:$0xff]  ;;  %3056 = vst.msk [vmem:[#allocation4 + $0xd8] sm:$0xff] %vm317_vm0, %v9299_v25  ;;  %v4102_v46 = vld [vmem:[#allocation2 + $0x70] sm:$0xff]  ;;  %v9314_v20 = vld [vmem:[#allocation2 + $0x78] sm:$0xff] }
 0x2d7   : > { %7217 = vmatpush3.msra.mxu1 %v4433_v4  ;;  %7373 = vmatpush3.msra.mxu0 %v6583_v11  ;;  %3055 = vst.msk [vmem:[#allocation4 + $0xd0] sm:$0xff] %vm317_vm0, %v9291_v60  ;;  %v9317_v8 = vld [vmem:[%s7627_s29 + $0xf8] sm:$0xff]  ;;  %v9326_v34 = vld [vmem:[%s7627_s29 + $0x100] sm:$0xff]  ;;  %v9348_v0 = vld [vmem:[#allocation2 + $0x88] sm:$0xff] }
 0x2d8   : > { %3179 = vrot.lane.b32.xlu0 %v3608_v56, %s7566_s27  ;;  %3418 = vrot.lane.b32.xlu1 %v2979_v49, %s7567_s28  ;;  %3057 = vst.msk [vmem:[#allocation4 + $0xe0] sm:$0xff] %vm317_vm0, %v9317_v8  ;;  %3058 = vst.msk [vmem:[#allocation4 + $0xe8] sm:$0xff] %vm317_vm0, %v9326_v34  ;;  %v9335_v6 = vld [vmem:[#allocation2 + $0x80] sm:$0xff]  ;;  %v9353_v27 = vld [vmem:[%s7627_s29 + $0x108] sm:$0xff] }
 0x2d9   : > { %3059 = vst.msk [vmem:[#allocation4 + $0xf0] sm:$0xff] %vm317_vm0, %v9353_v27  ;;  %v9364_v43 = vld [vmem:[%s7627_s29 + $0x110] sm:$0xff]  ;;  %v9393_v56 = vld [vmem:[#allocation2 + $0x98] sm:$0xff]  ;;  %v9446_v23 = vld [vmem:[%s7627_s29 + $0x128] sm:$0xff] }
 0x2da   : > { %3060 = vst.msk [vmem:[#allocation4 + $0xf8] sm:$0xff] %vm317_vm0, %v9364_v43  ;;  %3063 = vst.msk [vmem:[#allocation4 + $0x110] sm:$0xff] %vm317_vm0, %v9446_v23  ;;  %v9459_v11 = vld [vmem:[%s7627_s29 + $0x130] sm:$0xff] }
 0x2db   : > { %3064 = vst.msk [vmem:[#allocation4 + $0x118] sm:$0xff] %vm317_vm0, %v9459_v11 }
 0x2dc   : > { %4192 = vrot.lane.b32.xlu0 %v4095_v54, %s7570_s15  ;;  %3420 = vrot.lane.b32.xlu1 %v9107_v1, %s7567_s28  ;;  %v9377_v1 = vld [vmem:[#allocation2 + $0x90] sm:$0xff] }
 0x2e0   : > { %3708 = vrot.lane.b32.xlu0 %v3610_v2, %s7568_s30  ;;  %3710 = vrot.lane.b32.xlu1 %v4094_v50, %s7568_s30 }
 0x2e4   : > { %3904 = vrot.lane.b32.xlu0 %v9119_v58, %s7569_s6  ;;  %3181 = vrot.lane.b32.xlu1 %v9133_v31, %s7566_s27 }
 0x2e8   : > { %3906 = vrot.lane.b32.xlu0 %v9122_v16, %s7569_s6  ;;  %4194 = vrot.lane.b32.xlu1 %v4096_v61, %s7570_s15 }
 0x2ec   : > { %3183 = vrot.lane.b32.xlu0 %v3610_v2, %s7566_s27  ;;  %3422 = vrot.lane.b32.xlu1 %v9110_v33, %s7567_s28  ;;  %v9473_v2 = vld [vmem:[#allocation2 + $0xb0] sm:$0xff] }
 0x2f0   : > { %4196 = vrot.lane.b32.xlu0 %v4097_v44, %s7570_s15  ;;  %3424 = vrot.lane.b32.xlu1 %v9119_v58, %s7567_s28 }
 0x2f4   : > { %3712 = vrot.lane.b32.xlu0 %v4095_v54, %s7568_s30  ;;  %3714 = vrot.lane.b32.xlu1 %v4096_v61, %s7568_s30 }
 0x2f8   : > { %3908 = vrot.lane.b32.xlu0 %v9131_v12, %s7569_s6  ;;  %3185 = vrot.lane.b32.xlu1 %v4094_v50, %s7566_s27  ;;  %v9441_v50 = vld [vmem:[#allocation2 + $0xa8] sm:$0xff] }
 0x2fc   : > { %3910 = vrot.lane.b32.xlu0 %v9138_v10, %s7569_s6  ;;  %4198 = vrot.lane.b32.xlu1 %v4098_v62, %s7570_s15 }
 0x300   : > { %3187 = vrot.lane.b32.xlu0 %v4095_v54, %s7566_s27  ;;  %3426 = vrot.lane.b32.xlu1 %v9122_v16, %s7567_s28 }
 0x304   : > { %4200 = vrot.lane.b32.xlu0 %v4099_v52, %s7570_s15  ;;  %3428 = vrot.lane.b32.xlu1 %v9131_v12, %s7567_s28 }
 0x308   : > { %3716 = vrot.lane.b32.xlu0 %v4097_v44, %s7568_s30  ;;  %3718 = vrot.lane.b32.xlu1 %v4098_v62, %s7568_s30 }
 0x30c   : > { %3912 = vrot.lane.b32.xlu0 %v9143_v13, %s7569_s6  ;;  %3189 = vrot.lane.b32.xlu1 %v4096_v61, %s7566_s27 }
 0x310   : > { %3914 = vrot.lane.b32.xlu0 %v9146_v40, %s7569_s6  ;;  %4202 = vrot.lane.b32.xlu1 %v4100_v7, %s7570_s15 }
 0x314   : > { %3191 = vrot.lane.b32.xlu0 %v4097_v44, %s7566_s27  ;;  %3430 = vrot.lane.b32.xlu1 %v9138_v10, %s7567_s28 }
 0x318   : > { %4204 = vrot.lane.b32.xlu0 %v4101_v35, %s7570_s15  ;;  %3432 = vrot.lane.b32.xlu1 %v9143_v13, %s7567_s28  ;;  %v9398_v13 = vld [vmem:[%s7627_s29 + $0x118] sm:$0xff] }
 0x319   : > { %3061 = vst.msk [vmem:[#allocation4 + $0x100] sm:$0xff] %vm317_vm0, %v9398_v13 }
 0x31c   : > { %3720 = vrot.lane.b32.xlu0 %v4099_v52, %s7568_s30  ;;  %3722 = vrot.lane.b32.xlu1 %v4100_v7, %s7568_s30 }
 0x320   : > { %3916 = vrot.lane.b32.xlu0 %v9153_v53, %s7569_s6  ;;  %3193 = vrot.lane.b32.xlu1 %v4098_v62, %s7566_s27 }
 0x324   : > { %3918 = vrot.lane.b32.xlu0 %v9156_v29, %s7569_s6  ;;  %4206 = vrot.lane.b32.xlu1 %v4102_v46, %s7570_s15 }
 0x328   : > { %3195 = vrot.lane.b32.xlu0 %v4099_v52, %s7566_s27  ;;  %3434 = vrot.lane.b32.xlu1 %v9146_v40, %s7567_s28 }
 0x32c   : > { %4208 = vrot.lane.b32.xlu0 %v9314_v20, %s7570_s15  ;;  %3436 = vrot.lane.b32.xlu1 %v9153_v53, %s7567_s28 }
 0x330   : > { %3724 = vrot.lane.b32.xlu0 %v4101_v35, %s7568_s30  ;;  %3726 = vrot.lane.b32.xlu1 %v4102_v46, %s7568_s30 }
 0x334   : > { %3920 = vrot.lane.b32.xlu0 %v9166_v32, %s7569_s6  ;;  %3197 = vrot.lane.b32.xlu1 %v4100_v7, %s7566_s27 }
 0x336   : > { %v3174_v15 = vpop.permute.xlu0 %3173  ;;  %v3415_v42 = vpop.permute.xlu1 %3414 }
 0x337   : > { %3318 = vst.msk [vmem:[#allocation4] sm:$0xff] %vm588_vm4, %v3174_v15 }
 0x338   : > { %3559 = vst.msk [vmem:[#allocation4] sm:$0xff] %vm808_vm5, %v3415_v42  ;;  %3922 = vrot.lane.b32.xlu0 %v9172_v9, %s7569_s6  ;;  %4210 = vrot.lane.b32.xlu1 %v9335_v6, %s7570_s15 }
 0x33a   : > { %v3176_v18 = vpop.permute.xlu0 %3175  ;;  %v3417_v38 = vpop.permute.xlu1 %3416 }
 0x33b   : > { %3319 = vst.msk [vmem:[#allocation4 + $0x8] sm:$0xff] %vm588_vm4, %v3176_v18  ;;  %v9507_v18 = vld [vmem:[%s7627_s29 + $0x140] sm:$0xff] }
 0x33c   : > { %3560 = vst.msk [vmem:[#allocation4 + $0x8] sm:$0xff] %vm808_vm5, %v3417_v38  ;;  %3199 = vrot.lane.b32.xlu0 %v4101_v35, %s7566_s27  ;;  %3438 = vrot.lane.b32.xlu1 %v9156_v29, %s7567_s28  ;;  %v9489_v35 = vld [vmem:[#allocation2 + $0xb8] sm:$0xff] }
 0x33d   : > { %3066 = vst.msk [vmem:[#allocation4 + $0x128] sm:$0xff] %vm317_vm0, %v9507_v18 }
 0x33e   : > { %v3705_v36 = vpop.permute.xlu0 %3704  ;;  %v3707_v63 = vpop.permute.xlu1 %3706 }
 0x33f   : > { %3849 = vst.msk [vmem:[#allocation4] sm:$0xff] %vm3848_vm2, %v3705_v36  ;;  %3850 = vst.msk [vmem:[#allocation4 + $0x8] sm:$0xff] %vm3848_vm2, %v3707_v63 }
 0x340   : > { %4212 = vrot.lane.b32.xlu0 %v9348_v0, %s7570_s15  ;;  %3440 = vrot.lane.b32.xlu1 %v9166_v32, %s7567_s28  ;;  %v9411_v32 = vld [vmem:[%s7627_s29 + $0x120] sm:$0xff] }
 0x341   : > { %3062 = vst.msk [vmem:[#allocation4 + $0x108] sm:$0xff] %vm317_vm0, %v9411_v32 }
 0x342   : > { %v3901_v45 = vpop.permute.xlu0 %3900  ;;  %v3178_v39 = vpop.permute.xlu1 %3177 }
 0x343   : > { %4045 = vst.msk [vmem:[#allocation4] sm:$0xff] %vm4044_vm3, %v3901_v45 }
 0x344   : > { %3320 = vst.msk [vmem:[#allocation4 + $0x10] sm:$0xff] %vm588_vm4, %v3178_v39  ;;  %3728 = vrot.lane.b32.xlu0 %v9314_v20, %s7568_s30  ;;  %3730 = vrot.lane.b32.xlu1 %v9335_v6, %s7568_s30 }
 0x346   : > { %v3903_v30 = vpop.permute.xlu0 %3902  ;;  %v4191_v41 = vpop.permute.xlu1 %4190 }
 0x347   : > { %4046 = vst.msk [vmem:[#allocation4 + $0x8] sm:$0xff] %vm4044_vm3, %v3903_v30 }
 0x348   : > { %4335 = vst.msk [vmem:[#allocation4] sm:$0xff] %vm4334_vm6, %v4191_v41  ;;  %3924 = vrot.lane.b32.xlu0 %v9182_v14, %s7569_s6  ;;  %3201 = vrot.lane.b32.xlu1 %v4102_v46, %s7566_s27  ;;  %v9537_v41 = vld [vmem:[#allocation2 + $0xc8] sm:$0xff] }
 0x34a   : > { %v3180_v33 = vpop.permute.xlu0 %3179  ;;  %v3419_v49 = vpop.permute.xlu1 %3418 }
 0x34b   : > { %3321 = vst.msk [vmem:[#allocation4 + $0x18] sm:$0xff] %vm588_vm4, %v3180_v33 }
 0x34c   : > { %3561 = vst.msk [vmem:[#allocation4 + $0x10] sm:$0xff] %vm808_vm5, %v3419_v49  ;;  %3926 = vrot.lane.b32.xlu0 %v9185_v51, %s7569_s6  ;;  %4214 = vrot.lane.b32.xlu1 %v9377_v1, %s7570_s15  ;;  %v9542_v49 = vld [vmem:[%s7627_s29 + $0x148] sm:$0xff] }
 0x34d   : > { %3067 = vst.msk [vmem:[#allocation4 + $0x130] sm:$0xff] %vm317_vm0, %v9542_v49 }
 0x34e   : > { %v4193_v58 = vpop.permute.xlu0 %4192  ;;  %v3421_v16 = vpop.permute.xlu1 %3420 }
 0x34f   : > { %v4383_v12 = vld [vmem:[#allocation4] sm:$0xff]  ;;  %4336 = vst.msk [vmem:[#allocation4 + $0x8] sm:$0xff] %vm4334_vm6, %v4193_v58 }
 0x350   : > { %3562 = vst.msk [vmem:[#allocation4 + $0x18] sm:$0xff] %vm808_vm5, %v3421_v16  ;;  %7218 = vmatprep.mubr.msk.f32.mxu1 %vm4434_vm7, %v4383_v12  ;;  %7374 = vmatprep.mubr.msk.f32.mxu0 %vm4434_vm7, %v4383_v12  ;;  %v9555_v12 = vld [vmem:[%s7627_s29 + $0x150] sm:$0xff] }
 0x351   : > { %3203 = vrot.lane.b32.xlu0 %v9314_v20, %s7566_s27  ;;  %3442 = vrot.lane.b32.xlu1 %v9172_v9, %s7567_s28  ;;  %v9425_v9 = vld [vmem:[#allocation2 + $0xa0] sm:$0xff]  ;;  %3068 = vst.msk [vmem:[#allocation4 + $0x138] sm:$0xff] %vm317_vm0, %v9555_v12 }
 0x352   : > { %v3709_v31 = vpop.permute.xlu0 %3708  ;;  %v3711_v10 = vpop.permute.xlu1 %3710 }
 0x353   : > { %3851 = vst.msk [vmem:[#allocation4 + $0x10] sm:$0xff] %vm3848_vm2, %v3709_v31  ;;  %3852 = vst.msk [vmem:[#allocation4 + $0x18] sm:$0xff] %vm3848_vm2, %v3711_v10  ;;  %v9569_v31 = vld [vmem:[#allocation2 + $0xd0] sm:$0xff] }
 0x355   : > { %4216 = vrot.lane.b32.xlu0 %v9393_v56, %s7570_s15  ;;  %3444 = vrot.lane.b32.xlu1 %v9182_v14, %s7567_s28 }
 0x356   : > { %v3905_v40 = vpop.permute.xlu0 %3904  ;;  %v3182_v53 = vpop.permute.xlu1 %3181  ;;  %v4384_v29 = vld [vmem:[#allocation4 + $0x8] sm:$0xff] }
 0x357   : > { %4047 = vst.msk [vmem:[#allocation4 + $0x10] sm:$0xff] %vm4044_vm3, %v3905_v40  ;;  %7219 = vmatmul.mubr.msk.f32.vlgmr.msra.gmra.mrb[56].mxu1 %vm4434_vm7, %v4384_v29  ;;  %7375 = vmatmul.mubr.msk.f32.vlgmr.msra.gmra.mrb[106].mxu0 %vm4434_vm7, %v4384_v29 }
 0x358   : > { %3322 = vst.msk [vmem:[#allocation4 + $0x20] sm:$0xff] %vm588_vm4, %v3182_v53 }
 0x359   : > { %3732 = vrot.lane.b32.xlu0 %v9348_v0, %s7568_s30  ;;  %3734 = vrot.lane.b32.xlu1 %v9377_v1, %s7568_s30 }
 0x35a   : > { %v3907_v26 = vpop.permute.xlu0 %3906  ;;  %v4195_v19 = vpop.permute.xlu1 %4194 }
 0x35b   : > { %4048 = vst.msk [vmem:[#allocation4 + $0x18] sm:$0xff] %vm4044_vm3, %v3907_v26 }
 0x35c   : > { %4337 = vst.msk [vmem:[#allocation4 + $0x10] sm:$0xff] %vm4334_vm6, %v4195_v19  ;;  %v9585_v19 = vld [vmem:[#allocation2 + $0xd8] sm:$0xff] }
 0x35d   : > { %3928 = vrot.lane.b32.xlu0 %v9218_v57, %s7569_s6  ;;  %3205 = vrot.lane.b32.xlu1 %v9335_v6, %s7566_s27  ;;  %v9494_v6 = vld [vmem:[%s7627_s29 + $0x138] sm:$0xff] }
 0x35e   : > { %v3184_v24 = vpop.permute.xlu0 %3183  ;;  %v3423_v17 = vpop.permute.xlu1 %3422  ;;  %3065 = vst.msk [vmem:[#allocation4 + $0x120] sm:$0xff] %vm317_vm0, %v9494_v6 }
 0x35f   : > { %3323 = vst.msk [vmem:[#allocation4 + $0x28] sm:$0xff] %vm588_vm4, %v3184_v24 }
 0x360   : > { %3563 = vst.msk [vmem:[#allocation4 + $0x20] sm:$0xff] %vm808_vm5, %v3423_v17  ;;  %v9590_v17 = vld [vmem:[%s7627_s29 + $0x158] sm:$0xff] }
 0x361   : > { %3930 = vrot.lane.b32.xlu0 %v9226_v21, %s7569_s6  ;;  %4218 = vrot.lane.b32.xlu1 %v9425_v9, %s7570_s15  ;;  %3069 = vst.msk [vmem:[#allocation4 + $0x140] sm:$0xff] %vm317_vm0, %v9590_v17 }
 0x362   : > { %v4197_v14 = vpop.permute.xlu0 %4196  ;;  %v3425_v55 = vpop.permute.xlu1 %3424 }
 0x363   : > { %v4385_v47 = vld [vmem:[#allocation4 + $0x10] sm:$0xff]  ;;  %4338 = vst.msk [vmem:[#allocation4 + $0x18] sm:$0xff] %vm4334_vm6, %v4197_v14 }
 0x364   : > { %3564 = vst.msk [vmem:[#allocation4 + $0x28] sm:$0xff] %vm808_vm5, %v3425_v55  ;;  %7221 = vmatprep.mubr.msk.f32.mxu1 %vm4434_vm7, %v4385_v47  ;;  %7377 = vmatprep.mubr.msk.f32.mxu0 %vm4434_vm7, %v4385_v47  ;;  %v9603_v47 = vld [vmem:[%s7627_s29 + $0x160] sm:$0xff] }
 0x365   : > { %3207 = vrot.lane.b32.xlu0 %v9348_v0, %s7566_s27  ;;  %3446 = vrot.lane.b32.xlu1 %v9185_v51, %s7567_s28  ;;  %v9521_v0 = vld [vmem:[#allocation2 + $0xc0] sm:$0xff]  ;;  %3070 = vst.msk [vmem:[#allocation4 + $0x148] sm:$0xff] %vm317_vm0, %v9603_v47 }
 0x366   : > { %v3713_v48 = vpop.permute.xlu0 %3712  ;;  %v3715_v59 = vpop.permute.xlu1 %3714 }
 0x367   : > { %3853 = vst.msk [vmem:[#allocation4 + $0x20] sm:$0xff] %vm3848_vm2, %v3713_v48  ;;  %3854 = vst.msk [vmem:[#allocation4 + $0x28] sm:$0xff] %vm3848_vm2, %v3715_v59  ;;  %v9617_v48 = vld [vmem:[#allocation2 + $0xe0] sm:$0xff] }
 0x369   : > { %4220 = vrot.lane.b32.xlu0 %v9441_v50, %s7570_s15  ;;  %3448 = vrot.lane.b32.xlu1 %v9218_v57, %s7567_s28 }
 0x36a   : > { %v3909_v51 = vpop.permute.xlu0 %3908  ;;  %v3186_v22 = vpop.permute.xlu1 %3185  ;;  %v4386_v4 = vld [vmem:[#allocation4 + $0x18] sm:$0xff] }
 0x36b   : > { %4049 = vst.msk [vmem:[#allocation4 + $0x20] sm:$0xff] %vm4044_vm3, %v3909_v51  ;;  %7222 = vmatmul.mubr.msk.f32.gmra.mrb[58].mxu1 %vm4434_vm7, %v4386_v4  ;;  %7378 = vmatmul.mubr.msk.f32.gmra.mrb[108].mxu0 %vm4434_vm7, %v4386_v4 }
 0x36c   : > { %3324 = vst.msk [vmem:[#allocation4 + $0x30] sm:$0xff] %vm588_vm4, %v3186_v22 }
 0x36d   : > { %3736 = vrot.lane.b32.xlu0 %v9393_v56, %s7568_s30  ;;  %3738 = vrot.lane.b32.xlu1 %v9425_v9, %s7568_s30 }
 0x36e   : > { %v3911_v54 = vpop.permute.xlu0 %3910  ;;  %v4199_v57 = vpop.permute.xlu1 %4198 }
 0x36f   : > { %4050 = vst.msk [vmem:[#allocation4 + $0x28] sm:$0xff] %vm4044_vm3, %v3911_v54 }
 0x370   : > { %4339 = vst.msk [vmem:[#allocation4 + $0x20] sm:$0xff] %vm4334_vm6, %v4199_v57  ;;  %v9633_v57 = vld [vmem:[#allocation2 + $0xe8] sm:$0xff] }
 0x371   : > { %3932 = vrot.lane.b32.xlu0 %v9243_v5, %s7569_s6  ;;  %3209 = vrot.lane.b32.xlu1 %v9377_v1, %s7566_s27 }
 0x372   : > { %v3188_v61 = vpop.permute.xlu0 %3187  ;;  %v3427_v44 = vpop.permute.xlu1 %3426 }
 0x373   : > { %3325 = vst.msk [vmem:[#allocation4 + $0x38] sm:$0xff] %vm588_vm4, %v3188_v61 }
 0x374   : > { %3565 = vst.msk [vmem:[#allocation4 + $0x30] sm:$0xff] %vm808_vm5, %v3427_v44  ;;  %v9642_v44 = vld [vmem:[%s7627_s29 + $0x168] sm:$0xff] }
 0x375   : > { %3934 = vrot.lane.b32.xlu0 %v9251_v3, %s7569_s6  ;;  %4222 = vrot.lane.b32.xlu1 %v9473_v2, %s7570_s15  ;;  %3071 = vst.msk [vmem:[#allocation4 + $0x150] sm:$0xff] %vm317_vm0, %v9642_v44 }
 0x376   : > { %v4201_v62 = vpop.permute.xlu0 %4200  ;;  %v3429_v52 = vpop.permute.xlu1 %3428 }
 0x377   : > { %v4387_v7 = vld [vmem:[#allocation4 + $0x20] sm:$0xff]  ;;  %4340 = vst.msk [vmem:[#allocation4 + $0x28] sm:$0xff] %vm4334_vm6, %v4201_v62 }
 0x378   : > { %3566 = vst.msk [vmem:[#allocation4 + $0x38] sm:$0xff] %vm808_vm5, %v3429_v52  ;;  %7224 = vmatprep.mubr.msk.f32.mxu1 %vm4434_vm7, %v4387_v7  ;;  %7380 = vmatprep.mubr.msk.f32.mxu0 %vm4434_vm7, %v4387_v7 }
 0x379   : > { %3211 = vrot.lane.b32.xlu0 %v9393_v56, %s7566_s27  ;;  %3450 = vrot.lane.b32.xlu1 %v9226_v21, %s7567_s28 }
 0x37a   : > { %v3717_v46 = vpop.permute.xlu0 %3716  ;;  %v3719_v20 = vpop.permute.xlu1 %3718 }
 0x37b   : > { %3855 = vst.msk [vmem:[#allocation4 + $0x30] sm:$0xff] %vm3848_vm2, %v3717_v46  ;;  %3856 = vst.msk [vmem:[#allocation4 + $0x38] sm:$0xff] %vm3848_vm2, %v3719_v20  ;;  %v9665_v46 = vld [vmem:[#allocation2 + $0xf0] sm:$0xff] }
 0x37d   : > { %4224 = vrot.lane.b32.xlu0 %v9489_v35, %s7570_s15  ;;  %3452 = vrot.lane.b32.xlu1 %v9243_v5, %s7567_s28 }
 0x37e   : > { %v3913_v21 = vpop.permute.xlu0 %3912  ;;  %v3190_v15 = vpop.permute.xlu1 %3189  ;;  %v4388_v42 = vld [vmem:[#allocation4 + $0x28] sm:$0xff] }
 0x37f   : > { %4051 = vst.msk [vmem:[#allocation4 + $0x30] sm:$0xff] %vm4044_vm3, %v3913_v21  ;;  %7225 = vmatmul.mubr.msk.f32.gmra.mrb[60].mxu1 %vm4434_vm7, %v4388_v42  ;;  %7381 = vmatmul.mubr.msk.f32.gmra.mrb[110].mxu0 %vm4434_vm7, %v4388_v42 }
 0x380   : > { %3326 = vst.msk [vmem:[#allocation4 + $0x40] sm:$0xff] %vm588_vm4, %v3190_v15 }
 0x381   : > { %3740 = vrot.lane.b32.xlu0 %v9441_v50, %s7568_s30  ;;  %3742 = vrot.lane.b32.xlu1 %v9473_v2, %s7568_s30 }
 0x382   : > { %v3915_v5 = vpop.permute.xlu0 %3914  ;;  %v4203_v38 = vpop.permute.xlu1 %4202 }
 0x383   : > { %4052 = vst.msk [vmem:[#allocation4 + $0x38] sm:$0xff] %vm4044_vm3, %v3915_v5 }
 0x384   : > { %4341 = vst.msk [vmem:[#allocation4 + $0x30] sm:$0xff] %vm4334_vm6, %v4203_v38  ;;  %v9681_v38 = vld [vmem:[#allocation2 + $0xf8] sm:$0xff] }
 0x385   : > { %3936 = vrot.lane.b32.xlu0 %v9267_v28, %s7569_s6  ;;  %3213 = vrot.lane.b32.xlu1 %v9425_v9, %s7566_s27 }
 0x386   : > { %v3192_v36 = vpop.permute.xlu0 %3191  ;;  %v3431_v63 = vpop.permute.xlu1 %3430 }
 0x387   : > { %3327 = vst.msk [vmem:[#allocation4 + $0x48] sm:$0xff] %vm588_vm4, %v3192_v36 }
 0x388   : > { %3567 = vst.msk [vmem:[#allocation4 + $0x40] sm:$0xff] %vm808_vm5, %v3431_v63  ;;  %v9690_v63 = vld [vmem:[%s7627_s29 + $0x178] sm:$0xff] }
 0x389   : > { %3938 = vrot.lane.b32.xlu0 %v9275_v37, %s7569_s6  ;;  %4226 = vrot.lane.b32.xlu1 %v9521_v0, %s7570_s15  ;;  %3073 = vst.msk [vmem:[#allocation4 + $0x160] sm:$0xff] %vm317_vm0, %v9690_v63 }
 0x38a   : > { %v4205_v45 = vpop.permute.xlu0 %4204  ;;  %v3433_v39 = vpop.permute.xlu1 %3432 }
 0x38b   : > { %v4389_v30 = vld [vmem:[#allocation4 + $0x30] sm:$0xff]  ;;  %4342 = vst.msk [vmem:[#allocation4 + $0x38] sm:$0xff] %vm4334_vm6, %v4205_v45 }
 0x38c   : > { %3568 = vst.msk [vmem:[#allocation4 + $0x48] sm:$0xff] %vm808_vm5, %v3433_v39  ;;  %7227 = vmatprep.mubr.msk.f32.mxu1 %vm4434_vm7, %v4389_v30  ;;  %7383 = vmatprep.mubr.msk.f32.mxu0 %vm4434_vm7, %v4389_v30 }
 0x38d   : > { %3215 = vrot.lane.b32.xlu0 %v9441_v50, %s7566_s27  ;;  %3454 = vrot.lane.b32.xlu1 %v9251_v3, %s7567_s28 }
 0x38e   : > { %v3721_v1 = vpop.permute.xlu0 %3720  ;;  %v3723_v33 = vpop.permute.xlu1 %3722 }
 0x38f   : > { %3857 = vst.msk [vmem:[#allocation4 + $0x40] sm:$0xff] %vm3848_vm2, %v3721_v1  ;;  %3858 = vst.msk [vmem:[#allocation4 + $0x48] sm:$0xff] %vm3848_vm2, %v3723_v33  ;;  %v9713_v1 = vld [vmem:[#allocation2 + $0x100] sm:$0xff] }
 0x391   : > { %4228 = vrot.lane.b32.xlu0 %v9537_v41, %s7570_s15  ;;  %3456 = vrot.lane.b32.xlu1 %v9267_v28, %s7567_s28 }
 0x392   : > { %v3917_v3 = vpop.permute.xlu0 %3916  ;;  %v3194_v58 = vpop.permute.xlu1 %3193  ;;  %v4390_v16 = vld [vmem:[#allocation4 + $0x38] sm:$0xff] }
 0x393   : > { %4053 = vst.msk [vmem:[#allocation4 + $0x40] sm:$0xff] %vm4044_vm3, %v3917_v3  ;;  %7228 = vmatmul.mubr.msk.f32.gmra.mrb[62].mxu1 %vm4434_vm7, %v4390_v16  ;;  %7384 = vmatmul.mubr.msk.f32.gmra.mrb[112].mxu0 %vm4434_vm7, %v4390_v16 }
 0x394   : > { %3328 = vst.msk [vmem:[#allocation4 + $0x50] sm:$0xff] %vm588_vm4, %v3194_v58 }
 0x395   : > { %3744 = vrot.lane.b32.xlu0 %v9489_v35, %s7568_s30  ;;  %3746 = vrot.lane.b32.xlu1 %v9521_v0, %s7568_s30 }
 0x396   : > { %v3919_v28 = vpop.permute.xlu0 %3918  ;;  %v4207_v56 = vpop.permute.xlu1 %4206 }
 0x397   : > { %4054 = vst.msk [vmem:[#allocation4 + $0x48] sm:$0xff] %vm4044_vm3, %v3919_v28 }
 0x398   : > { %4343 = vst.msk [vmem:[#allocation4 + $0x40] sm:$0xff] %vm4334_vm6, %v4207_v56  ;;  %v9729_v56 = vld [vmem:[#allocation2 + $0x108] sm:$0xff] }
 0x399   : > { %3940 = vrot.lane.b32.xlu0 %v9291_v60, %s7569_s6  ;;  %3217 = vrot.lane.b32.xlu1 %v9473_v2, %s7566_s27 }
 0x39a   : > { %v3196_v10 = vpop.permute.xlu0 %3195  ;;  %v3435_v40 = vpop.permute.xlu1 %3434 }
 0x39b   : > { %3329 = vst.msk [vmem:[#allocation4 + $0x58] sm:$0xff] %vm588_vm4, %v3196_v10 }
 0x39c   : > { %3569 = vst.msk [vmem:[#allocation4 + $0x50] sm:$0xff] %vm808_vm5, %v3435_v40  ;;  %v9738_v40 = vld [vmem:[%s7627_s29 + $0x188] sm:$0xff] }
 0x39d   : > { %3942 = vrot.lane.b32.xlu0 %v9299_v25, %s7569_s6  ;;  %4230 = vrot.lane.b32.xlu1 %v9569_v31, %s7570_s15  ;;  %3075 = vst.msk [vmem:[#allocation4 + $0x170] sm:$0xff] %vm317_vm0, %v9738_v40 }
 0x39e   : > { %v4209_v53 = vpop.permute.xlu0 %4208  ;;  %v3437_v29 = vpop.permute.xlu1 %3436 }
 0x39f   : > { %v4391_v26 = vld [vmem:[#allocation4 + $0x40] sm:$0xff]  ;;  %4344 = vst.msk [vmem:[#allocation4 + $0x48] sm:$0xff] %vm4334_vm6, %v4209_v53 }
 0x3a0   : > { %3570 = vst.msk [vmem:[#allocation4 + $0x58] sm:$0xff] %vm808_vm5, %v3437_v29  ;;  %7230 = vmatprep.mubr.msk.f32.mxu1 %vm4434_vm7, %v4391_v26  ;;  %7386 = vmatprep.mubr.msk.f32.mxu0 %vm4434_vm7, %v4391_v26 }
 0x3a1   : > { %3219 = vrot.lane.b32.xlu0 %v9489_v35, %s7566_s27  ;;  %3458 = vrot.lane.b32.xlu1 %v9275_v37, %s7567_s28 }
 0x3a2   : > { %v3725_v9 = vpop.permute.xlu0 %3724  ;;  %v3727_v24 = vpop.permute.xlu1 %3726 }
 0x3a3   : > { %3859 = vst.msk [vmem:[#allocation4 + $0x50] sm:$0xff] %vm3848_vm2, %v3725_v9  ;;  %3860 = vst.msk [vmem:[#allocation4 + $0x58] sm:$0xff] %vm3848_vm2, %v3727_v24  ;;  %v9761_v9 = vld [vmem:[#allocation2 + $0x110] sm:$0xff] }
 0x3a5   : > { %4232 = vrot.lane.b32.xlu0 %v9585_v19, %s7570_s15  ;;  %3460 = vrot.lane.b32.xlu1 %v9291_v60, %s7567_s28 }
 0x3a6   : > { %v3921_v37 = vpop.permute.xlu0 %3920  ;;  %v3198_v14 = vpop.permute.xlu1 %3197  ;;  %v4392_v55 = vld [vmem:[#allocation4 + $0x48] sm:$0xff] }
 0x3a7   : > { %4055 = vst.msk [vmem:[#allocation4 + $0x50] sm:$0xff] %vm4044_vm3, %v3921_v37  ;;  %7231 = vmatmul.mubr.msk.f32.gmra.mrb[64].mxu1 %vm4434_vm7, %v4392_v55  ;;  %7387 = vmatmul.mubr.msk.f32.gmra.mrb[114].mxu0 %vm4434_vm7, %v4392_v55 }
 0x3a8   : > { %3330 = vst.msk [vmem:[#allocation4 + $0x60] sm:$0xff] %vm588_vm4, %v3198_v14 }
 0x3a9   : > { %3748 = vrot.lane.b32.xlu0 %v9537_v41, %s7568_s30  ;;  %3750 = vrot.lane.b32.xlu1 %v9569_v31, %s7568_s30 }
 0x3aa   : > { %v3923_v60 = vpop.permute.xlu0 %3922  ;;  %v4211_v50 = vpop.permute.xlu1 %4210 }
 0x3ab   : > { %4056 = vst.msk [vmem:[#allocation4 + $0x58] sm:$0xff] %vm4044_vm3, %v3923_v60 }
 0x3ac   : > { %4345 = vst.msk [vmem:[#allocation4 + $0x50] sm:$0xff] %vm4334_vm6, %v4211_v50  ;;  %v9777_v50 = vld [vmem:[#allocation2 + $0x118] sm:$0xff] }
 0x3ad   : > { %3944 = vrot.lane.b32.xlu0 %v9317_v8, %s7569_s6  ;;  %3221 = vrot.lane.b32.xlu1 %v9521_v0, %s7566_s27 }
 0x3ae   : > { %v3200_v59 = vpop.permute.xlu0 %3199  ;;  %v3439_v51 = vpop.permute.xlu1 %3438 }
 0x3af   : > { %3331 = vst.msk [vmem:[#allocation4 + $0x68] sm:$0xff] %vm588_vm4, %v3200_v59 }
 0x3b0   : > { %3571 = vst.msk [vmem:[#allocation4 + $0x60] sm:$0xff] %vm808_vm5, %v3439_v51 }
 0x3b1   : > { %3946 = vrot.lane.b32.xlu0 %v9326_v34, %s7569_s6  ;;  %4234 = vrot.lane.b32.xlu1 %v9617_v48, %s7570_s15 }
 0x3b2   : > { %v4213_v22 = vpop.permute.xlu0 %4212  ;;  %v3441_v4 = vpop.permute.xlu1 %3440 }
 0x3b3   : > { %v4393_v54 = vld [vmem:[#allocation4 + $0x50] sm:$0xff]  ;;  %4346 = vst.msk [vmem:[#allocation4 + $0x58] sm:$0xff] %vm4334_vm6, %v4213_v22 }
 0x3b4   : > { %3572 = vst.msk [vmem:[#allocation4 + $0x68] sm:$0xff] %vm808_vm5, %v3441_v4  ;;  %7233 = vmatprep.mubr.msk.f32.mxu1 %vm4434_vm7, %v4393_v54  ;;  %7389 = vmatprep.mubr.msk.f32.mxu0 %vm4434_vm7, %v4393_v54 }
 0x3b5   : > { %3223 = vrot.lane.b32.xlu0 %v9537_v41, %s7566_s27  ;;  %3462 = vrot.lane.b32.xlu1 %v9299_v25, %s7567_s28 }
 0x3b6   : > { %v3729_v2 = vpop.permute.xlu0 %3728  ;;  %v3731_v61 = vpop.permute.xlu1 %3730 }
 0x3b7   : > { %3861 = vst.msk [vmem:[#allocation4 + $0x60] sm:$0xff] %vm3848_vm2, %v3729_v2  ;;  %3862 = vst.msk [vmem:[#allocation4 + $0x68] sm:$0xff] %vm3848_vm2, %v3731_v61 }
 0x3b9   : > { %4236 = vrot.lane.b32.xlu0 %v9633_v57, %s7570_s15  ;;  %3464 = vrot.lane.b32.xlu1 %v9317_v8, %s7567_s28  ;;  %v9655_v8 = vld [vmem:[%s7627_s29 + $0x170] sm:$0xff] }
 0x3ba   : > { %v3925_v25 = vpop.permute.xlu0 %3924  ;;  %v3202_v62 = vpop.permute.xlu1 %3201  ;;  %v4394_v52 = vld [vmem:[#allocation4 + $0x58] sm:$0xff]  ;;  %3072 = vst.msk [vmem:[#allocation4 + $0x158] sm:$0xff] %vm317_vm0, %v9655_v8 }
 0x3bb   : > { %4057 = vst.msk [vmem:[#allocation4 + $0x60] sm:$0xff] %vm4044_vm3, %v3925_v25  ;;  %7234 = vmatmul.mubr.msk.f32.gmra.mrb[66].mxu1 %vm4434_vm7, %v4394_v52  ;;  %7390 = vmatmul.mubr.msk.f32.gmra.mrb[116].mxu0 %vm4434_vm7, %v4394_v52  ;;  %v9815_v52 = vld [vmem:[#allocation2 + $0x128] sm:$0xff] }
 0x3bc   : > { %3332 = vst.msk [vmem:[#allocation4 + $0x70] sm:$0xff] %vm588_vm4, %v3202_v62 }
 0x3bd   : > { %3752 = vrot.lane.b32.xlu0 %v9585_v19, %s7568_s30  ;;  %3754 = vrot.lane.b32.xlu1 %v9617_v48, %s7568_s30 }
 0x3be   : > { %v3927_v7 = vpop.permute.xlu0 %3926  ;;  %v4215_v35 = vpop.permute.xlu1 %4214 }
 0x3bf   : > { %4058 = vst.msk [vmem:[#allocation4 + $0x68] sm:$0xff] %vm4044_vm3, %v3927_v7 }
 0x3c0   : > { %4347 = vst.msk [vmem:[#allocation4 + $0x60] sm:$0xff] %vm4334_vm6, %v4215_v35 }
 0x3c1   : > { %3948 = vrot.lane.b32.xlu0 %v9353_v27, %s7569_s6  ;;  %3225 = vrot.lane.b32.xlu1 %v9569_v31, %s7566_s27 }
 0x3c3   : > { %v3204_v20 = vpop.permute.xlu0 %3203  ;;  %v3443_v21 = vpop.permute.xlu1 %3442 }
 0x3c4   : > { %3333 = vst.msk [vmem:[#allocation4 + $0x78] sm:$0xff] %vm588_vm4, %v3204_v20 }
 0x3c5   : > { %3573 = vst.msk [vmem:[#allocation4 + $0x70] sm:$0xff] %vm808_vm5, %v3443_v21  ;;  %3950 = vrot.lane.b32.xlu0 %v9364_v43, %s7569_s6  ;;  %4238 = vrot.lane.b32.xlu1 %v9665_v46, %s7570_s15 }
 0x3c7   : > { %v4217_v15 = vpop.permute.xlu0 %4216  ;;  %v3445_v42 = vpop.permute.xlu1 %3444  ;;  %v4395_v5 = vld [vmem:[#allocation4 + $0x60] sm:$0xff] }
 0x3c8   : > { %4348 = vst.msk [vmem:[#allocation4 + $0x68] sm:$0xff] %vm4334_vm6, %v4217_v15  ;;  %7236 = vmatprep.mubr.msk.f32.mxu1 %vm4434_vm7, %v4395_v5  ;;  %7392 = vmatprep.mubr.msk.f32.mxu0 %vm4434_vm7, %v4395_v5 }
 0x3c9   : > { %3574 = vst.msk [vmem:[#allocation4 + $0x78] sm:$0xff] %vm808_vm5, %v3445_v42  ;;  %3227 = vrot.lane.b32.xlu0 %v9585_v19, %s7566_s27  ;;  %3466 = vrot.lane.b32.xlu1 %v9326_v34, %s7567_s28 }
 0x3cb   : > { %v3733_v0 = vpop.permute.xlu0 %3732  ;;  %v3735_v36 = vpop.permute.xlu1 %3734 }
 0x3cc   : > { %3863 = vst.msk [vmem:[#allocation4 + $0x70] sm:$0xff] %vm3848_vm2, %v3733_v0  ;;  %3864 = vst.msk [vmem:[#allocation4 + $0x78] sm:$0xff] %vm3848_vm2, %v3735_v36 }
 0x3cd   : > { %4240 = vrot.lane.b32.xlu0 %v9681_v38, %s7570_s15  ;;  %3468 = vrot.lane.b32.xlu1 %v9353_v27, %s7567_s28  ;;  %v9703_v27 = vld [vmem:[%s7627_s29 + $0x180] sm:$0xff] }
 0x3ce   : > { %3074 = vst.msk [vmem:[#allocation4 + $0x168] sm:$0xff] %vm317_vm0, %v9703_v27 }
 0x3cf   : > { %v3929_v34 = vpop.permute.xlu0 %3928  ;;  %v3206_v45 = vpop.permute.xlu1 %3205  ;;  %v4396_v39 = vld [vmem:[#allocation4 + $0x68] sm:$0xff] }
 0x3d0   : > { %4059 = vst.msk [vmem:[#allocation4 + $0x70] sm:$0xff] %vm4044_vm3, %v3929_v34  ;;  %7237 = vmatmul.mubr.msk.f32.gmra.mrb[68].mxu1 %vm4434_vm7, %v4396_v39  ;;  %7393 = vmatmul.mubr.msk.f32.gmra.mrb[118].mxu0 %vm4434_vm7, %v4396_v39  ;;  %v9853_v34 = vld [vmem:[#allocation2 + $0x138] sm:$0xff] }
 0x3d1   : > { %3334 = vst.msk [vmem:[#allocation4 + $0x80] sm:$0xff] %vm588_vm4, %v3206_v45  ;;  %3756 = vrot.lane.b32.xlu0 %v9633_v57, %s7568_s30  ;;  %3758 = vrot.lane.b32.xlu1 %v9665_v46, %s7568_s30 }
 0x3d3   : > { %v3931_v30 = vpop.permute.xlu0 %3930  ;;  %v4219_v41 = vpop.permute.xlu1 %4218 }
 0x3d4   : > { %4060 = vst.msk [vmem:[#allocation4 + $0x78] sm:$0xff] %vm4044_vm3, %v3931_v30 }
 0x3d5   : > { %4349 = vst.msk [vmem:[#allocation4 + $0x70] sm:$0xff] %vm4334_vm6, %v4219_v41  ;;  %3952 = vrot.lane.b32.xlu0 %v9398_v13, %s7569_s6  ;;  %3229 = vrot.lane.b32.xlu1 %v9617_v48, %s7566_s27 }
 0x3d7   : > { %v3208_v33 = vpop.permute.xlu0 %3207  ;;  %v3447_v3 = vpop.permute.xlu1 %3446 }
 0x3d8   : > { %3335 = vst.msk [vmem:[#allocation4 + $0x88] sm:$0xff] %vm588_vm4, %v3208_v33 }
 0x3d9   : > { %3575 = vst.msk [vmem:[#allocation4 + $0x80] sm:$0xff] %vm808_vm5, %v3447_v3  ;;  %3954 = vrot.lane.b32.xlu0 %v9411_v32, %s7569_s6  ;;  %4242 = vrot.lane.b32.xlu1 %v9713_v1, %s7570_s15 }
 0x3db   : > { %v4221_v58 = vpop.permute.xlu0 %4220  ;;  %v3449_v16 = vpop.permute.xlu1 %3448 }
 0x3dc   : > { %v4397_v28 = vld [vmem:[#allocation4 + $0x70] sm:$0xff]  ;;  %4350 = vst.msk [vmem:[#allocation4 + $0x78] sm:$0xff] %vm4334_vm6, %v4221_v58 }
 0x3dd   : > { %3576 = vst.msk [vmem:[#allocation4 + $0x88] sm:$0xff] %vm808_vm5, %v3449_v16  ;;  %7239 = vmatprep.mubr.msk.f32.mxu1 %vm4434_vm7, %v4397_v28  ;;  %7395 = vmatprep.mubr.msk.f32.mxu0 %vm4434_vm7, %v4397_v28 }
 0x3de   : > { %3231 = vrot.lane.b32.xlu0 %v9633_v57, %s7566_s27  ;;  %3470 = vrot.lane.b32.xlu1 %v9364_v43, %s7567_s28 }
 0x3df   : > { %v3737_v31 = vpop.permute.xlu0 %3736  ;;  %v3739_v10 = vpop.permute.xlu1 %3738 }
 0x3e0   : > { %3865 = vst.msk [vmem:[#allocation4 + $0x80] sm:$0xff] %vm3848_vm2, %v3737_v31  ;;  %3866 = vst.msk [vmem:[#allocation4 + $0x88] sm:$0xff] %vm3848_vm2, %v3739_v10 }
 0x3e2   : > { %4244 = vrot.lane.b32.xlu0 %v9729_v56, %s7570_s15  ;;  %3472 = vrot.lane.b32.xlu1 %v9398_v13, %s7567_s28  ;;  %v9751_v13 = vld [vmem:[%s7627_s29 + $0x190] sm:$0xff] }
 0x3e3   : > { %v3933_v43 = vpop.permute.xlu0 %3932  ;;  %v3210_v53 = vpop.permute.xlu1 %3209  ;;  %v4398_v29 = vld [vmem:[#allocation4 + $0x78] sm:$0xff]  ;;  %3076 = vst.msk [vmem:[#allocation4 + $0x178] sm:$0xff] %vm317_vm0, %v9751_v13  ;;  %vm5904_vm0 = vcmask 1044480  }
 0x3e4   : > { %4061 = vst.msk [vmem:[#allocation4 + $0x80] sm:$0xff] %vm4044_vm3, %v3933_v43  ;;  %7240 = vmatmul.mubr.msk.f32.gmra.mrb[70].mxu1 %vm4434_vm7, %v4398_v29  ;;  %7396 = vmatmul.mubr.msk.f32.gmra.mrb[120].mxu0 %vm4434_vm7, %v4398_v29 }
 0x3e5   : > { %3336 = vst.msk [vmem:[#allocation4 + $0x90] sm:$0xff] %vm588_vm4, %v3210_v53 }
 0x3e6   : > { %3760 = vrot.lane.b32.xlu0 %v9681_v38, %s7568_s30  ;;  %3762 = vrot.lane.b32.xlu1 %v9713_v1, %s7568_s30 }
 0x3e7   : > { %v3935_v26 = vpop.permute.xlu0 %3934  ;;  %v4223_v19 = vpop.permute.xlu1 %4222 }
 0x3e8   : > { %4062 = vst.msk [vmem:[#allocation4 + $0x88] sm:$0xff] %vm4044_vm3, %v3935_v26 }
 0x3e9   : > { %4351 = vst.msk [vmem:[#allocation4 + $0x80] sm:$0xff] %vm4334_vm6, %v4223_v19 }
 0x3ea   : > { %3956 = vrot.lane.b32.xlu0 %v9446_v23, %s7569_s6  ;;  %3233 = vrot.lane.b32.xlu1 %v9665_v46, %s7566_s27 }
 0x3eb   : > { %v3212_v24 = vpop.permute.xlu0 %3211  ;;  %v3451_v37 = vpop.permute.xlu1 %3450 }
 0x3ec   : > { %3337 = vst.msk [vmem:[#allocation4 + $0x98] sm:$0xff] %vm588_vm4, %v3212_v24  ;;  %v9897_v24 = vld [vmem:[#allocation2 + $0x148] sm:$0xff] }
 0x3ed   : > { %3577 = vst.msk [vmem:[#allocation4 + $0x90] sm:$0xff] %vm808_vm5, %v3451_v37 }
 0x3ee   : > { %3958 = vrot.lane.b32.xlu0 %v9459_v11, %s7569_s6  ;;  %4246 = vrot.lane.b32.xlu1 %v9761_v9, %s7570_s15 }
 0x3ef   : > { %v4225_v14 = vpop.permute.xlu0 %4224  ;;  %v3453_v55 = vpop.permute.xlu1 %3452 }
 0x3f0   : > { %v4399_v60 = vld [vmem:[#allocation4 + $0x80] sm:$0xff]  ;;  %4352 = vst.msk [vmem:[#allocation4 + $0x88] sm:$0xff] %vm4334_vm6, %v4225_v14 }
 0x3f1   : > { %3578 = vst.msk [vmem:[#allocation4 + $0x98] sm:$0xff] %vm808_vm5, %v3453_v55  ;;  %7242 = vmatprep.mubr.msk.f32.mxu1 %vm4434_vm7, %v4399_v60  ;;  %7398 = vmatprep.mubr.msk.f32.mxu0 %vm4434_vm7, %v4399_v60 }
 0x3f2   : > { %3235 = vrot.lane.b32.xlu0 %v9681_v38, %s7566_s27  ;;  %3474 = vrot.lane.b32.xlu1 %v9411_v32, %s7567_s28 }
 0x3f3   : > { %v3741_v48 = vpop.permute.xlu0 %3740  ;;  %v3743_v59 = vpop.permute.xlu1 %3742 }
 0x3f4   : > { %3867 = vst.msk [vmem:[#allocation4 + $0x90] sm:$0xff] %vm3848_vm2, %v3741_v48  ;;  %3868 = vst.msk [vmem:[#allocation4 + $0x98] sm:$0xff] %vm3848_vm2, %v3743_v59 }
 0x3f6   : > { %4248 = vrot.lane.b32.xlu0 %v9777_v50, %s7570_s15  ;;  %3476 = vrot.lane.b32.xlu1 %v9446_v23, %s7567_s28  ;;  %v9799_v23 = vld [vmem:[#allocation2 + $0x120] sm:$0xff] }
 0x3f7   : > { %v3937_v51 = vpop.permute.xlu0 %3936  ;;  %v3214_v22 = vpop.permute.xlu1 %3213  ;;  %v4400_v4 = vld [vmem:[#allocation4 + $0x88] sm:$0xff] }
 0x3f8   : > { %4063 = vst.msk [vmem:[#allocation4 + $0x90] sm:$0xff] %vm4044_vm3, %v3937_v51  ;;  %7243 = vmatmul.mubr.msk.f32.gmra.mrb[72].mxu1 %vm4434_vm7, %v4400_v4  ;;  %7399 = vmatmul.mubr.msk.f32.gmra.mrb[122].mxu0 %vm4434_vm7, %v4400_v4  ;;  %v9929_v51 = vld [vmem:[#allocation2 + $0x150] sm:$0xff] }
 0x3f9   : > { %3338 = vst.msk [vmem:[#allocation4 + $0xa0] sm:$0xff] %vm588_vm4, %v3214_v22 }
 0x3fa   : > { %3764 = vrot.lane.b32.xlu0 %v9729_v56, %s7568_s30  ;;  %3766 = vrot.lane.b32.xlu1 %v9761_v9, %s7568_s30 }
 0x3fb   : > { %v3939_v32 = vpop.permute.xlu0 %3938  ;;  %v4227_v54 = vpop.permute.xlu1 %4226 }
 0x3fc   : > { %4064 = vst.msk [vmem:[#allocation4 + $0x98] sm:$0xff] %vm4044_vm3, %v3939_v32 }
 0x3fd   : > { %4353 = vst.msk [vmem:[#allocation4 + $0x90] sm:$0xff] %vm4334_vm6, %v4227_v54 }
 0x3fe   : > { %3960 = vrot.lane.b32.xlu0 %v9494_v6, %s7569_s6  ;;  %3237 = vrot.lane.b32.xlu1 %v9713_v1, %s7566_s27 }
 0x3ff   : > { %v3216_v57 = vpop.permute.xlu0 %3215  ;;  %v3455_v2 = vpop.permute.xlu1 %3454 }
 0x400   : > { %3339 = vst.msk [vmem:[#allocation4 + $0xa8] sm:$0xff] %vm588_vm4, %v3216_v57 }
 0x401   : > { %3579 = vst.msk [vmem:[#allocation4 + $0xa0] sm:$0xff] %vm808_vm5, %v3455_v2 }
 0x402   : > { %3962 = vrot.lane.b32.xlu0 %v9507_v18, %s7569_s6  ;;  %4250 = vrot.lane.b32.xlu1 %v9799_v23, %s7570_s15 }
 0x403   : > { %v4229_v61 = vpop.permute.xlu0 %4228  ;;  %v3457_v25 = vpop.permute.xlu1 %3456 }
 0x404   : > { %v4401_v62 = vld [vmem:[#allocation4 + $0x90] sm:$0xff]  ;;  %4354 = vst.msk [vmem:[#allocation4 + $0x98] sm:$0xff] %vm4334_vm6, %v4229_v61  ;;  %v6530_v61 = vld [vmem:[%s10796_s3 + $0x18] sm:$0xff] }
 0x405   : > { %3580 = vst.msk [vmem:[#allocation4 + $0xa8] sm:$0xff] %vm808_vm5, %v3457_v25  ;;  %7245 = vmatprep.mubr.msk.f32.mxu1 %vm4434_vm7, %v4401_v62  ;;  %7401 = vmatprep.mubr.msk.f32.mxu0 %vm4434_vm7, %v4401_v62  ;;  %v6531_v25 = vld [vmem:[%s10796_s3 + $0x20] sm:$0xff] }
 0x406   : > { %3239 = vrot.lane.b32.xlu0 %v9729_v56, %s7566_s27  ;;  %3478 = vrot.lane.b32.xlu1 %v9459_v11, %s7567_s28 }
 0x407   : > { %v3745_v7 = vpop.permute.xlu0 %3744  ;;  %v3747_v35 = vpop.permute.xlu1 %3746 }
 0x408   : > { %3869 = vst.msk [vmem:[#allocation4 + $0xa0] sm:$0xff] %vm3848_vm2, %v3745_v7  ;;  %3870 = vst.msk [vmem:[#allocation4 + $0xa8] sm:$0xff] %vm3848_vm2, %v3747_v35  ;;  %v7468_v7 = vpack.c.bf16 %v6531_v25, %v6530_v61  ;;  %v10077_v61 = vld [vmem:[#allocation2 + $0x178] sm:$0xff] }
 0x40a   : > { %4252 = vrot.lane.b32.xlu0 %v9815_v52, %s7570_s15  ;;  %3480 = vrot.lane.b32.xlu1 %v9494_v6, %s7567_s28  ;;  %v9837_v6 = vld [vmem:[#allocation2 + $0x130] sm:$0xff] }
 0x40b   : > { %v3941_v46 = vpop.permute.xlu0 %3940  ;;  %v3218_v20 = vpop.permute.xlu1 %3217  ;;  %v4402_v21 = vld [vmem:[#allocation4 + $0x98] sm:$0xff]  ;;  %7469 = vmatprep.subr.bf16.mxu1 %v7468_v7 }
 0x40c   : > { %4065 = vst.msk [vmem:[#allocation4 + $0xa0] sm:$0xff] %vm4044_vm3, %v3941_v46  ;;  %7246 = vmatmul.mubr.msk.f32.gmra.mrb[74].mxu1 %vm4434_vm7, %v4402_v21  ;;  %7402 = vmatmul.mubr.msk.f32.gmra.mrb[124].mxu0 %vm4434_vm7, %v4402_v21 }
 0x40d   : > { %3340 = vst.msk [vmem:[#allocation4 + $0xb0] sm:$0xff] %vm588_vm4, %v3218_v20  ;;  %v9955_v20 = vld [vmem:[#allocation2 + $0x158] sm:$0xff]  ;;  %7471 = vmatpush3.bf16.msra.mxu1 %v7468_v7 }
 0x40e   : > { %3768 = vrot.lane.b32.xlu0 %v9777_v50, %s7568_s30  ;;  %3770 = vrot.lane.b32.xlu1 %v9799_v23, %s7568_s30 }
 0x40f   : > { %v3943_v11 = vpop.permute.xlu0 %3942  ;;  %v4231_v15 = vpop.permute.xlu1 %4230 }
 0x410   : > { %4066 = vst.msk [vmem:[#allocation4 + $0xa8] sm:$0xff] %vm4044_vm3, %v3943_v11 }
 0x411   : > { %4355 = vst.msk [vmem:[#allocation4 + $0xa0] sm:$0xff] %vm4334_vm6, %v4231_v15 }
 0x412   : > { %3964 = vrot.lane.b32.xlu0 %v9542_v49, %s7569_s6  ;;  %3241 = vrot.lane.b32.xlu1 %v9761_v9, %s7566_s27 }
 0x413   : > { %v3220_v42 = vpop.permute.xlu0 %3219  ;;  %v3459_v5 = vpop.permute.xlu1 %3458 }
 0x414   : > { %3341 = vst.msk [vmem:[#allocation4 + $0xb8] sm:$0xff] %vm588_vm4, %v3220_v42 }
 0x415   : > { %3581 = vst.msk [vmem:[#allocation4 + $0xb0] sm:$0xff] %vm808_vm5, %v3459_v5 }
 0x416   : > { %3966 = vrot.lane.b32.xlu0 %v9555_v12, %s7569_s6  ;;  %4254 = vrot.lane.b32.xlu1 %v9837_v6, %s7570_s15 }
 0x417   : > { %v4233_v38 = vpop.permute.xlu0 %4232  ;;  %v3461_v0 = vpop.permute.xlu1 %3460 }
 0x418   : > { %v4403_v36 = vld [vmem:[#allocation4 + $0xa0] sm:$0xff]  ;;  %4356 = vst.msk [vmem:[#allocation4 + $0xa8] sm:$0xff] %vm4334_vm6, %v4233_v38 }
 0x419   : > { %3582 = vst.msk [vmem:[#allocation4 + $0xb8] sm:$0xff] %vm808_vm5, %v3461_v0  ;;  %7248 = vmatprep.mubr.msk.f32.mxu1 %vm4434_vm7, %v4403_v36  ;;  %7404 = vmatprep.mubr.msk.f32.mxu0 %vm4434_vm7, %v4403_v36  ;;  %v9991_v36 = vld [vmem:[#allocation2 + $0x160] sm:$0xff] }
 0x41a   : > { %3243 = vrot.lane.b32.xlu0 %v9777_v50, %s7566_s27  ;;  %3482 = vrot.lane.b32.xlu1 %v9507_v18, %s7567_s28 }
 0x41b   : > { %v3749_v45 = vpop.permute.xlu0 %3748  ;;  %v3751_v39 = vpop.permute.xlu1 %3750 }
 0x41c   : > { %3871 = vst.msk [vmem:[#allocation4 + $0xb0] sm:$0xff] %vm3848_vm2, %v3749_v45  ;;  %3872 = vst.msk [vmem:[#allocation4 + $0xb8] sm:$0xff] %vm3848_vm2, %v3751_v39 }
 0x41e   : > { %4256 = vrot.lane.b32.xlu0 %v9853_v34, %s7570_s15  ;;  %3484 = vrot.lane.b32.xlu1 %v9542_v49, %s7567_s28  ;;  %v9875_v49 = vld [vmem:[#allocation2 + $0x140] sm:$0xff] }
 0x41f   : > { %v3945_v30 = vpop.permute.xlu0 %3944  ;;  %v3222_v41 = vpop.permute.xlu1 %3221  ;;  %v4404_v1 = vld [vmem:[#allocation4 + $0xa8] sm:$0xff] }
 0x420   : > { %4067 = vst.msk [vmem:[#allocation4 + $0xb0] sm:$0xff] %vm4044_vm3, %v3945_v30  ;;  %7249 = vmatmul.mubr.msk.f32.gmra.mrb[76].mxu1 %vm4434_vm7, %v4404_v1  ;;  %7405 = vmatmul.mubr.msk.f32.gmra.mrb[126].mxu0 %vm4434_vm7, %v4404_v1 }
 0x421   : > { %3342 = vst.msk [vmem:[#allocation4 + $0xc0] sm:$0xff] %vm588_vm4, %v3222_v41 }
 0x422   : > { %3772 = vrot.lane.b32.xlu0 %v9815_v52, %s7568_s30  ;;  %3774 = vrot.lane.b32.xlu1 %v9837_v6, %s7568_s30 }
 0x423   : > { %v3947_v18 = vpop.permute.xlu0 %3946  ;;  %v4235_v33 = vpop.permute.xlu1 %4234 }
 0x424   : > { %4068 = vst.msk [vmem:[#allocation4 + $0xb8] sm:$0xff] %vm4044_vm3, %v3947_v18 }
 0x425   : > { %4357 = vst.msk [vmem:[#allocation4 + $0xb0] sm:$0xff] %vm4334_vm6, %v4235_v33 }
 0x426   : > { %3968 = vrot.lane.b32.xlu0 %v9590_v17, %s7569_s6  ;;  %3245 = vrot.lane.b32.xlu1 %v9799_v23, %s7566_s27 }
 0x427   : > { %v3224_v3 = vpop.permute.xlu0 %3223  ;;  %v3463_v58 = vpop.permute.xlu1 %3462 }
 0x428   : > { %3343 = vst.msk [vmem:[#allocation4 + $0xc8] sm:$0xff] %vm588_vm4, %v3224_v3 }
 0x429   : > { %3583 = vst.msk [vmem:[#allocation4 + $0xc0] sm:$0xff] %vm808_vm5, %v3463_v58 }
 0x42a   : > { %3970 = vrot.lane.b32.xlu0 %v9603_v47, %s7569_s6  ;;  %4258 = vrot.lane.b32.xlu1 %v9875_v49, %s7570_s15  ;;  %v9883_v28 = vpop.f32.mrb[56].mxu1  ;;  %v9887_v10 = vpop.f32.mrb[106].mxu0 }
 0x42b   : > { %v4237_v16 = vpop.permute.xlu0 %4236  ;;  %v4934_v31 = vrot.slane %v9883_v28, 1  ;;  %v3465_v43 = vpop.permute.xlu1 %3464  ;;  %v5906_v53 = vrot.slane %v9887_v10, 3 }
 0x42c   : > { %v4405_v56 = vld [vmem:[#allocation4 + $0xb0] sm:$0xff]  ;;  %4358 = vst.msk [vmem:[#allocation4 + $0xb8] sm:$0xff] %vm4334_vm6, %v4237_v16  ;;  %v4645_v29 = vpop.f32.mrb[57].mxu1  ;;  %v5617_v26 = vpop.f32.mrb[107].mxu0 }
 0x42d   : > { %7251 = vmatprep.mubr.msk.f32.mxu1 %vm4434_vm7, %v4405_v56  ;;  %7407 = vmatprep.mubr.msk.f32.mxu0 %vm4434_vm7, %v4405_v56  ;;  %3584 = vst.msk [vmem:[#allocation4 + $0xc8] sm:$0xff] %vm808_vm5, %v3465_v43  ;;  %v4933_v19 = vrot.slane %v4645_v29, 1  ;;  %v5905_v9 = vrot.slane %v5617_v26, 3 }
 0x42e   : > { %3247 = vrot.lane.b32.xlu0 %v9815_v52, %s7566_s27  ;;  %3486 = vrot.lane.b32.xlu1 %v9555_v12, %s7567_s28 }
 0x42f   : > { %v3753_v37 = vpop.permute.xlu0 %3752  ;;  %v9902_v14 = vsel %vm2429_vm8, %v4933_v19, %v4934_v31  ;;  %v9907_v55 = vsel %vm5904_vm0, %v5905_v9, %v5906_v53  ;;  %v3755_v60 = vpop.permute.xlu1 %3754 }
 0x430   : > { %3873 = vst.msk [vmem:[#allocation4 + $0xc0] sm:$0xff] %vm3848_vm2, %v3753_v37  ;;  %3874 = vst.msk [vmem:[#allocation4 + $0xc8] sm:$0xff] %vm3848_vm2, %v3755_v60 }
 0x432   : > { %4260 = vrot.lane.b32.xlu0 %v9897_v24, %s7570_s15  ;;  %3488 = vrot.lane.b32.xlu1 %v9590_v17, %s7567_s28 }
 0x433   : > { %v3949_v12 = vpop.permute.xlu0 %3948  ;;  %v4406_v50 = vld [vmem:[#allocation4 + $0xb8] sm:$0xff]  ;;  %v3226_v48 = vpop.permute.xlu1 %3225 }
 0x434   : > { %4069 = vst.msk [vmem:[#allocation4 + $0xc0] sm:$0xff] %vm4044_vm3, %v3949_v12  ;;  %7252 = vmatmul.mubr.msk.f32.gmra.mrb[78].mxu1 %vm4434_vm7, %v4406_v50  ;;  %7408 = vmatmul.mubr.msk.f32.gmra.mrb[128].mxu0 %vm4434_vm7, %v4406_v50  ;;  %v10051_v12 = vld [vmem:[#allocation2 + $0x170] sm:$0xff] }
 0x435   : > { %3344 = vst.msk [vmem:[#allocation4 + $0xd0] sm:$0xff] %vm588_vm4, %v3226_v48 }
 0x436   : > { %3776 = vrot.lane.b32.xlu0 %v9853_v34, %s7568_s30  ;;  %3778 = vrot.lane.b32.xlu1 %v9875_v49, %s7568_s30 }
 0x437   : > { %v3951_v59 = vpop.permute.xlu0 %3950  ;;  %v4239_v17 = vpop.permute.xlu1 %4238 }
 0x438   : > { %4070 = vst.msk [vmem:[#allocation4 + $0xc8] sm:$0xff] %vm4044_vm3, %v3951_v59 }
 0x439   : > { %4359 = vst.msk [vmem:[#allocation4 + $0xc0] sm:$0xff] %vm4334_vm6, %v4239_v17 }
 0x43a   : > { %3972 = vrot.lane.b32.xlu0 %v9642_v44, %s7569_s6  ;;  %3249 = vrot.lane.b32.xlu1 %v9837_v6, %s7566_s27 }
 0x43b   : > { %v3228_v22 = vpop.permute.xlu0 %3227  ;;  %v3467_v4 = vpop.permute.xlu1 %3466 }
 0x43c   : > { %3345 = vst.msk [vmem:[#allocation4 + $0xd8] sm:$0xff] %vm588_vm4, %v3228_v22 }
 0x43d   : > { %3585 = vst.msk [vmem:[#allocation4 + $0xd0] sm:$0xff] %vm808_vm5, %v3467_v4 }
 0x43e   : > { %3974 = vrot.lane.b32.xlu0 %v9655_v8, %s7569_s6  ;;  %4262 = vrot.lane.b32.xlu1 %v9929_v51, %s7570_s15  ;;  %v9937_v54 = vpop.f32.mrb[58].mxu1  ;;  %v9940_v23 = vpop.f32.mrb[108].mxu0 }
 0x43f   : > { %v4241_v32 = vpop.permute.xlu0 %4240  ;;  %v3469_v57 = vpop.permute.xlu1 %3468  ;;  %v4938_v58 = vrot.slane %v9937_v54, 1  ;;  %v5910_v16 = vrot.slane %v9940_v23, 3 }
 0x440   : > { %4360 = vst.msk [vmem:[#allocation4 + $0xc8] sm:$0xff] %vm4334_vm6, %v4241_v32  ;;  %v4407_v2 = vld [vmem:[#allocation4 + $0xc0] sm:$0xff]  ;;  %v4655_v62 = vpop.f32.mrb[59].mxu1  ;;  %v5627_v52 = vpop.f32.mrb[109].mxu0 }
 0x441   : > { %3586 = vst.msk [vmem:[#allocation4 + $0xd8] sm:$0xff] %vm808_vm5, %v3469_v57  ;;  %7254 = vmatprep.mubr.msk.f32.mxu1 %vm4434_vm7, %v4407_v2  ;;  %v4936_v35 = vrot.slane %v4655_v62, 1  ;;  %v5908_v46 = vrot.slane %v5627_v52, 3  ;;  %7410 = vmatprep.mubr.msk.f32.mxu0 %vm4434_vm7, %v4407_v2 }
 0x442   : > { %3251 = vrot.lane.b32.xlu0 %v9853_v34, %s7566_s27  ;;  %3490 = vrot.lane.b32.xlu1 %v9603_v47, %s7567_s28 }
 0x443   : > { %v3757_v21 = vpop.permute.xlu0 %3756  ;;  %v9960_v11 = vsel %vm2429_vm8, %v4934_v31, %v4936_v35  ;;  %v9965_v15 = vsel %vm5904_vm0, %v5906_v53, %v5908_v46  ;;  %v3759_v6 = vpop.permute.xlu1 %3758  ;;  %v10013_v31 = vld [vmem:[#allocation2 + $0x168] sm:$0xff] }
 0x444   : > { %3875 = vst.msk [vmem:[#allocation4 + $0xd0] sm:$0xff] %vm3848_vm2, %v3757_v21  ;;  %3876 = vst.msk [vmem:[#allocation4 + $0xd8] sm:$0xff] %vm3848_vm2, %v3759_v6 }
 0x446   : > { %4264 = vrot.lane.b32.xlu0 %v9955_v20, %s7570_s15  ;;  %3492 = vrot.lane.b32.xlu1 %v9642_v44, %s7567_s28 }
 0x447   : > { %v3953_v47 = vpop.permute.xlu0 %3952  ;;  %v9973_v42 = vld [vmem:[#allocation4 + $0xc8] sm:$0xff]  ;;  %v3230_v5 = vpop.permute.xlu1 %3229 }
 0x448   : > { %4071 = vst.msk [vmem:[#allocation4 + $0xd0] sm:$0xff] %vm4044_vm3, %v3953_v47  ;;  %7255 = vmatmul.mubr.msk.f32.gmra.mrb[80].mxu1 %vm4434_vm7, %v9973_v42  ;;  %7411 = vmatmul.mubr.msk.f32.gmra.mrb[130].mxu0 %vm4434_vm7, %v9973_v42  ;;  %v10117_v47 = vld [vmem:[%s7627_s29 + $0x1a0] sm:$0xff] }
 0x449   : > { %3346 = vst.msk [vmem:[#allocation4 + $0xe0] sm:$0xff] %vm588_vm4, %v3230_v5 }
 0x44a   : > { %3780 = vrot.lane.b32.xlu0 %v9897_v24, %s7568_s30  ;;  %3782 = vrot.lane.b32.xlu1 %v9929_v51, %s7568_s30 }
 0x44b   : > { %v3955_v44 = vpop.permute.xlu0 %3954  ;;  %v4243_v38 = vpop.permute.xlu1 %4242 }
 0x44c   : > { %4072 = vst.msk [vmem:[#allocation4 + $0xd8] sm:$0xff] %vm4044_vm3, %v3955_v44  ;;  %v4136_v44 = vld [vmem:[#allocation2 + $0x180] sm:$0xff] }
 0x44d   : > { %4361 = vst.msk [vmem:[#allocation4 + $0xd0] sm:$0xff] %vm4334_vm6, %v4243_v38 }
 0x44e   : > { %3976 = vrot.lane.b32.xlu0 %v9690_v63, %s7569_s6  ;;  %3253 = vrot.lane.b32.xlu1 %v9875_v49, %s7566_s27 }
 0x450   : > { %v3232_v0 = vpop.permute.xlu0 %3231  ;;  %v3471_v34 = vpop.permute.xlu1 %3470 }
 0x451   : > { %3347 = vst.msk [vmem:[#allocation4 + $0xe8] sm:$0xff] %vm588_vm4, %v3232_v0 }
 0x452   : > { %3587 = vst.msk [vmem:[#allocation4 + $0xe0] sm:$0xff] %vm808_vm5, %v3471_v34  ;;  %3978 = vrot.lane.b32.xlu0 %v9703_v27, %s7569_s6  ;;  %4266 = vrot.lane.b32.xlu1 %v9991_v36, %s7570_s15  ;;  %v7226_v39 = vpop.f32.mrb[60].mxu1  ;;  %v7382_v41 = vpop.f32.mrb[110].mxu0 }
 0x453   : > { %v4941_v30 = vrot.slane %v7226_v39, 1  ;;  %v5913_v33 = vrot.slane %v7382_v41, 3  ;;  %v4665_v49 = vpop.f32.mrb[61].mxu1  ;;  %v5637_v3 = vpop.f32.mrb[111].mxu0 }
 0x454   : > { %v4245_v45 = vpop.permute.xlu0 %4244  ;;  %v3473_v1 = vpop.permute.xlu1 %3472  ;;  %v10000_v18 = vld [vmem:[#allocation4 + $0xd0] sm:$0xff]  ;;  %v4939_v28 = vrot.slane %v4665_v49, 1  ;;  %v5911_v56 = vrot.slane %v5637_v3, 3  ;;  %v10140_v49 = vld [vmem:[#allocation2 + $0x188] sm:$0xff] }
 0x455   : > { %4362 = vst.msk [vmem:[#allocation4 + $0xd8] sm:$0xff] %vm4334_vm6, %v4245_v45  ;;  %7257 = vmatprep.mubr.msk.f32.mxu1 %vm4434_vm7, %v10000_v18  ;;  %7413 = vmatprep.mubr.msk.f32.mxu0 %vm4434_vm7, %v10000_v18 }
 0x456   : > { %3588 = vst.msk [vmem:[#allocation4 + $0xe8] sm:$0xff] %vm808_vm5, %v3473_v1  ;;  %3255 = vrot.lane.b32.xlu0 %v9897_v24, %s7566_s27  ;;  %3494 = vrot.lane.b32.xlu1 %v9655_v8, %s7567_s28  ;;  %v10016_v43 = vsel %vm2429_vm8, %v4938_v58, %v4939_v28  ;;  %v10019_v53 = vsel %vm2429_vm8, %v4939_v28, %v4941_v30 }
 0x457   : > { %v10022_v29 = vsel %vm5904_vm0, %v5910_v16, %v5911_v56  ;;  %v10025_v26 = vsel %vm5904_vm0, %v5911_v56, %v5913_v33 }
 0x458   : > { %v3761_v10 = vpop.permute.xlu0 %3760  ;;  %v3763_v19 = vpop.permute.xlu1 %3762 }
 0x459   : > { %3877 = vst.msk [vmem:[#allocation4 + $0xe0] sm:$0xff] %vm3848_vm2, %v3761_v10  ;;  %3878 = vst.msk [vmem:[#allocation4 + $0xe8] sm:$0xff] %vm3848_vm2, %v3763_v19  ;;  %v3024_v10 = vld [vmem:[%s7627_s29 + $0x1a8] sm:$0xff] }
 0x45a   : > { %4268 = vrot.lane.b32.xlu0 %v10013_v31, %s7570_s15  ;;  %3496 = vrot.lane.b32.xlu1 %v9690_v63, %s7567_s28 }
 0x45c   : > { %v3957_v8 = vpop.permute.xlu0 %3956  ;;  %v10033_v9 = vld [vmem:[#allocation4 + $0xd8] sm:$0xff]  ;;  %v3234_v24 = vpop.permute.xlu1 %3233 }
 0x45d   : > { %4073 = vst.msk [vmem:[#allocation4 + $0xe0] sm:$0xff] %vm4044_vm3, %v3957_v8  ;;  %7258 = vmatmul.mubr.msk.f32.gmra.mrb[82].mxu1 %vm4434_vm7, %v10033_v9  ;;  %7414 = vmatmul.mubr.msk.f32.gmra.mrb[132].mxu0 %vm4434_vm7, %v10033_v9 }
 0x45e   : > { %3348 = vst.msk [vmem:[#allocation4 + $0xf0] sm:$0xff] %vm588_vm4, %v3234_v24  ;;  %3784 = vrot.lane.b32.xlu0 %v9955_v20, %s7568_s30  ;;  %3786 = vrot.lane.b32.xlu1 %v9991_v36, %s7568_s30  ;;  %v3025_v24 = vld [vmem:[%s7627_s29 + $0x1b0] sm:$0xff] }
 0x460   : > { %v3959_v63 = vpop.permute.xlu0 %3958  ;;  %v4247_v37 = vpop.permute.xlu1 %4246 }
 0x461   : > { %4074 = vst.msk [vmem:[#allocation4 + $0xe8] sm:$0xff] %vm4044_vm3, %v3959_v63 }
 0x462   : > { %4363 = vst.msk [vmem:[#allocation4 + $0xe0] sm:$0xff] %vm4334_vm6, %v4247_v37  ;;  %3980 = vrot.lane.b32.xlu0 %v9738_v40, %s7569_s6  ;;  %3257 = vrot.lane.b32.xlu1 %v9929_v51, %s7566_s27  ;;  %v4138_v37 = vld [vmem:[#allocation2 + $0x190] sm:$0xff] }
 0x464   : > { %v3236_v60 = vpop.permute.xlu0 %3235  ;;  %v3475_v50 = vpop.permute.xlu1 %3474 }
 0x465   : > { %3349 = vst.msk [vmem:[#allocation4 + $0xf8] sm:$0xff] %vm588_vm4, %v3236_v60 }
 0x466   : > { %3589 = vst.msk [vmem:[#allocation4 + $0xf0] sm:$0xff] %vm808_vm5, %v3475_v50  ;;  %3982 = vrot.lane.b32.xlu0 %v9751_v13, %s7569_s6  ;;  %4270 = vrot.lane.b32.xlu1 %v10051_v12, %s7570_s15  ;;  %v10059_v59 = vpop.f32.mrb[62].mxu1  ;;  %v10063_v51 = vpop.f32.mrb[112].mxu0 }
 0x467   : > { %v4944_v17 = vrot.slane %v10059_v59, 1  ;;  %v5916_v32 = vrot.slane %v10063_v51, 3  ;;  %v4675_v54 = vpop.f32.mrb[63].mxu1  ;;  %v5647_v23 = vpop.f32.mrb[113].mxu0 }
 0x468   : > { %v4249_v48 = vpop.permute.xlu0 %4248  ;;  %v3477_v22 = vpop.permute.xlu1 %3476  ;;  %v4943_v57 = vrot.slane %v4675_v54, 1  ;;  %v5915_v2 = vrot.slane %v5647_v23, 3 }
 0x469   : > { %4364 = vst.msk [vmem:[#allocation4 + $0xe8] sm:$0xff] %vm4334_vm6, %v4249_v48  ;;  %v10065_v4 = vld [vmem:[#allocation4 + $0xe0] sm:$0xff] }
 0x46a   : > { %3590 = vst.msk [vmem:[#allocation4 + $0xf8] sm:$0xff] %vm808_vm5, %v3477_v22  ;;  %3259 = vrot.lane.b32.xlu0 %v9955_v20, %s7566_s27  ;;  %7260 = vmatprep.mubr.msk.f32.mxu1 %vm4434_vm7, %v10065_v4  ;;  %v10082_v62 = vsel %vm2429_vm8, %v4943_v57, %v4944_v17  ;;  %v10087_v52 = vsel %vm5904_vm0, %v5915_v2, %v5916_v32  ;;  %v3022_v20 = vld [vmem:[%s7627_s29 + $0x198] sm:$0xff] }
 0x46b   : > { %7416 = vmatprep.mubr.msk.f32.mxu0 %vm4434_vm7, %v10065_v4  ;;  %3498 = vrot.lane.b32.xlu1 %v9703_v27, %s7567_s28 }
 0x46c   : > { %v3765_v25 = vpop.permute.xlu0 %3764  ;;  %v3767_v7 = vpop.permute.xlu1 %3766 }
 0x46d   : > { %3879 = vst.msk [vmem:[#allocation4 + $0xf0] sm:$0xff] %vm3848_vm2, %v3765_v25  ;;  %3880 = vst.msk [vmem:[#allocation4 + $0xf8] sm:$0xff] %vm3848_vm2, %v3767_v7  ;;  %v4139_v7 = vld [vmem:[#allocation2 + $0x198] sm:$0xff] }
 0x46e   : > { %4272 = vrot.lane.b32.xlu0 %v10077_v61, %s7570_s15 }
 0x46f   : > { %3500 = vrot.lane.b32.xlu1 %v9738_v40, %s7567_s28  ;;  %v6532_v40 = vld [vmem:[%s10796_s3 + $0x28] sm:$0xff] }
 0x470   : > { %v3961_v27 = vpop.permute.xlu0 %3960  ;;  %v10095_v35 = vld [vmem:[#allocation4 + $0xe8] sm:$0xff]  ;;  %v3238_v46 = vpop.permute.xlu1 %3237  ;;  %7294 = vmatprep.subr.mxu1 %v6532_v40 }
 0x471   : > { %4075 = vst.msk [vmem:[#allocation4 + $0xf0] sm:$0xff] %vm4044_vm3, %v3961_v27  ;;  %7261 = vmatmul.mubr.msk.f32.gmra.mrb[84].mxu1 %vm4434_vm7, %v10095_v35  ;;  %7417 = vmatmul.mubr.msk.f32.gmra.mrb[134].mxu0 %vm4434_vm7, %v10095_v35 }
 0x472   : > { %3350 = vst.msk [vmem:[#allocation4 + $0x100] sm:$0xff] %vm588_vm4, %v3238_v46  ;;  %3788 = vrot.lane.b32.xlu0 %v10013_v31, %s7568_s30  ;;  %7295 = vmatpush3.msra.mxu1 %v6532_v40 }
 0x473   : > { %3790 = vrot.lane.b32.xlu1 %v10051_v12, %s7568_s30 }
 0x474   : > { %v3963_v21 = vpop.permute.xlu0 %3962  ;;  %v4251_v6 = vpop.permute.xlu1 %4250 }
 0x475   : > { %4076 = vst.msk [vmem:[#allocation4 + $0xf8] sm:$0xff] %vm4044_vm3, %v3963_v21 }
 0x476   : > { %4365 = vst.msk [vmem:[#allocation4 + $0xf0] sm:$0xff] %vm4334_vm6, %v4251_v6  ;;  %3984 = vrot.lane.b32.xlu0 %v3022_v20, %s7569_s6 }
 0x477   : > { %3261 = vrot.lane.b32.xlu1 %v9991_v36, %s7566_s27 }
 0x478   : > { %v3240_v5 = vpop.permute.xlu0 %3239  ;;  %v3479_v38 = vpop.permute.xlu1 %3478 }
 0x479   : > { %3351 = vst.msk [vmem:[#allocation4 + $0x108] sm:$0xff] %vm588_vm4, %v3240_v5 }
 0x47a   : > { %3591 = vst.msk [vmem:[#allocation4 + $0x100] sm:$0xff] %vm808_vm5, %v3479_v38  ;;  %3986 = vrot.lane.b32.xlu0 %v10117_v47, %s7569_s6  ;;  %v10124_v34 = vpop.f32.mrb[64].mxu1  ;;  %v10127_v36 = vpop.f32.mrb[114].mxu0 }
 0x47b   : > { %4274 = vrot.lane.b32.xlu1 %v4136_v44, %s7570_s15  ;;  %v4685_v30 = vpop.f32.mrb[65].mxu1  ;;  %v5657_v41 = vpop.f32.mrb[115].mxu0  ;;  %v4948_v23 = vrot.slane %v10124_v34, 1  ;;  %v5920_v57 = vrot.slane %v10127_v36, 3  ;;  %v4140_v36 = vld [vmem:[#allocation2 + $0x1a0] sm:$0xff] }
 0x47c   : > { %v4253_v0 = vpop.permute.xlu0 %4252  ;;  %v3481_v45 = vpop.permute.xlu1 %3480  ;;  %v4946_v1 = vrot.slane %v4685_v30, 1  ;;  %v5918_v33 = vrot.slane %v5657_v41, 3  ;;  %v4141_v30 = vld [vmem:[#allocation2 + $0x1a8] sm:$0xff] }
 0x47d   : > { %4366 = vst.msk [vmem:[#allocation4 + $0xf8] sm:$0xff] %vm4334_vm6, %v4253_v0  ;;  %v10129_v39 = vld [vmem:[#allocation4 + $0xf0] sm:$0xff] }
 0x47e   : > { %3592 = vst.msk [vmem:[#allocation4 + $0x108] sm:$0xff] %vm808_vm5, %v3481_v45  ;;  %3263 = vrot.lane.b32.xlu0 %v10013_v31, %s7566_s27  ;;  %7263 = vmatprep.mubr.msk.f32.mxu1 %vm4434_vm7, %v10129_v39  ;;  %v10145_v58 = vsel %vm2429_vm8, %v4944_v17, %v4946_v1  ;;  %v10150_v16 = vsel %vm5904_vm0, %v5916_v32, %v5918_v33  ;;  %v3027_v0 = vld [vmem:[%s7627_s29 + $0x1c0] sm:$0xff] }
 0x47f   : > { %7419 = vmatprep.mubr.msk.f32.mxu0 %vm4434_vm7, %v10129_v39  ;;  %3502 = vrot.lane.b32.xlu1 %v9751_v13, %s7567_s28 }
 0x480   : > { %v3769_v3 = vpop.permute.xlu0 %3768  ;;  %v3771_v28 = vpop.permute.xlu1 %3770 }
 0x481   : > { %3881 = vst.msk [vmem:[#allocation4 + $0x100] sm:$0xff] %vm3848_vm2, %v3769_v3  ;;  %3882 = vst.msk [vmem:[#allocation4 + $0x108] sm:$0xff] %vm3848_vm2, %v3771_v28 }
 0x482   : > { %4276 = vrot.lane.b32.xlu0 %v10140_v49, %s7570_s15 }
 0x483   : > { %3504 = vrot.lane.b32.xlu1 %v3022_v20, %s7567_s28 }
 0x484   : > { %v3965_v13 = vpop.permute.xlu0 %3964  ;;  %v10157_v56 = vld [vmem:[#allocation4 + $0xf8] sm:$0xff]  ;;  %v3242_v31 = vpop.permute.xlu1 %3241 }
 0x485   : > { %4077 = vst.msk [vmem:[#allocation4 + $0x100] sm:$0xff] %vm4044_vm3, %v3965_v13  ;;  %7264 = vmatmul.mubr.msk.f32.gmra.mrb[86].mxu1 %vm4434_vm7, %v10157_v56  ;;  %7420 = vmatmul.mubr.msk.f32.gmra.mrb[136].mxu0 %vm4434_vm7, %v10157_v56 }
 0x486   : > { %3352 = vst.msk [vmem:[#allocation4 + $0x110] sm:$0xff] %vm588_vm4, %v3242_v31  ;;  %3792 = vrot.lane.b32.xlu0 %v10077_v61, %s7568_s30 }
 0x487   : > { %3794 = vrot.lane.b32.xlu1 %v4136_v44, %s7568_s30  ;;  %v3026_v44 = vld [vmem:[%s7627_s29 + $0x1b8] sm:$0xff] }
 0x488   : > { %v3967_v19 = vpop.permute.xlu0 %3966  ;;  %v4255_v8 = vpop.permute.xlu1 %4254 }
 0x489   : > { %4078 = vst.msk [vmem:[#allocation4 + $0x108] sm:$0xff] %vm4044_vm3, %v3967_v19 }
 0x48a   : > { %4367 = vst.msk [vmem:[#allocation4 + $0x100] sm:$0xff] %vm4334_vm6, %v4255_v8  ;;  %3988 = vrot.lane.b32.xlu0 %v3024_v10, %s7569_s6 }
 0x48b   : > { %3265 = vrot.lane.b32.xlu1 %v10051_v12, %s7566_s27 }
 0x48c   : > { %v3244_v63 = vpop.permute.xlu0 %3243  ;;  %v3483_v60 = vpop.permute.xlu1 %3482 }
 0x48d   : > { %3353 = vst.msk [vmem:[#allocation4 + $0x118] sm:$0xff] %vm588_vm4, %v3244_v63 }
 0x48e   : > { %3593 = vst.msk [vmem:[#allocation4 + $0x110] sm:$0xff] %vm808_vm5, %v3483_v60  ;;  %3990 = vrot.lane.b32.xlu0 %v3025_v24, %s7569_s6  ;;  %v7235_v48 = vpop.f32.mrb[66].mxu1  ;;  %v7391_v17 = vpop.f32.mrb[116].mxu0 }
 0x48f   : > { %4278 = vrot.lane.b32.xlu1 %v4138_v37, %s7570_s15  ;;  %v4951_v59 = vrot.slane %v7235_v48, 1  ;;  %v5923_v22 = vrot.slane %v7391_v17, 3  ;;  %v4695_v32 = vpop.f32.mrb[67].mxu1  ;;  %v5667_v54 = vpop.f32.mrb[117].mxu0 }
 0x490   : > { %v4257_v50 = vpop.permute.xlu0 %4256  ;;  %v3485_v51 = vpop.permute.xlu1 %3484  ;;  %v4949_v2 = vrot.slane %v4695_v32, 1  ;;  %v5921_v25 = vrot.slane %v5667_v54, 3 }
 0x491   : > { %4368 = vst.msk [vmem:[#allocation4 + $0x108] sm:$0xff] %vm4334_vm6, %v4257_v50  ;;  %v10180_v12 = vld [vmem:[#allocation4 + $0x100] sm:$0xff] }
 0x492   : > { %3594 = vst.msk [vmem:[#allocation4 + $0x118] sm:$0xff] %vm808_vm5, %v3485_v51  ;;  %3267 = vrot.lane.b32.xlu0 %v10077_v61, %s7566_s27  ;;  %7266 = vmatprep.mubr.msk.f32.mxu1 %vm4434_vm7, %v10180_v12  ;;  %v10194_v46 = vsel %vm2429_vm8, %v4948_v23, %v4949_v2  ;;  %v10197_v61 = vsel %vm2429_vm8, %v4949_v2, %v4951_v59 }
 0x493   : > { %7422 = vmatprep.mubr.msk.f32.mxu0 %vm4434_vm7, %v10180_v12  ;;  %3506 = vrot.lane.b32.xlu1 %v10117_v47, %s7567_s28  ;;  %v10200_v40 = vsel %vm5904_vm0, %v5920_v57, %v5921_v25  ;;  %v10203_v20 = vsel %vm5904_vm0, %v5921_v25, %v5923_v22 }
 0x494   : > { %v3773_v27 = vpop.permute.xlu0 %3772  ;;  %v3775_v21 = vpop.permute.xlu1 %3774 }
 0x495   : > { %3883 = vst.msk [vmem:[#allocation4 + $0x110] sm:$0xff] %vm3848_vm2, %v3773_v27  ;;  %3884 = vst.msk [vmem:[#allocation4 + $0x118] sm:$0xff] %vm3848_vm2, %v3775_v21 }
 0x496   : > { %4280 = vrot.lane.b32.xlu0 %v4139_v7, %s7570_s15 }
 0x497   : > { %3508 = vrot.lane.b32.xlu1 %v3024_v10, %s7567_s28 }
 0x498   : > { %v3969_v6 = vpop.permute.xlu0 %3968  ;;  %v10209_v47 = vld [vmem:[#allocation4 + $0x108] sm:$0xff]  ;;  %v3246_v5 = vpop.permute.xlu1 %3245 }
 0x499   : > { %4079 = vst.msk [vmem:[#allocation4 + $0x110] sm:$0xff] %vm4044_vm3, %v3969_v6  ;;  %7267 = vmatmul.mubr.msk.f32.gmra.mrb[88].mxu1 %vm4434_vm7, %v10209_v47  ;;  %7423 = vmatmul.mubr.msk.f32.gmra.mrb[138].mxu0 %vm4434_vm7, %v10209_v47 }
 0x49a   : > { %3354 = vst.msk [vmem:[#allocation4 + $0x120] sm:$0xff] %vm588_vm4, %v3246_v5  ;;  %3796 = vrot.lane.b32.xlu0 %v10140_v49, %s7568_s30 }
 0x49b   : > { %3798 = vrot.lane.b32.xlu1 %v4138_v37, %s7568_s30 }
 0x49c   : > { %v3971_v38 = vpop.permute.xlu0 %3970  ;;  %v4259_v34 = vpop.permute.xlu1 %4258 }
 0x49d   : > { %4080 = vst.msk [vmem:[#allocation4 + $0x118] sm:$0xff] %vm4044_vm3, %v3971_v38 }
 0x49e   : > { %4369 = vst.msk [vmem:[#allocation4 + $0x110] sm:$0xff] %vm4334_vm6, %v4259_v34  ;;  %3992 = vrot.lane.b32.xlu0 %v3026_v44, %s7569_s6 }
 0x49f   : > { %3994 = vrot.lane.b32.xlu1 %v3027_v0, %s7569_s6 }
 0x4a0   : > { %v3248_v45 = vpop.permute.xlu0 %3247  ;;  %v3487_v41 = vpop.permute.xlu1 %3486 }
 0x4a1   : > { %3355 = vst.msk [vmem:[#allocation4 + $0x128] sm:$0xff] %vm588_vm4, %v3248_v45 }
 0x4a2   : > { %3595 = vst.msk [vmem:[#allocation4 + $0x120] sm:$0xff] %vm808_vm5, %v3487_v41  ;;  %4282 = vrot.lane.b32.xlu0 %v4140_v36, %s7570_s15 }
 0x4a3   : > { %4284 = vrot.lane.b32.xlu1 %v4141_v30, %s7570_s15  ;;  %v7238_v33 = vpop.f32.mrb[68].mxu1  ;;  %v7394_v3 = vpop.f32.mrb[118].mxu0 }
 0x4a4   : > { %v4261_v1 = vpop.permute.xlu0 %4260  ;;  %v4954_v49 = vrot.slane %v7238_v33, 1  ;;  %v3489_v28 = vpop.permute.xlu1 %3488  ;;  %v5926_v31 = vrot.slane %v7394_v3, 3 }
 0x4a5   : > { %4370 = vst.msk [vmem:[#allocation4 + $0x118] sm:$0xff] %vm4334_vm6, %v4261_v1  ;;  %v10231_v13 = vld [vmem:[#allocation4 + $0x110] sm:$0xff]  ;;  %v4705_v10 = vpop.f32.mrb[69].mxu1  ;;  %v5677_v19 = vpop.f32.mrb[119].mxu0 }
 0x4a6   : > { %3596 = vst.msk [vmem:[#allocation4 + $0x128] sm:$0xff] %vm808_vm5, %v3489_v28  ;;  %7269 = vmatprep.mubr.msk.f32.mxu1 %vm4434_vm7, %v10231_v13  ;;  %7425 = vmatprep.mubr.msk.f32.mxu0 %vm4434_vm7, %v10231_v13  ;;  %v4953_v8 = vrot.slane %v4705_v10, 1  ;;  %v5925_v24 = vrot.slane %v5677_v19, 3 }
 0x4a8   : > { %v3777_v63 = vpop.permute.xlu0 %3776  ;;  %v10239_v37 = vsel %vm2429_vm8, %v4953_v8, %v4954_v49  ;;  %v10242_v60 = vsel %vm5904_vm0, %v5925_v24, %v5926_v31  ;;  %v3779_v50 = vpop.permute.xlu1 %3778 }
 0x4a9   : > { %3885 = vst.msk [vmem:[#allocation4 + $0x120] sm:$0xff] %vm3848_vm2, %v3777_v63  ;;  %3886 = vst.msk [vmem:[#allocation4 + $0x128] sm:$0xff] %vm3848_vm2, %v3779_v50 }
 0x4ac   : > { %v3973_v48 = vpop.permute.xlu0 %3972  ;;  %v10246_v59 = vld [vmem:[#allocation4 + $0x118] sm:$0xff]  ;;  %v3250_v17 = vpop.permute.xlu1 %3249 }
 0x4ad   : > { %4081 = vst.msk [vmem:[#allocation4 + $0x120] sm:$0xff] %vm4044_vm3, %v3973_v48  ;;  %7270 = vmatmul.mubr.msk.f32.gmra.mrb[90].mxu1 %vm4434_vm7, %v10246_v59  ;;  %7426 = vmatmul.mubr.msk.f32.gmra.mrb[140].mxu0 %vm4434_vm7, %v10246_v59 }
 0x4ae   : > { %3356 = vst.msk [vmem:[#allocation4 + $0x130] sm:$0xff] %vm588_vm4, %v3250_v17 }
 0x4b0   : > { %v3975_v51 = vpop.permute.xlu0 %3974  ;;  %v4263_v22 = vpop.permute.xlu1 %4262 }
 0x4b1   : > { %4082 = vst.msk [vmem:[#allocation4 + $0x128] sm:$0xff] %vm4044_vm3, %v3975_v51 }
 0x4b2   : > { %4371 = vst.msk [vmem:[#allocation4 + $0x120] sm:$0xff] %vm4334_vm6, %v4263_v22 }
 0x4b4   : > { %v3252_v32 = vpop.permute.xlu0 %3251  ;;  %v3491_v54 = vpop.permute.xlu1 %3490 }
 0x4b5   : > { %3357 = vst.msk [vmem:[#allocation4 + $0x138] sm:$0xff] %vm588_vm4, %v3252_v32 }
 0x4b6   : > { %3597 = vst.msk [vmem:[#allocation4 + $0x130] sm:$0xff] %vm808_vm5, %v3491_v54 }
 0x4b7   : > { %v7241_v57 = vpop.f32.mrb[70].mxu1  ;;  %v7397_v2 = vpop.f32.mrb[120].mxu0 }
 0x4b8   : > { %v4265_v23 = vpop.permute.xlu0 %4264  ;;  %v3493_v25 = vpop.permute.xlu1 %3492  ;;  %v4958_v48 = vrot.slane %v7241_v57, 1  ;;  %v5930_v17 = vrot.slane %v7397_v2, 3 }
 0x4b9   : > { %4372 = vst.msk [vmem:[#allocation4 + $0x128] sm:$0xff] %vm4334_vm6, %v4265_v23  ;;  %v10259_v7 = vld [vmem:[#allocation4 + $0x120] sm:$0xff]  ;;  %v4715_v27 = vpop.f32.mrb[71].mxu1  ;;  %v5687_v21 = vpop.f32.mrb[121].mxu0 }
 0x4ba   : > { %3598 = vst.msk [vmem:[#allocation4 + $0x138] sm:$0xff] %vm808_vm5, %v3493_v25  ;;  %7272 = vmatprep.mubr.msk.f32.mxu1 %vm4434_vm7, %v10259_v7  ;;  %7428 = vmatprep.mubr.msk.f32.mxu0 %vm4434_vm7, %v10259_v7  ;;  %v4956_v6 = vrot.slane %v4715_v27, 1  ;;  %v5928_v5 = vrot.slane %v5687_v21, 3 }
 0x4bc   : > { %v3781_v44 = vpop.permute.xlu0 %3780  ;;  %v10267_v38 = vsel %vm2429_vm8, %v4954_v49, %v4956_v6  ;;  %v10270_v0 = vsel %vm5904_vm0, %v5926_v31, %v5928_v5  ;;  %v3783_v34 = vpop.permute.xlu1 %3782 }
 0x4bd   : > { %3887 = vst.msk [vmem:[#allocation4 + $0x130] sm:$0xff] %vm3848_vm2, %v3781_v44  ;;  %3888 = vst.msk [vmem:[#allocation4 + $0x138] sm:$0xff] %vm3848_vm2, %v3783_v34 }
 0x4c0   : > { %v3977_v36 = vpop.permute.xlu0 %3976  ;;  %v10274_v45 = vld [vmem:[#allocation4 + $0x128] sm:$0xff]  ;;  %v3254_v30 = vpop.permute.xlu1 %3253 }
 0x4c1   : > { %4083 = vst.msk [vmem:[#allocation4 + $0x130] sm:$0xff] %vm4044_vm3, %v3977_v36  ;;  %7273 = vmatmul.mubr.msk.f32.gmra.mrb[92].mxu1 %vm4434_vm7, %v10274_v45  ;;  %7429 = vmatmul.mubr.msk.f32.gmra.mrb[142].mxu0 %vm4434_vm7, %v10274_v45 }
 0x4c2   : > { %3358 = vst.msk [vmem:[#allocation4 + $0x140] sm:$0xff] %vm588_vm4, %v3254_v30 }
 0x4c4   : > { %v3979_v41 = vpop.permute.xlu0 %3978  ;;  %v4267_v1 = vpop.permute.xlu1 %4266 }
 0x4c5   : > { %4084 = vst.msk [vmem:[#allocation4 + $0x138] sm:$0xff] %vm4044_vm3, %v3979_v41 }
 0x4c6   : > { %4373 = vst.msk [vmem:[#allocation4 + $0x130] sm:$0xff] %vm4334_vm6, %v4267_v1 }
 0x4c8   : > { %v3256_v33 = vpop.permute.xlu0 %3255  ;;  %v3495_v49 = vpop.permute.xlu1 %3494 }
 0x4c9   : > { %3359 = vst.msk [vmem:[#allocation4 + $0x148] sm:$0xff] %vm588_vm4, %v3256_v33 }
 0x4ca   : > { %3599 = vst.msk [vmem:[#allocation4 + $0x140] sm:$0xff] %vm808_vm5, %v3495_v49 }
 0x4cb   : > { %v7244_v28 = vpop.f32.mrb[72].mxu1  ;;  %v7400_v10 = vpop.f32.mrb[122].mxu0 }
 0x4cc   : > { %v4269_v3 = vpop.permute.xlu0 %4268  ;;  %v4961_v31 = vrot.slane %v7244_v28, 1  ;;  %v3497_v19 = vpop.permute.xlu1 %3496  ;;  %v5933_v24 = vrot.slane %v7400_v10, 3 }
 0x4cd   : > { %4374 = vst.msk [vmem:[#allocation4 + $0x138] sm:$0xff] %vm4334_vm6, %v4269_v3  ;;  %v10287_v8 = vld [vmem:[#allocation4 + $0x130] sm:$0xff]  ;;  %v4725_v63 = vpop.f32.mrb[73].mxu1  ;;  %v5697_v50 = vpop.f32.mrb[123].mxu0 }
 0x4ce   : > { %3600 = vst.msk [vmem:[#allocation4 + $0x148] sm:$0xff] %vm808_vm5, %v3497_v19  ;;  %7275 = vmatprep.mubr.msk.f32.mxu1 %vm4434_vm7, %v10287_v8  ;;  %7431 = vmatprep.mubr.msk.f32.mxu0 %vm4434_vm7, %v10287_v8  ;;  %v4959_v51 = vrot.slane %v4725_v63, 1  ;;  %v5931_v22 = vrot.slane %v5697_v50, 3 }
 0x4d0   : > { %v3785_v32 = vpop.permute.xlu0 %3784  ;;  %v10295_v54 = vsel %vm2429_vm8, %v4958_v48, %v4959_v51  ;;  %v10298_v23 = vsel %vm2429_vm8, %v4959_v51, %v4961_v31  ;;  %v10301_v25 = vsel %vm5904_vm0, %v5930_v17, %v5931_v22  ;;  %v10304_v27 = vsel %vm5904_vm0, %v5931_v22, %v5933_v24  ;;  %v3787_v21 = vpop.permute.xlu1 %3786 }
 0x4d1   : > { %3889 = vst.msk [vmem:[#allocation4 + $0x140] sm:$0xff] %vm3848_vm2, %v3785_v32  ;;  %3890 = vst.msk [vmem:[#allocation4 + $0x148] sm:$0xff] %vm3848_vm2, %v3787_v21 }
 0x4d4   : > { %v3981_v57 = vpop.permute.xlu0 %3980  ;;  %v10308_v2 = vld [vmem:[#allocation4 + $0x138] sm:$0xff]  ;;  %v3258_v6 = vpop.permute.xlu1 %3257 }
 0x4d5   : > { %4085 = vst.msk [vmem:[#allocation4 + $0x140] sm:$0xff] %vm4044_vm3, %v3981_v57  ;;  %7276 = vmatmul.mubr.msk.f32.gmra.mrb[94].mxu1 %vm4434_vm7, %v10308_v2  ;;  %7432 = vmatmul.mubr.msk.f32.gmra.mrb[144].mxu0 %vm4434_vm7, %v10308_v2 }
 0x4d6   : > { %3360 = vst.msk [vmem:[#allocation4 + $0x150] sm:$0xff] %vm588_vm4, %v3258_v6 }
 0x4d8   : > { %v3983_v5 = vpop.permute.xlu0 %3982  ;;  %v4271_v44 = vpop.permute.xlu1 %4270 }
 0x4d9   : > { %4086 = vst.msk [vmem:[#allocation4 + $0x148] sm:$0xff] %vm4044_vm3, %v3983_v5 }
 0x4da   : > { %4375 = vst.msk [vmem:[#allocation4 + $0x140] sm:$0xff] %vm4334_vm6, %v4271_v44 }
 0x4dc   : > { %v3260_v34 = vpop.permute.xlu0 %3259 }
 0x4dd   : > { %3361 = vst.msk [vmem:[#allocation4 + $0x158] sm:$0xff] %vm588_vm4, %v3260_v34  ;;  %v3499_v36 = vpop.permute.xlu1 %3498 }
 0x4de   : > { %3601 = vst.msk [vmem:[#allocation4 + $0x150] sm:$0xff] %vm808_vm5, %v3499_v36 }
 0x4df   : > { %v7247_v41 = vpop.f32.mrb[74].mxu1  ;;  %v7403_v33 = vpop.f32.mrb[124].mxu0 }
 0x4e0   : > { %v4273_v30 = vpop.permute.xlu0 %4272  ;;  %v4964_v1 = vrot.slane %v7247_v41, 1  ;;  %v5936_v28 = vrot.slane %v7403_v33, 3  ;;  %v4735_v31 = vpop.f32.mrb[75].mxu1 }
 0x4e1   : > { %4376 = vst.msk [vmem:[#allocation4 + $0x148] sm:$0xff] %vm4334_vm6, %v4273_v30  ;;  %v3501_v49 = vpop.permute.xlu1 %3500  ;;  %v10321_v3 = vld [vmem:[#allocation4 + $0x140] sm:$0xff]  ;;  %v5707_v10 = vpop.f32.mrb[125].mxu0  ;;  %v4963_v19 = vrot.slane %v4735_v31, 1 }
 0x4e2   : > { %3602 = vst.msk [vmem:[#allocation4 + $0x158] sm:$0xff] %vm808_vm5, %v3501_v49  ;;  %7278 = vmatprep.mubr.msk.f32.mxu1 %vm4434_vm7, %v10321_v3  ;;  %7434 = vmatprep.mubr.msk.f32.mxu0 %vm4434_vm7, %v10321_v3  ;;  %v5935_v24 = vrot.slane %v5707_v10, 3 }
 0x4e3   : > { %v10329_v50 = vsel %vm2429_vm8, %v4963_v19, %v4964_v1 }
 0x4e4   : > { %v3789_v63 = vpop.permute.xlu0 %3788  ;;  %v10332_v48 = vsel %vm5904_vm0, %v5935_v24, %v5936_v28 }
 0x4e5   : > { %10830 = vst [vmem:[#allocation17_spill] sm:$0xff] %v10332_v48  ;;  %3891 = vst.msk [vmem:[#allocation4 + $0x150] sm:$0xff] %vm3848_vm2, %v3789_v63  ;;  %v3791_v17 = vpop.permute.xlu1 %3790 }
 0x4e6   : > { %3892 = vst.msk [vmem:[#allocation4 + $0x158] sm:$0xff] %vm3848_vm2, %v3791_v17 }
 0x4e8   : > { %v3985_v51 = vpop.permute.xlu0 %3984  ;;  %v10336_v22 = vld [vmem:[#allocation4 + $0x148] sm:$0xff] }
 0x4e9   : > { %4087 = vst.msk [vmem:[#allocation4 + $0x150] sm:$0xff] %vm4044_vm3, %v3985_v51  ;;  %v3262_v32 = vpop.permute.xlu1 %3261  ;;  %7279 = vmatmul.mubr.msk.f32.gmra.mrb[96].mxu1 %vm4434_vm7, %v10336_v22  ;;  %7435 = vmatmul.mubr.msk.f32.gmra.mrb[146].mxu0 %vm4434_vm7, %v10336_v22 }
 0x4ea   : > { %3362 = vst.msk [vmem:[#allocation4 + $0x160] sm:$0xff] %vm588_vm4, %v3262_v32 }
 0x4ec   : > { %v3987_v21 = vpop.permute.xlu0 %3986 }
 0x4ed   : > { %4088 = vst.msk [vmem:[#allocation4 + $0x158] sm:$0xff] %vm4044_vm3, %v3987_v21  ;;  %v4275_v57 = vpop.permute.xlu1 %4274 }
 0x4ee   : > { %4377 = vst.msk [vmem:[#allocation4 + $0x150] sm:$0xff] %vm4334_vm6, %v4275_v57 }
 0x4f0   : > { %v3264_v6 = vpop.permute.xlu0 %3263 }
 0x4f1   : > { %3363 = vst.msk [vmem:[#allocation4 + $0x168] sm:$0xff] %vm588_vm4, %v3264_v6  ;;  %v3503_v5 = vpop.permute.xlu1 %3502 }
 0x4f2   : > { %3603 = vst.msk [vmem:[#allocation4 + $0x160] sm:$0xff] %vm808_vm5, %v3503_v5 }
 0x4f3   : > { %v7250_v34 = vpop.f32.mrb[76].mxu1  ;;  %v7406_v36 = vpop.f32.mrb[126].mxu0 }
 0x4f4   : > { %v4277_v44 = vpop.permute.xlu0 %4276  ;;  %v4745_v33 = vpop.f32.mrb[77].mxu1 }
 0x4f5   : > { %4378 = vst.msk [vmem:[#allocation4 + $0x158] sm:$0xff] %vm4334_vm6, %v4277_v44  ;;  %v3505_v30 = vpop.permute.xlu1 %3504  ;;  %v10349_v41 = vld [vmem:[#allocation4 + $0x150] sm:$0xff]  ;;  %v5717_v49 = vpop.f32.mrb[127].mxu0  ;;  %v4966_v31 = vrot.slane %v4745_v33, 1 }
 0x4f6   : > { %3604 = vst.msk [vmem:[#allocation4 + $0x168] sm:$0xff] %vm808_vm5, %v3505_v30  ;;  %7281 = vmatprep.mubr.msk.f32.mxu1 %vm4434_vm7, %v10349_v41  ;;  %7437 = vmatprep.mubr.msk.f32.mxu0 %vm4434_vm7, %v10349_v41  ;;  %v5938_v10 = vrot.slane %v5717_v49, 3 }
 0x4f7   : > { %v10357_v24 = vsel %vm2429_vm8, %v4964_v1, %v4966_v31 }
 0x4f8   : > { %v3793_v19 = vpop.permute.xlu0 %3792  ;;  %10831 = vst [vmem:[#allocation18_spill] sm:$0xff] %v10357_v24  ;;  %v10360_v63 = vsel %vm5904_vm0, %v5936_v28, %v5938_v10 }
 0x4f9   : > { %10832 = vst [vmem:[#allocation19_spill] sm:$0xff] %v10360_v63  ;;  %3893 = vst.msk [vmem:[#allocation4 + $0x160] sm:$0xff] %vm3848_vm2, %v3793_v19  ;;  %v3795_v17 = vpop.permute.xlu1 %3794  ;;  %v7522_v63 = vld [vmem:[#allocation4 + $0x48] sm:$0xff] }
 0x4fa   : > { %3894 = vst.msk [vmem:[#allocation4 + $0x168] sm:$0xff] %vm3848_vm2, %v3795_v17 }
 0x4fc   : > { %v3989_v51 = vpop.permute.xlu0 %3988  ;;  %v10364_v32 = vld [vmem:[#allocation4 + $0x158] sm:$0xff] }
 0x4fd   : > { %4089 = vst.msk [vmem:[#allocation4 + $0x160] sm:$0xff] %vm4044_vm3, %v3989_v51  ;;  %v3266_v21 = vpop.permute.xlu1 %3265  ;;  %7282 = vmatmul.mubr.msk.f32.gmra.mrb[98].mxu1 %vm4434_vm7, %v10364_v32  ;;  %7438 = vmatmul.mubr.msk.f32.gmra.mrb[148].mxu0 %vm4434_vm7, %v10364_v32  ;;  %v4968_v51 = vrot.slane %v7250_v34, 1 }
 0x4fe   : > { %3364 = vst.msk [vmem:[#allocation4 + $0x170] sm:$0xff] %vm588_vm4, %v3266_v21  ;;  %v5940_v21 = vrot.slane %v7406_v36, 3 }
 0x500   : > { %v3991_v1 = vpop.permute.xlu0 %3990 }
 0x501   : > { %4090 = vst.msk [vmem:[#allocation4 + $0x168] sm:$0xff] %vm4044_vm3, %v3991_v1  ;;  %v4279_v28 = vpop.permute.xlu1 %4278 }
 0x502   : > { %4379 = vst.msk [vmem:[#allocation4 + $0x160] sm:$0xff] %vm4334_vm6, %v4279_v28 }
 0x504   : > { %v3268_v57 = vpop.permute.xlu0 %3267 }
 0x505   : > { %3365 = vst.msk [vmem:[#allocation4 + $0x178] sm:$0xff] %vm588_vm4, %v3268_v57  ;;  %v3507_v6 = vpop.permute.xlu1 %3506  ;;  %vm5402_vm4 = vcmask 1045504  }
 0x506   : > { %3605 = vst.msk [vmem:[#allocation4 + $0x170] sm:$0xff] %vm808_vm5, %v3507_v6 }
 0x507   : > { %v7253_v44 = vpop.f32.mrb[78].mxu1  ;;  %v7409_v33 = vpop.f32.mrb[128].mxu0 }
 0x508   : > { %v4281_v5 = vpop.permute.xlu0 %4280  ;;  %v4971_v30 = vrot.slane %v7253_v44, 1  ;;  %v5943_v10 = vrot.slane %v7409_v33, 3  ;;  %v4755_v19 = vpop.f32.mrb[79].mxu1 }
 0x509   : > { %4380 = vst.msk [vmem:[#allocation4 + $0x168] sm:$0xff] %vm4334_vm6, %v4281_v5  ;;  %v3509_v49 = vpop.permute.xlu1 %3508  ;;  %v10377_v31 = vld [vmem:[#allocation4 + $0x160] sm:$0xff]  ;;  %v5727_v17 = vpop.f32.mrb[129].mxu0  ;;  %v4969_v1 = vrot.slane %v4755_v19, 1 }
 0x50a   : > { %3606 = vst.msk [vmem:[#allocation4 + $0x178] sm:$0xff] %vm808_vm5, %v3509_v49  ;;  %7284 = vmatprep.mubr.msk.f32.mxu1 %vm4434_vm7, %v10377_v31  ;;  %7440 = vmatprep.mubr.msk.f32.mxu0 %vm4434_vm7, %v10377_v31  ;;  %v5941_v28 = vrot.slane %v5727_v17, 3 }
 0x50b   : > { %v10385_v6 = vsel %vm2429_vm8, %v4968_v51, %v4969_v1  ;;  %v10388_v5 = vsel %vm2429_vm8, %v4969_v1, %v4971_v30 }
 0x50c   : > { %v3797_v57 = vpop.permute.xlu0 %3796  ;;  %10833 = vst [vmem:[#allocation20_spill] sm:$0xff] %v10385_v6  ;;  %10834 = vst [vmem:[#allocation21_spill] sm:$0xff] %v10388_v5  ;;  %v10391_v44 = vsel %vm5904_vm0, %v5940_v21, %v5941_v28  ;;  %v10394_v33 = vsel %vm5904_vm0, %v5941_v28, %v5943_v10  ;;  %v7518_v5 = vld [vmem:[#allocation4 + $0x28] sm:$0xff] }
 0x50d   : > { %10835 = vst [vmem:[#allocation22_spill] sm:$0xff] %v10391_v44  ;;  %10836 = vst [vmem:[#allocation23_spill] sm:$0xff] %v10394_v33  ;;  %v3799_v49 = vpop.permute.xlu1 %3798  ;;  %v7514_v33 = vld [vmem:[#allocation4 + $0x8] sm:$0xff]  ;;  %v7517_v44 = vld [vmem:[#allocation4 + $0x20] sm:$0xff] }
 0x50e   : > { %3895 = vst.msk [vmem:[#allocation4 + $0x170] sm:$0xff] %vm3848_vm2, %v3797_v57  ;;  %3896 = vst.msk [vmem:[#allocation4 + $0x178] sm:$0xff] %vm3848_vm2, %v3799_v49 }
 0x510   : > { %v3993_v34 = vpop.permute.xlu0 %3992  ;;  %v10398_v36 = vld [vmem:[#allocation4 + $0x168] sm:$0xff] }
 0x511   : > { %4091 = vst.msk [vmem:[#allocation4 + $0x170] sm:$0xff] %vm4044_vm3, %v3993_v34  ;;  %v3995_v19 = vpop.permute.xlu1 %3994  ;;  %7285 = vmatmul.mubr.msk.f32.gmra.mrb[100].mxu1 %vm4434_vm7, %v10398_v36  ;;  %7441 = vmatmul.mubr.msk.f32.gmra.mrb[150].mxu0 %vm4434_vm7, %v10398_v36 }
 0x512   : > { %4092 = vst.msk [vmem:[#allocation4 + $0x178] sm:$0xff] %vm4044_vm3, %v3995_v19 }
 0x514   : > { %v4283_v30 = vpop.permute.xlu0 %4282 }
 0x515   : > { %4381 = vst.msk [vmem:[#allocation4 + $0x170] sm:$0xff] %vm4334_vm6, %v4283_v30  ;;  %v4285_v10 = vpop.permute.xlu1 %4284 }
 0x516   : > { %4382 = vst.msk [vmem:[#allocation4 + $0x178] sm:$0xff] %vm4334_vm6, %v4285_v10  ;;  %v7513_v10 = vld [vmem:[#allocation4] sm:$0xff] }
 0x51b   : > { %v7256_v17 = vpop.f32.mrb[80].mxu1  ;;  %v7412_v51 = vpop.f32.mrb[130].mxu0 }
 0x51c   : > { %v10408_v21 = vld [vmem:[#allocation4 + $0x170] sm:$0xff]  ;;  %v4974_v1 = vrot.slane %v7256_v17, 1  ;;  %v5946_v28 = vrot.slane %v7412_v51, 3  ;;  %v4765_v57 = vpop.f32.mrb[81].mxu1  ;;  %v5737_v49 = vpop.f32.mrb[131].mxu0 }
 0x51d   : > { %7287 = vmatprep.mubr.msk.f32.mxu1 %vm4434_vm7, %v10408_v21  ;;  %7443 = vmatprep.mubr.msk.f32.mxu0 %vm4434_vm7, %v10408_v21  ;;  %v10414_v34 = vld [vmem:[#allocation4 + $0x178] sm:$0xff]  ;;  %v4973_v19 = vrot.slane %v4765_v57, 1  ;;  %v5945_v30 = vrot.slane %v5737_v49, 3  ;;  %v7515_v57 = vld [vmem:[#allocation4 + $0x10] sm:$0xff] }
 0x51e   : > { %7288 = vmatmul.mubr.msk.f32.gmra.mrb[102].mxu1 %vm4434_vm7, %v10414_v34  ;;  %7444 = vmatmul.mubr.msk.f32.gmra.mrb[152].mxu0 %vm4434_vm7, %v10414_v34  ;;  %v7516_v49 = vld [vmem:[#allocation4 + $0x18] sm:$0xff] }
 0x51f   : > { %7296 = vmatprep.mubr.msk.f32.mxu1 %vm4434_vm7, %v7513_v10  ;;  %v10422_v17 = vsel %vm2429_vm8, %v4973_v19, %v4974_v1  ;;  %v10425_v51 = vsel %vm5904_vm0, %v5945_v30, %v5946_v28  ;;  %v7519_v19 = vld [vmem:[#allocation4 + $0x30] sm:$0xff]  ;;  %v7520_v30 = vld [vmem:[#allocation4 + $0x38] sm:$0xff]  ;;  %v7521_v10 = vld [vmem:[#allocation4 + $0x40] sm:$0xff] }
 0x520   : > { %10837 = vst [vmem:[#allocation24_spill] sm:$0xff] %v10422_v17  ;;  %10838 = vst [vmem:[#allocation25_spill] sm:$0xff] %v10425_v51 }
 0x522   : > { %7297 = vmatmul.mubr.msk.f32.vlgmr.msra.gmra.mrb[104].mxu1 %vm4434_vm7, %v7514_v33 }
 0x523   : > { %7299 = vmatprep.mubr.msk.f32.mxu1 %vm4434_vm7, %v7515_v57 }
 0x526   : > { %7300 = vmatmul.mubr.msk.f32.gmra.mrb[106].mxu1 %vm4434_vm7, %v7516_v49 }
 0x527   : > { %7302 = vmatprep.mubr.msk.f32.mxu1 %vm4434_vm7, %v7517_v44  ;;  %v7523_v44 = vld [vmem:[#allocation4 + $0x50] sm:$0xff] }
 0x52a   : > { %7303 = vmatmul.mubr.msk.f32.gmra.mrb[108].mxu1 %vm4434_vm7, %v7518_v5 }
 0x52b   : > { %7305 = vmatprep.mubr.msk.f32.mxu1 %vm4434_vm7, %v7519_v19 }
 0x52e   : > { %7306 = vmatmul.mubr.msk.f32.gmra.mrb[110].mxu1 %vm4434_vm7, %v7520_v30  ;;  %v7524_v30 = vld [vmem:[#allocation4 + $0x58] sm:$0xff] }
 0x52f   : > { %7308 = vmatprep.mubr.msk.f32.mxu1 %vm4434_vm7, %v7521_v10  ;;  %v7525_v10 = vld [vmem:[#allocation4 + $0x60] sm:$0xff] }
 0x530   : > { %v7259_v33 = vpop.f32.mrb[82].mxu1  ;;  %v7415_v57 = vpop.f32.mrb[132].mxu0 }
 0x531   : > { %v4775_v51 = vpop.f32.mrb[83].mxu1  ;;  %v5747_v17 = vpop.f32.mrb[133].mxu0 }
 0x532   : > { %v4976_v49 = vrot.slane %v4775_v51, 1  ;;  %v5948_v6 = vrot.slane %v5747_v17, 3  ;;  %7309 = vmatmul.mubr.msk.f32.gmra.mrb[112].mxu1 %vm4434_vm7, %v7522_v63  ;;  %v7526_v51 = vld [vmem:[#allocation4 + $0x68] sm:$0xff]  ;;  %v7527_v17 = vld [vmem:[#allocation4 + $0x70] sm:$0xff]  ;;  %v7528_v63 = vld [vmem:[#allocation4 + $0x78] sm:$0xff] }
 0x533   : > { %7311 = vmatprep.mubr.msk.f32.mxu1 %vm4434_vm7, %v7523_v44 }
 0x534   : > { %v10438_v5 = vsel %vm2429_vm8, %v4974_v1, %v4976_v49  ;;  %v10441_v19 = vsel %vm5904_vm0, %v5946_v28, %v5948_v6  ;;  %v7529_v1 = vld [vmem:[#allocation4 + $0x80] sm:$0xff]  ;;  %v7530_v6 = vld [vmem:[#allocation4 + $0x88] sm:$0xff]  ;;  %v7531_v28 = vld [vmem:[#allocation4 + $0x90] sm:$0xff] }
 0x535   : > { %10839 = vst [vmem:[#allocation26_spill] sm:$0xff] %v10438_v5  ;;  %10840 = vst [vmem:[#allocation27_spill] sm:$0xff] %v10441_v19  ;;  %v4978_v5 = vrot.slane %v7259_v33, 1 }
 0x536   : > { %7312 = vmatmul.mubr.msk.f32.gmra.mrb[114].mxu1 %vm4434_vm7, %v7524_v30 }
 0x537   : > { %7314 = vmatprep.mubr.msk.f32.mxu1 %vm4434_vm7, %v7525_v10 }
 0x53a   : > { %7315 = vmatmul.mubr.msk.f32.gmra.mrb[116].mxu1 %vm4434_vm7, %v7526_v51 }
 0x53b   : > { %7317 = vmatprep.mubr.msk.f32.mxu1 %vm4434_vm7, %v7527_v17  ;;  %v5950_v17 = vrot.slane %v7415_v57, 3  ;;  %v7534_v57 = vld [vmem:[#allocation4 + $0xa8] sm:$0xff] }
 0x53e   : > { %7318 = vmatmul.mubr.msk.f32.gmra.mrb[118].mxu1 %vm4434_vm7, %v7528_v63  ;;  %v7532_v63 = vld [vmem:[#allocation4 + $0x98] sm:$0xff] }
 0x53f   : > { %7320 = vmatprep.mubr.msk.f32.mxu1 %vm4434_vm7, %v7529_v1  ;;  %v7533_v1 = vld [vmem:[#allocation4 + $0xa0] sm:$0xff] }
 0x542   : > { %7321 = vmatmul.mubr.msk.f32.gmra.mrb[120].mxu1 %vm4434_vm7, %v7530_v6 }
 0x543   : > { %7323 = vmatprep.mubr.msk.f32.mxu1 %vm4434_vm7, %v7531_v28 }
 0x544   : > { %v7262_v49 = vpop.f32.mrb[84].mxu1  ;;  %v7418_v44 = vpop.f32.mrb[134].mxu0 }
 0x545   : > { %v4981_v30 = vrot.slane %v7262_v49, 1  ;;  %v5953_v10 = vrot.slane %v7418_v44, 3  ;;  %v4785_v51 = vpop.f32.mrb[85].mxu1  ;;  %v5757_v19 = vpop.f32.mrb[135].mxu0  ;;  %v7536_v44 = vld [vmem:[#allocation4 + $0xb8] sm:$0xff] }
 0x546   : > { %v4979_v24 = vrot.slane %v4785_v51, 1  ;;  %v5951_v48 = vrot.slane %v5757_v19, 3  ;;  %7324 = vmatmul.mubr.msk.f32.gmra.mrb[122].mxu1 %vm4434_vm7, %v7532_v63  ;;  %v7535_v19 = vld [vmem:[#allocation4 + $0xb0] sm:$0xff] }
 0x547   : > { %7326 = vmatprep.mubr.msk.f32.mxu1 %vm4434_vm7, %v7533_v1 }
 0x548   : > { %v10454_v6 = vsel %vm2429_vm8, %v4978_v5, %v4979_v24  ;;  %v10457_v28 = vsel %vm2429_vm8, %v4979_v24, %v4981_v30  ;;  %v10460_v49 = vsel %vm5904_vm0, %v5950_v17, %v5951_v48  ;;  %v10463_v33 = vsel %vm5904_vm0, %v5951_v48, %v5953_v10  ;;  %v7537_v5 = vld [vmem:[#allocation4 + $0xc0] sm:$0xff] }
 0x54a   : > { %7327 = vmatmul.mubr.msk.f32.gmra.mrb[124].mxu1 %vm4434_vm7, %v7534_v57 }
 0x54b   : > { %7329 = vmatprep.mubr.msk.f32.mxu1 %vm4434_vm7, %v7535_v19 }
 0x54e   : > { %7330 = vmatmul.mubr.msk.f32.gmra.mrb[126].mxu1 %vm4434_vm7, %v7536_v44 }
 0x54f   : > { %7332 = vmatprep.mubr.msk.f32.mxu1 %vm4434_vm7, %v7537_v5 }
 0x552   : > { %7333 = vmatmul.mubr.msk.f32.gmra.mrb[128].mxu1 %vm4434_vm7, %v9973_v42 }
 0x553   : > { %7335 = vmatprep.mubr.msk.f32.mxu1 %vm4434_vm7, %v10000_v18 }
 0x556   : > { %7336 = vmatmul.mubr.msk.f32.gmra.mrb[130].mxu1 %vm4434_vm7, %v10033_v9 }
 0x557   : > { %7338 = vmatprep.mubr.msk.f32.mxu1 %vm4434_vm7, %v10065_v4 }
 0x558   : > { %v7265_v48 = vpop.f32.mrb[86].mxu1  ;;  %v7421_v24 = vpop.f32.mrb[136].mxu0 }
 0x559   : > { %v4984_v30 = vrot.slane %v7265_v48, 1  ;;  %v5956_v10 = vrot.slane %v7421_v24, 3  ;;  %v4795_v51 = vpop.f32.mrb[87].mxu1  ;;  %v5767_v17 = vpop.f32.mrb[137].mxu0 }
 0x55a   : > { %v4983_v63 = vrot.slane %v4795_v51, 1  ;;  %v5955_v1 = vrot.slane %v5767_v17, 3  ;;  %7339 = vmatmul.mubr.msk.f32.gmra.mrb[132].mxu1 %vm4434_vm7, %v10095_v35 }
 0x55b   : > { %7341 = vmatprep.mubr.msk.f32.mxu1 %vm4434_vm7, %v10129_v39 }
 0x55c   : > { %v10482_v42 = vsel %vm2429_vm8, %v4983_v63, %v4984_v30  ;;  %v10485_v18 = vsel %vm5904_vm0, %v5955_v1, %v5956_v10 }
 0x55e   : > { %7342 = vmatmul.mubr.msk.f32.gmra.mrb[134].mxu1 %vm4434_vm7, %v10157_v56 }
 0x55f   : > { %7344 = vmatprep.mubr.msk.f32.mxu1 %vm4434_vm7, %v10180_v12 }
 0x562   : > { %7345 = vmatmul.mubr.msk.f32.gmra.mrb[136].mxu1 %vm4434_vm7, %v10209_v47 }
 0x563   : > { %7347 = vmatprep.mubr.msk.f32.mxu1 %vm4434_vm7, %v10231_v13 }
 0x566   : > { %7348 = vmatmul.mubr.msk.f32.gmra.mrb[138].mxu1 %vm4434_vm7, %v10246_v59 }
 0x567   : > { %7350 = vmatprep.mubr.msk.f32.mxu1 %vm4434_vm7, %v10259_v7 }
 0x56a   : > { %7351 = vmatmul.mubr.msk.f32.gmra.mrb[140].mxu1 %vm4434_vm7, %v10274_v45 }
 0x56b   : > { %7353 = vmatprep.mubr.msk.f32.mxu1 %vm4434_vm7, %v10287_v8 }
 0x56c   : > { %v7268_v9 = vpop.f32.mrb[88].mxu1  ;;  %v7424_v4 = vpop.f32.mrb[138].mxu0 }
 0x56d   : > { %v4805_v35 = vpop.f32.mrb[89].mxu1  ;;  %v5777_v39 = vpop.f32.mrb[139].mxu0 }
 0x56e   : > { %v4986_v56 = vrot.slane %v4805_v35, 1  ;;  %v5958_v12 = vrot.slane %v5777_v39, 3  ;;  %7354 = vmatmul.mubr.msk.f32.gmra.mrb[142].mxu1 %vm4434_vm7, %v10308_v2 }
 0x56f   : > { %7356 = vmatprep.mubr.msk.f32.mxu1 %vm4434_vm7, %v10321_v3 }
 0x570   : > { %v10508_v47 = vsel %vm2429_vm8, %v4984_v30, %v4986_v56  ;;  %v10511_v13 = vsel %vm5904_vm0, %v5956_v10, %v5958_v12 }
 0x572   : > { %7357 = vmatmul.mubr.msk.f32.gmra.mrb[144].mxu1 %vm4434_vm7, %v10336_v22  ;;  %v4988_v22 = vrot.slane %v7268_v9, 1 }
 0x573   : > { %7359 = vmatprep.mubr.msk.f32.mxu1 %vm4434_vm7, %v10349_v41  ;;  %v5960_v41 = vrot.slane %v7424_v4, 3 }
 0x576   : > { %7360 = vmatmul.mubr.msk.f32.gmra.mrb[146].mxu1 %vm4434_vm7, %v10364_v32 }
 0x577   : > { %7362 = vmatprep.mubr.msk.f32.mxu1 %vm4434_vm7, %v10377_v31 }
 0x57a   : > { %7363 = vmatmul.mubr.msk.f32.gmra.mrb[148].mxu1 %vm4434_vm7, %v10398_v36 }
 0x57b   : > { %7365 = vmatprep.mubr.msk.f32.mxu1 %vm4434_vm7, %v10408_v21 }
 0x57e   : > { %7366 = vmatmul.mubr.msk.f32.gmra.mrb[150].mxu1 %vm4434_vm7, %v10414_v34 }
 0x580   : > { %v7271_v59 = vpop.f32.mrb[90].mxu1  ;;  %v7427_v7 = vpop.f32.mrb[140].mxu0 }
 0x581   : > { %v4991_v45 = vrot.slane %v7271_v59, 1  ;;  %v5963_v8 = vrot.slane %v7427_v7, 3  ;;  %v4815_v2 = vpop.f32.mrb[91].mxu1  ;;  %v5787_v3 = vpop.f32.mrb[141].mxu0 }
 0x582   : > { %v4989_v32 = vrot.slane %v4815_v2, 1  ;;  %v5961_v57 = vrot.slane %v5787_v3, 3 }
 0x584   : > { %v10528_v31 = vsel %vm2429_vm8, %v4988_v22, %v4989_v32  ;;  %v10531_v36 = vsel %vm2429_vm8, %v4989_v32, %v4991_v45  ;;  %v10534_v21 = vsel %vm5904_vm0, %v5960_v41, %v5961_v57  ;;  %v10537_v34 = vsel %vm5904_vm0, %v5961_v57, %v5963_v8 }
 0x594   : > { %v7274_v19 = vpop.f32.mrb[92].mxu1  ;;  %v7430_v44 = vpop.f32.mrb[142].mxu0 }
 0x595   : > { %v4994_v5 = vrot.slane %v7274_v19, 1  ;;  %v5966_v48 = vrot.slane %v7430_v44, 3  ;;  %v4825_v24 = vpop.f32.mrb[93].mxu1  ;;  %v5797_v30 = vpop.f32.mrb[143].mxu0 }
 0x596   : > { %v4993_v10 = vrot.slane %v4825_v24, 1  ;;  %v5965_v51 = vrot.slane %v5797_v30, 3 }
 0x598   : > { %v10540_v17 = vsel %vm2429_vm8, %v4993_v10, %v4994_v5  ;;  %v10543_v63 = vsel %vm5904_vm0, %v5965_v51, %v5966_v48 }
 0x5a8   : > { %v7277_v1 = vpop.f32.mrb[94].mxu1  ;;  %v7433_v9 = vpop.f32.mrb[144].mxu0 }
 0x5a9   : > { %v4835_v4 = vpop.f32.mrb[95].mxu1  ;;  %v5807_v35 = vpop.f32.mrb[145].mxu0  ;;  %v4998_v41 = vrot.slane %v7277_v1, 1  ;;  %v5970_v32 = vrot.slane %v7433_v9, 3 }
 0x5aa   : > { %v4996_v39 = vrot.slane %v4835_v4, 1  ;;  %v5968_v56 = vrot.slane %v5807_v35, 3 }
 0x5ac   : > { %v10546_v12 = vsel %vm2429_vm8, %v4994_v5, %v4996_v39  ;;  %v10549_v59 = vsel %vm5904_vm0, %v5966_v48, %v5968_v56 }
 0x5bc   : > { %v7280_v7 = vpop.f32.mrb[96].mxu1  ;;  %v7436_v45 = vpop.f32.mrb[146].mxu0 }
 0x5bd   : > { %v5001_v8 = vrot.slane %v7280_v7, 1  ;;  %v5973_v2 = vrot.slane %v7436_v45, 3  ;;  %v4845_v3 = vpop.f32.mrb[97].mxu1  ;;  %v5817_v22 = vpop.f32.mrb[147].mxu0 }
 0x5be   : > { %v4999_v57 = vrot.slane %v4845_v3, 1  ;;  %v5971_v19 = vrot.slane %v5817_v22, 3 }
 0x5c0   : > { %v10552_v44 = vsel %vm2429_vm8, %v4998_v41, %v4999_v57  ;;  %v10555_v24 = vsel %vm2429_vm8, %v4999_v57, %v5001_v8  ;;  %v10558_v5 = vsel %vm5904_vm0, %v5970_v32, %v5971_v19  ;;  %v10561_v48 = vsel %vm5904_vm0, %v5971_v19, %v5973_v2 }
 0x5c1   : > { %10841 = vst [vmem:[#allocation28_spill] sm:$0xff] %v10558_v5  ;;  %10842 = vst [vmem:[#allocation29_spill] sm:$0xff] %v10561_v48 }
 0x5d0   : > { %v7283_v30 = vpop.f32.mrb[98].mxu1  ;;  %v7439_v10 = vpop.f32.mrb[148].mxu0 }
 0x5d1   : > { %v5004_v51 = vrot.slane %v7283_v30, 1  ;;  %v5976_v4 = vrot.slane %v7439_v10, 3  ;;  %v4855_v1 = vpop.f32.mrb[99].mxu1  ;;  %v5827_v9 = vpop.f32.mrb[149].mxu0 }
 0x5d2   : > { %v5003_v35 = vrot.slane %v4855_v1, 1  ;;  %v5975_v39 = vrot.slane %v5827_v9, 3 }
 0x5d4   : > { %v10564_v56 = vsel %vm2429_vm8, %v5003_v35, %v5004_v51  ;;  %v10567_v7 = vsel %vm5904_vm0, %v5975_v39, %v5976_v4 }
 0x5d5   : > { %10843 = vst [vmem:[#allocation30_spill] sm:$0xff] %v10564_v56  ;;  %10844 = vst [vmem:[#allocation31_spill] sm:$0xff] %v10567_v7 }
 0x5e4   : > { %v7286_v45 = vpop.f32.mrb[100].mxu1  ;;  %v7442_v8 = vpop.f32.mrb[150].mxu0 }
 0x5e5   : > { %v4865_v3 = vpop.f32.mrb[101].mxu1  ;;  %v5837_v22 = vpop.f32.mrb[151].mxu0  ;;  %v5008_v39 = vrot.slane %v7286_v45, 1  ;;  %v5980_v7 = vrot.slane %v7442_v8, 3 }
 0x5e6   : > { %v5006_v2 = vrot.slane %v4865_v3, 1  ;;  %v5978_v41 = vrot.slane %v5837_v22, 3 }
 0x5e8   : > { %v10570_v32 = vsel %vm2429_vm8, %v5004_v51, %v5006_v2  ;;  %v10573_v57 = vsel %vm5904_vm0, %v5976_v4, %v5978_v41 }
 0x5f1   : > { %v7289_v19 = vpop.f32.mrb[102].mxu1  ;;  %v7445_v30 = vpop.f32.mrb[152].mxu0 }
 0x5f2   : > { %v5011_v10 = vrot.slane %v7289_v19, 1  ;;  %v5983_v1 = vrot.slane %v7445_v30, 3  ;;  %v4875_v9 = vpop.f32.mrb[103].mxu1  ;;  %v5847_v35 = vpop.f32.mrb[153].mxu0 }
 0x5f3   : > { %v5009_v56 = vrot.slane %v4875_v9, 1  ;;  %v5981_v48 = vrot.slane %v5847_v35, 3 }
 0x5f5   : > { %v10576_v5 = vsel %vm2429_vm8, %v5008_v39, %v5009_v56  ;;  %v10579_v3 = vsel %vm2429_vm8, %v5009_v56, %v5011_v10  ;;  %v10582_v51 = vsel %vm5904_vm0, %v5980_v7, %v5981_v48  ;;  %v10585_v4 = vsel %vm5904_vm0, %v5981_v48, %v5983_v1  ;;  %v7298_v22 = vpop.f32.mrb[104].mxu1  ;;  %v10592_v56 = vld [vmem:[%s10797_s4] ss:$0 sm:$0xff] }
 0x5f6   : > { %10845 = vst [vmem:[#allocation32_spill] sm:$0xff] %v10585_v4  ;;  %v5404_v2 = vrot.slane %v7298_v22, 2  ;;  %v5115_v41 = vpop.f32.mrb[105].mxu1  ;;  %vm6184_vm8 = vcmask 64512  }
 0x5f7   : > { %v5403_v45 = vrot.slane %v5115_v41, 2 }
 0x5f9   : > { %v5405_v8 = vsel %vm5402_vm4, %v5403_v45, %v5404_v2  ;;  %v7301_v19 = vpop.f32.mrb[106].mxu1 }
 0x5fa   : > { %v5515_v30 = vadd.f32 %v5405_v8, %v9902_v14  ;;  %v5125_v9 = vpop.f32.mrb[107].mxu1  ;;  %v5408_v14 = vrot.slane %v7301_v19, 2 }
 0x5fb   : > { %v5406_v7 = vrot.slane %v5125_v9, 2 }
 0x5fc   : > { %v6017_v48 = vadd.f32 %v9907_v55, %v5515_v30 }
 0x5fd   : > { %v5407_v10 = vsel %vm5402_vm4, %v5404_v2, %v5406_v7  ;;  %v7304_v1 = vpop.f32.mrb[108].mxu1 }
 0x5fe   : > { %v6056_v35 = vadd.f32 %v10592_v56, %v6017_v48  ;;  %v5516_v39 = vadd.f32 %v5407_v10, %v9960_v11  ;;  %v5411_v22 = vrot.slane %v7304_v1, 2  ;;  %v5135_v41 = vpop.f32.mrb[109].mxu1 }
 0x5ff   : > { %v5409_v45 = vrot.slane %v5135_v41, 2 }
 0x600   : > { %vm6088_vm5 = vcmp.ge.f32.partialorder %v6056_v35, 0.0  ;;  %v6120_v8 = vmul.f32 0.2, %v6056_v35  ;;  %v6018_v4 = vadd.f32 %v9965_v15, %v5516_v39 }
 0x601   : > { %v5410_v9 = vsel %vm5402_vm4, %v5408_v14, %v5409_v45  ;;  %v5412_v55 = vsel %vm5402_vm4, %v5409_v45, %v5411_v22  ;;  %v7307_v2 = vpop.f32.mrb[110].mxu1 }
 0x602   : > { %v6152_v30 = vsel %vm6088_vm5, %v6056_v35, %v6120_v8  ;;  %v6057_v7 = vadd.f32 %v10592_v56, %v6018_v4  ;;  %v5517_v11 = vadd.f32 %v5410_v9, %v10016_v43  ;;  %v5518_v48 = vadd.f32 %v5412_v55, %v10019_v53  ;;  %v5145_v19 = vpop.f32.mrb[111].mxu1 }
 0x603   : > { %6185 = vst.msk [vmem:[%s7622_s26] sm:$0xff] %vm6184_vm8, %v6152_v30  ;;  %v5414_v10 = vrot.slane %v7307_v2, 2  ;;  %v5413_v1 = vrot.slane %v5145_v19, 2 }
 0x604   : > { %vm6089_vm9 = vcmp.ge.f32.partialorder %v6057_v7, 0.0  ;;  %v6121_v15 = vmul.f32 0.2, %v6057_v7  ;;  %v6019_v39 = vadd.f32 %v10022_v29, %v5517_v11  ;;  %v6020_v22 = vadd.f32 %v10025_v26, %v5518_v48 }
 0x605   : > { %v5415_v35 = vsel %vm5402_vm4, %v5413_v1, %v5414_v10  ;;  %v7310_v41 = vpop.f32.mrb[112].mxu1 }
 0x606   : > { %v6153_v4 = vsel %vm6089_vm9, %v6057_v7, %v6121_v15  ;;  %v6058_v43 = vadd.f32 %v10592_v56, %v6019_v39  ;;  %v6059_v53 = vadd.f32 %v10592_v56, %v6020_v22  ;;  %v5519_v14 = vadd.f32 %v5415_v35, %v10082_v62  ;;  %v5155_v45 = vpop.f32.mrb[113].mxu1 }
 0x607   : > { %6186 = vst.msk [vmem:[%s7622_s26 + $0x8] sm:$0xff] %vm6184_vm8, %v6153_v4  ;;  %v5416_v8 = vrot.slane %v5155_v45, 2  ;;  %v5418_v1 = vrot.slane %v7310_v41, 2 }
 0x608   : > { %vm6090_vm10 = vcmp.ge.f32.partialorder %v6058_v43, 0.0  ;;  %vm6091_vm11 = vcmp.ge.f32.partialorder %v6059_v53, 0.0  ;;  %v6122_v29 = vmul.f32 0.2, %v6058_v43  ;;  %v6123_v26 = vmul.f32 0.2, %v6059_v53 }
 0x609   : > { %v6021_v9 = vadd.f32 %v10087_v52, %v5519_v14  ;;  %v5417_v55 = vsel %vm5402_vm4, %v5414_v10, %v5416_v8  ;;  %v7313_v2 = vpop.f32.mrb[114].mxu1 }
 0x60a   : > { %v6154_v30 = vsel %vm6090_vm10, %v6058_v43, %v6122_v29  ;;  %v6155_v7 = vsel %vm6091_vm11, %v6059_v53, %v6123_v26  ;;  %v5520_v11 = vadd.f32 %v5417_v55, %v10145_v58  ;;  %v5421_v62 = vrot.slane %v7313_v2, 2  ;;  %v5165_v48 = vpop.f32.mrb[115].mxu1 }
 0x60b   : > { %6187 = vst.msk [vmem:[%s7622_s26 + $0x10] sm:$0xff] %vm6184_vm8, %v6154_v30  ;;  %6188 = vst.msk [vmem:[%s7622_s26 + $0x18] sm:$0xff] %vm6184_vm8, %v6155_v7  ;;  %v6060_v19 = vadd.f32 %v10592_v56, %v6021_v9  ;;  %v5419_v15 = vrot.slane %v5165_v48, 2 }
 0x60c   : > { %v6022_v52 = vadd.f32 %v10150_v16, %v5520_v11 }
 0x60d   : > { %vm6092_vm12 = vcmp.ge.f32.partialorder %v6060_v19, 0.0  ;;  %v6124_v10 = vmul.f32 0.2, %v6060_v19  ;;  %v5420_v39 = vsel %vm5402_vm4, %v5418_v1, %v5419_v15  ;;  %v5422_v22 = vsel %vm5402_vm4, %v5419_v15, %v5421_v62  ;;  %v7316_v58 = vpop.f32.mrb[116].mxu1 }
 0x60e   : > { %v6061_v35 = vadd.f32 %v10592_v56, %v6022_v52  ;;  %v5521_v4 = vadd.f32 %v5420_v39, %v10194_v46  ;;  %v5522_v43 = vadd.f32 %v5422_v22, %v10197_v61  ;;  %v5424_v53 = vrot.slane %v7316_v58, 2  ;;  %v5175_v14 = vpop.f32.mrb[117].mxu1 }
 0x60f   : > { %v6156_v41 = vsel %vm6092_vm12, %v6060_v19, %v6124_v10  ;;  %v5423_v45 = vrot.slane %v5175_v14, 2 }
 0x610   : > { %6189 = vst.msk [vmem:[%s7622_s26 + $0x20] sm:$0xff] %vm6184_vm8, %v6156_v41  ;;  %vm6093_vm13 = vcmp.ge.f32.partialorder %v6061_v35, 0.0  ;;  %v6125_v16 = vmul.f32 0.2, %v6061_v35  ;;  %v6023_v8 = vadd.f32 %v10200_v40, %v5521_v4  ;;  %v6024_v29 = vadd.f32 %v10203_v20, %v5522_v43 }
 0x611   : > { %v5425_v26 = vsel %vm5402_vm4, %v5423_v45, %v5424_v53  ;;  %v7319_v9 = vpop.f32.mrb[118].mxu1 }
 0x612   : > { %v6157_v55 = vsel %vm6093_vm13, %v6061_v35, %v6125_v16  ;;  %v6062_v46 = vadd.f32 %v10592_v56, %v6023_v8  ;;  %v6063_v61 = vadd.f32 %v10592_v56, %v6024_v29  ;;  %v5523_v2 = vadd.f32 %v5425_v26, %v10239_v37  ;;  %v5185_v30 = vpop.f32.mrb[119].mxu1 }
 0x613   : > { %6190 = vst.msk [vmem:[%s7622_s26 + $0x28] sm:$0xff] %vm6184_vm8, %v6157_v55  ;;  %v5426_v7 = vrot.slane %v5185_v30, 2  ;;  %v5428_v39 = vrot.slane %v7319_v9, 2 }
 0x614   : > { %vm6094_vm14 = vcmp.ge.f32.partialorder %v6062_v46, 0.0  ;;  %vm6095_vm15 = vcmp.ge.f32.partialorder %v6063_v61, 0.0  ;;  %v6126_v40 = vmul.f32 0.2, %v6062_v46  ;;  %v6127_v20 = vmul.f32 0.2, %v6063_v61 }
 0x615   : > { %v6025_v11 = vadd.f32 %v10242_v60, %v5523_v2  ;;  %v5427_v62 = vsel %vm5402_vm4, %v5424_v53, %v5426_v7  ;;  %v7322_v48 = vpop.f32.mrb[120].mxu1  ;;  %v10846_v7 = vld [vmem:[#allocation17_spill] sm:$0xff] }
 0x616   : > { %v6158_v19 = vsel %vm6094_vm14, %v6062_v46, %v6126_v40  ;;  %v6159_v1 = vsel %vm6095_vm15, %v6063_v61, %v6127_v20  ;;  %v5524_v15 = vadd.f32 %v5427_v62, %v10267_v38  ;;  %v5431_v37 = vrot.slane %v7322_v48, 2  ;;  %v5195_v52 = vpop.f32.mrb[121].mxu1 }
 0x617   : > { %6191 = vst.msk [vmem:[%s7622_s26 + $0x30] sm:$0xff] %vm6184_vm8, %v6158_v19  ;;  %6192 = vst.msk [vmem:[%s7622_s26 + $0x38] sm:$0xff] %vm6184_vm8, %v6159_v1  ;;  %v6064_v10 = vadd.f32 %v10592_v56, %v6025_v11  ;;  %v5429_v22 = vrot.slane %v5195_v52, 2  ;;  %v10847_v19 = vld [vmem:[#allocation18_spill] sm:$0xff] }
 0x618   : > { %v6026_v60 = vadd.f32 %v10270_v0, %v5524_v15 }
 0x619   : > { %vm6096_vm1 = vcmp.ge.f32.partialorder %v6064_v10, 0.0  ;;  %v6128_v58 = vmul.f32 0.2, %v6064_v10  ;;  %v5430_v35 = vsel %vm5402_vm4, %v5428_v39, %v5429_v22  ;;  %v5432_v4 = vsel %vm5402_vm4, %v5429_v22, %v5431_v37  ;;  %v7325_v38 = vpop.f32.mrb[122].mxu1  ;;  %v10848_v39 = vld [vmem:[#allocation19_spill] sm:$0xff] }
 0x61a   : > { %v6065_v43 = vadd.f32 %v10592_v56, %v6026_v60  ;;  %v5525_v53 = vadd.f32 %v5430_v35, %v10295_v54  ;;  %v5526_v14 = vadd.f32 %v5432_v4, %v10298_v23  ;;  %v5434_v41 = vrot.slane %v7325_v38, 2  ;;  %v5205_v45 = vpop.f32.mrb[123].mxu1 }
 0x61b   : > { %v6160_v16 = vsel %vm6096_vm1, %v6064_v10, %v6128_v58  ;;  %v5433_v8 = vrot.slane %v5205_v45, 2 }
 0x61c   : > { %6193 = vst.msk [vmem:[%s7622_s26 + $0x40] sm:$0xff] %vm6184_vm8, %v6160_v16  ;;  %vm6097_vm2 = vcmp.ge.f32.partialorder %v6065_v43, 0.0  ;;  %v6129_v0 = vmul.f32 0.2, %v6065_v43  ;;  %v6027_v29 = vadd.f32 %v10301_v25, %v5525_v53  ;;  %v6028_v26 = vadd.f32 %v10304_v27, %v5526_v14  ;;  %v10850_v14 = vld [vmem:[#allocation21_spill] sm:$0xff] }
 0x61d   : > { %v5435_v9 = vsel %vm5402_vm4, %v5433_v8, %v5434_v41  ;;  %v7328_v55 = vpop.f32.mrb[124].mxu1 }
 0x61e   : > { %v6161_v46 = vsel %vm6097_vm2, %v6065_v43, %v6129_v0  ;;  %v6066_v54 = vadd.f32 %v10592_v56, %v6027_v29  ;;  %v6067_v23 = vadd.f32 %v10592_v56, %v6028_v26  ;;  %v5527_v61 = vadd.f32 %v5435_v9, %v10329_v50  ;;  %v5215_v2 = vpop.f32.mrb[125].mxu1  ;;  %v10849_v43 = vld [vmem:[#allocation20_spill] sm:$0xff]  ;;  %v10851_v26 = vld [vmem:[#allocation22_spill] sm:$0xff] }
 0x61f   : > { %6194 = vst.msk [vmem:[%s7622_s26 + $0x48] sm:$0xff] %vm6184_vm8, %v6161_v46  ;;  %v5436_v30 = vrot.slane %v5215_v2, 2  ;;  %v5438_v52 = vrot.slane %v7328_v55, 2  ;;  %v10852_v55 = vld [vmem:[#allocation23_spill] sm:$0xff] }
 0x620   : > { %vm6098_vm3 = vcmp.ge.f32.partialorder %v6066_v54, 0.0  ;;  %vm6099_vm6 = vcmp.ge.f32.partialorder %v6067_v23, 0.0  ;;  %v6130_v25 = vmul.f32 0.2, %v6066_v54  ;;  %v6131_v27 = vmul.f32 0.2, %v6067_v23 }
 0x621   : > { %v6029_v40 = vadd.f32 %v10846_v7, %v5527_v61  ;;  %v5437_v20 = vsel %vm5402_vm4, %v5434_v41, %v5436_v30  ;;  %v7331_v11 = vpop.f32.mrb[126].mxu1 }
 0x622   : > { %v6162_v62 = vsel %vm6098_vm3, %v6066_v54, %v6130_v25  ;;  %v6163_v48 = vsel %vm6099_vm6, %v6067_v23, %v6131_v27  ;;  %v5528_v1 = vadd.f32 %v5437_v20, %v10847_v19  ;;  %v5441_v50 = vrot.slane %v7331_v11, 2  ;;  %v5225_v15 = vpop.f32.mrb[127].mxu1  ;;  %v10853_v25 = vld [vmem:[#allocation24_spill] sm:$0xff] }
 0x623   : > { %6195 = vst.msk [vmem:[%s7622_s26 + $0x50] sm:$0xff] %vm6184_vm8, %v6162_v62  ;;  %6196 = vst.msk [vmem:[%s7622_s26 + $0x58] sm:$0xff] %vm6184_vm8, %v6163_v48  ;;  %v6068_v37 = vadd.f32 %v10592_v56, %v6029_v40  ;;  %v5439_v10 = vrot.slane %v5225_v15, 2  ;;  %v10854_v62 = vld [vmem:[#allocation25_spill] sm:$0xff] }
 0x624   : > { %v6030_v22 = vadd.f32 %v10848_v39, %v5528_v1 }
 0x625   : > { %vm6100_vm7 = vcmp.ge.f32.partialorder %v6068_v37, 0.0  ;;  %v6132_v60 = vmul.f32 0.2, %v6068_v37  ;;  %v5440_v58 = vsel %vm5402_vm4, %v5438_v52, %v5439_v10  ;;  %v5442_v35 = vsel %vm5402_vm4, %v5439_v10, %v5441_v50  ;;  %v7334_v4 = vpop.f32.mrb[128].mxu1 }
 0x626   : > { %v6069_v38 = vadd.f32 %v10592_v56, %v6030_v22  ;;  %v5529_v53 = vadd.f32 %v5440_v58, %v10849_v43  ;;  %v5530_v41 = vadd.f32 %v5442_v35, %v10850_v14  ;;  %v5444_v45 = vrot.slane %v7334_v4, 2  ;;  %v5235_v16 = vpop.f32.mrb[129].mxu1  ;;  %v10856_v35 = vld [vmem:[#allocation27_spill] sm:$0xff] }
 0x627   : > { %v6164_v8 = vsel %vm6100_vm7, %v6068_v37, %v6132_v60  ;;  %v5443_v0 = vrot.slane %v5235_v16, 2  ;;  %v10855_v37 = vld [vmem:[#allocation26_spill] sm:$0xff] }
 0x628   : > { %6197 = vst.msk [vmem:[%s7622_s26 + $0x60] sm:$0xff] %vm6184_vm8, %v6164_v8  ;;  %vm6101_vm0 = vcmp.ge.f32.partialorder %v6069_v38, 0.0  ;;  %v6133_v29 = vmul.f32 0.2, %v6069_v38  ;;  %v6031_v9 = vadd.f32 %v10851_v26, %v5529_v53  ;;  %v6032_v46 = vadd.f32 %v10852_v55, %v5530_v41 }
 0x629   : > { %v5445_v54 = vsel %vm5402_vm4, %v5443_v0, %v5444_v45  ;;  %v7337_v23 = vpop.f32.mrb[130].mxu1 }
 0x62a   : > { %v6165_v61 = vsel %vm6101_vm0, %v6069_v38, %v6133_v29  ;;  %v6070_v2 = vadd.f32 %v10592_v56, %v6031_v9  ;;  %v6071_v30 = vadd.f32 %v10592_v56, %v6032_v46  ;;  %v5531_v27 = vadd.f32 %v5445_v54, %v10853_v25  ;;  %v5245_v7 = vpop.f32.mrb[131].mxu1 }
 0x62b   : > { %6198 = vst.msk [vmem:[%s7622_s26 + $0x68] sm:$0xff] %vm6184_vm8, %v6165_v61  ;;  %v5446_v40 = vrot.slane %v5245_v7, 2  ;;  %v5448_v60 = vrot.slane %v7337_v23, 2 }
 0x62c   : > { %vm6102_vm5 = vcmp.ge.f32.partialorder %v6070_v2, 0.0  ;;  %vm6103_vm9 = vcmp.ge.f32.partialorder %v6071_v30, 0.0  ;;  %v6134_v20 = vmul.f32 0.2, %v6070_v2  ;;  %v6135_v11 = vmul.f32 0.2, %v6071_v30 }
 0x62d   : > { %v6033_v48 = vadd.f32 %v10854_v62, %v5531_v27  ;;  %v5447_v19 = vsel %vm5402_vm4, %v5444_v45, %v5446_v40  ;;  %v7340_v1 = vpop.f32.mrb[132].mxu1 }
 0x62e   : > { %v6166_v50 = vsel %vm6102_vm5, %v6070_v2, %v6134_v20  ;;  %v6167_v15 = vsel %vm6103_vm9, %v6071_v30, %v6135_v11  ;;  %v5532_v52 = vadd.f32 %v5447_v19, %v10855_v37  ;;  %v5451_v10 = vrot.slane %v7340_v1, 2  ;;  %v5255_v39 = vpop.f32.mrb[133].mxu1 }
 0x62f   : > { %6199 = vst.msk [vmem:[%s7622_s26 + $0x70] sm:$0xff] %vm6184_vm8, %v6166_v50  ;;  %6200 = vst.msk [vmem:[%s7622_s26 + $0x78] sm:$0xff] %vm6184_vm8, %v6167_v15  ;;  %v6072_v22 = vadd.f32 %v10592_v56, %v6033_v48  ;;  %v5449_v58 = vrot.slane %v5255_v39, 2 }
 0x630   : > { %v6034_v4 = vadd.f32 %v10856_v35, %v5532_v52 }
 0x631   : > { %vm6104_vm10 = vcmp.ge.f32.partialorder %v6072_v22, 0.0  ;;  %v6136_v38 = vmul.f32 0.2, %v6072_v22  ;;  %v5450_v43 = vsel %vm5402_vm4, %v5448_v60, %v5449_v58  ;;  %v5452_v53 = vsel %vm5402_vm4, %v5449_v58, %v5451_v10  ;;  %v7343_v14 = vpop.f32.mrb[134].mxu1 }
 0x632   : > { %v6073_v41 = vadd.f32 %v10592_v56, %v6034_v4  ;;  %v5533_v45 = vadd.f32 %v5450_v43, %v10454_v6  ;;  %v5534_v16 = vadd.f32 %v5452_v53, %v10457_v28  ;;  %v5454_v8 = vrot.slane %v7343_v14, 2  ;;  %v5265_v0 = vpop.f32.mrb[135].mxu1 }
 0x633   : > { %v6168_v29 = vsel %vm6104_vm10, %v6072_v22, %v6136_v38  ;;  %v5453_v26 = vrot.slane %v5265_v0, 2 }
 0x634   : > { %6201 = vst.msk [vmem:[%s7622_s26 + $0x80] sm:$0xff] %vm6184_vm8, %v6168_v29  ;;  %vm6105_vm11 = vcmp.ge.f32.partialorder %v6073_v41, 0.0  ;;  %v6137_v9 = vmul.f32 0.2, %v6073_v41  ;;  %v6035_v55 = vadd.f32 %v10460_v49, %v5533_v45  ;;  %v6036_v46 = vadd.f32 %v10463_v33, %v5534_v16 }
 0x635   : > { %v5455_v54 = vsel %vm5402_vm4, %v5453_v26, %v5454_v8  ;;  %v7346_v23 = vpop.f32.mrb[136].mxu1 }
 0x636   : > { %v6169_v61 = vsel %vm6105_vm11, %v6073_v41, %v6137_v9  ;;  %v6074_v6 = vadd.f32 %v10592_v56, %v6035_v55  ;;  %v6075_v28 = vadd.f32 %v10592_v56, %v6036_v46  ;;  %v5535_v2 = vadd.f32 %v5455_v54, %v10482_v42  ;;  %v5275_v30 = vpop.f32.mrb[137].mxu1 }
 0x637   : > { %6202 = vst.msk [vmem:[%s7622_s26 + $0x88] sm:$0xff] %vm6184_vm8, %v6169_v61  ;;  %v5456_v25 = vrot.slane %v5275_v30, 2  ;;  %v5458_v1 = vrot.slane %v7346_v23, 2 }
 0x638   : > { %vm6106_vm12 = vcmp.ge.f32.partialorder %v6074_v6, 0.0  ;;  %vm6107_vm13 = vcmp.ge.f32.partialorder %v6075_v28, 0.0  ;;  %v6138_v49 = vmul.f32 0.2, %v6074_v6  ;;  %v6139_v33 = vmul.f32 0.2, %v6075_v28 }
 0x639   : > { %v6037_v27 = vadd.f32 %v10485_v18, %v5535_v2  ;;  %v5457_v7 = vsel %vm5402_vm4, %v5454_v8, %v5456_v25  ;;  %v7349_v40 = vpop.f32.mrb[138].mxu1 }
 0x63a   : > { %v6170_v20 = vsel %vm6106_vm12, %v6074_v6, %v6138_v49  ;;  %v6171_v11 = vsel %vm6107_vm13, %v6075_v28, %v6139_v33  ;;  %v5536_v62 = vadd.f32 %v5457_v7, %v10508_v47  ;;  %v5461_v42 = vrot.slane %v7349_v40, 2  ;;  %v5285_v48 = vpop.f32.mrb[139].mxu1 }
 0x63b   : > { %6203 = vst.msk [vmem:[%s7622_s26 + $0x90] sm:$0xff] %vm6184_vm8, %v6170_v20  ;;  %6204 = vst.msk [vmem:[%s7622_s26 + $0x98] sm:$0xff] %vm6184_vm8, %v6171_v11  ;;  %v6076_v19 = vadd.f32 %v10592_v56, %v6037_v27  ;;  %v5459_v50 = vrot.slane %v5285_v48, 2  ;;  %v10857_v11 = vld [vmem:[#allocation28_spill] sm:$0xff] }
 0x63c   : > { %v6038_v18 = vadd.f32 %v10511_v13, %v5536_v62 }
 0x63d   : > { %vm6108_vm14 = vcmp.ge.f32.partialorder %v6076_v19, 0.0  ;;  %v6140_v15 = vmul.f32 0.2, %v6076_v19  ;;  %v5460_v37 = vsel %vm5402_vm4, %v5458_v1, %v5459_v50  ;;  %v5462_v52 = vsel %vm5402_vm4, %v5459_v50, %v5461_v42  ;;  %v7352_v47 = vpop.f32.mrb[140].mxu1  ;;  %v10858_v42 = vld [vmem:[#allocation29_spill] sm:$0xff] }
 0x63e   : > { %v6077_v10 = vadd.f32 %v10592_v56, %v6038_v18  ;;  %v5537_v39 = vadd.f32 %v5460_v37, %v10528_v31  ;;  %v5538_v22 = vadd.f32 %v5462_v52, %v10531_v36  ;;  %v5464_v60 = vrot.slane %v7352_v47, 2  ;;  %v5295_v58 = vpop.f32.mrb[141].mxu1  ;;  %v10859_v18 = vld [vmem:[#allocation30_spill] sm:$0xff] }
 0x63f   : > { %v6172_v35 = vsel %vm6108_vm14, %v6076_v19, %v6140_v15  ;;  %v5463_v4 = vrot.slane %v5295_v58, 2 }
 0x640   : > { %6205 = vst.msk [vmem:[%s7622_s26 + $0xa0] sm:$0xff] %vm6184_vm8, %v6172_v35  ;;  %vm6109_vm15 = vcmp.ge.f32.partialorder %v6077_v10, 0.0  ;;  %v6141_v13 = vmul.f32 0.2, %v6077_v10  ;;  %v6039_v38 = vadd.f32 %v10534_v21, %v5537_v39  ;;  %v6040_v43 = vadd.f32 %v10537_v34, %v5538_v22  ;;  %v10860_v39 = vld [vmem:[#allocation31_spill] sm:$0xff] }
 0x641   : > { %v5465_v53 = vsel %vm5402_vm4, %v5463_v4, %v5464_v60  ;;  %v7355_v14 = vpop.f32.mrb[142].mxu1 }
 0x642   : > { %v6173_v41 = vsel %vm6109_vm15, %v6077_v10, %v6141_v13  ;;  %v6078_v31 = vadd.f32 %v10592_v56, %v6039_v38  ;;  %v6079_v36 = vadd.f32 %v10592_v56, %v6040_v43  ;;  %v5539_v45 = vadd.f32 %v5465_v53, %v10540_v17  ;;  %v5305_v16 = vpop.f32.mrb[143].mxu1 }
 0x643   : > { %6206 = vst.msk [vmem:[%s7622_s26 + $0xa8] sm:$0xff] %vm6184_vm8, %v6173_v41  ;;  %v5466_v8 = vrot.slane %v5305_v16, 2  ;;  %v5468_v61 = vrot.slane %v7355_v14, 2 }
 0x644   : > { %vm6110_vm1 = vcmp.ge.f32.partialorder %v6078_v31, 0.0  ;;  %vm6111_vm2 = vcmp.ge.f32.partialorder %v6079_v36, 0.0  ;;  %v6142_v21 = vmul.f32 0.2, %v6078_v31  ;;  %v6143_v34 = vmul.f32 0.2, %v6079_v36 }
 0x645   : > { %v6041_v0 = vadd.f32 %v10543_v63, %v5539_v45  ;;  %v5467_v29 = vsel %vm5402_vm4, %v5464_v60, %v5466_v8  ;;  %v7358_v26 = vpop.f32.mrb[144].mxu1 }
 0x646   : > { %v6174_v9 = vsel %vm6110_vm1, %v6078_v31, %v6142_v21  ;;  %v6175_v55 = vsel %vm6111_vm2, %v6079_v36, %v6143_v34  ;;  %v5540_v46 = vadd.f32 %v5467_v29, %v10546_v12  ;;  %v5471_v17 = vrot.slane %v7358_v26, 2  ;;  %v5315_v54 = vpop.f32.mrb[145].mxu1  ;;  %v10861_v29 = vld [vmem:[#allocation32_spill] sm:$0xff] }
 0x647   : > { %6207 = vst.msk [vmem:[%s7622_s26 + $0xb0] sm:$0xff] %vm6184_vm8, %v6174_v9  ;;  %6208 = vst.msk [vmem:[%s7622_s26 + $0xb8] sm:$0xff] %vm6184_vm8, %v6175_v55  ;;  %v6080_v23 = vadd.f32 %v10592_v56, %v6041_v0  ;;  %v5469_v6 = vrot.slane %v5315_v54, 2 }
 0x648   : > { %v6042_v63 = vadd.f32 %v10549_v59, %v5540_v46 }
 0x649   : > { %vm6112_vm3 = vcmp.ge.f32.partialorder %v6080_v23, 0.0  ;;  %v6144_v28 = vmul.f32 0.2, %v6080_v23  ;;  %v5470_v2 = vsel %vm5402_vm4, %v5468_v61, %v5469_v6  ;;  %v5472_v30 = vsel %vm5402_vm4, %v5469_v6, %v5471_v17  ;;  %v7361_v12 = vpop.f32.mrb[146].mxu1 }
 0x64a   : > { %v6081_v25 = vadd.f32 %v10592_v56, %v6042_v63  ;;  %v5541_v49 = vadd.f32 %v5470_v2, %v10552_v44  ;;  %v5542_v33 = vadd.f32 %v5472_v30, %v10555_v24  ;;  %v5474_v27 = vrot.slane %v7361_v12, 2  ;;  %v5325_v7 = vpop.f32.mrb[147].mxu1 }
 0x64b   : > { %v6176_v40 = vsel %vm6112_vm3, %v6080_v23, %v6144_v28  ;;  %v5473_v20 = vrot.slane %v5325_v7, 2 }
 0x64c   : > { %6209 = vst.msk [vmem:[%s7622_s26 + $0xc0] sm:$0xff] %vm6184_vm8, %v6176_v40  ;;  %vm6113_vm6 = vcmp.ge.f32.partialorder %v6081_v25, 0.0  ;;  %v6145_v59 = vmul.f32 0.2, %v6081_v25  ;;  %v6043_v62 = vadd.f32 %v10857_v11, %v5541_v49  ;;  %v6044_v48 = vadd.f32 %v10858_v42, %v5542_v33 }
 0x64d   : > { %v5475_v19 = vsel %vm5402_vm4, %v5473_v20, %v5474_v27  ;;  %v7364_v1 = vpop.f32.mrb[148].mxu1 }
 0x64e   : > { %v6177_v50 = vsel %vm6113_vm6, %v6081_v25, %v6145_v59  ;;  %v6082_v44 = vadd.f32 %v10592_v56, %v6043_v62  ;;  %v6083_v24 = vadd.f32 %v10592_v56, %v6044_v48  ;;  %v5543_v15 = vadd.f32 %v5475_v19, %v10859_v18  ;;  %v5335_v37 = vpop.f32.mrb[149].mxu1 }
 0x64f   : > { %6210 = vst.msk [vmem:[%s7622_s26 + $0xc8] sm:$0xff] %vm6184_vm8, %v6177_v50  ;;  %v5476_v52 = vrot.slane %v5335_v37, 2  ;;  %v5478_v14 = vrot.slane %v7364_v1, 2 }
 0x650   : > { %vm6114_vm7 = vcmp.ge.f32.partialorder %v6082_v44, 0.0  ;;  %vm6115_vm0 = vcmp.ge.f32.partialorder %v6083_v24, 0.0  ;;  %v6146_v47 = vmul.f32 0.2, %v6082_v44  ;;  %v6147_v10 = vmul.f32 0.2, %v6083_v24 }
 0x651   : > { %v6045_v22 = vadd.f32 %v10860_v39, %v5543_v15  ;;  %v5477_v60 = vsel %vm5402_vm4, %v5474_v27, %v5476_v52  ;;  %v7367_v58 = vpop.f32.mrb[150].mxu1 }
 0x652   : > { %v6178_v35 = vsel %vm6114_vm7, %v6082_v44, %v6146_v47  ;;  %v6179_v4 = vsel %vm6115_vm0, %v6083_v24, %v6147_v10  ;;  %v5544_v13 = vadd.f32 %v5477_v60, %v10570_v32  ;;  %v5481_v38 = vrot.slane %v7367_v58, 2  ;;  %v5345_v43 = vpop.f32.mrb[151].mxu1 }
 0x653   : > { %6211 = vst.msk [vmem:[%s7622_s26 + $0xd0] sm:$0xff] %vm6184_vm8, %v6178_v35  ;;  %6212 = vst.msk [vmem:[%s7622_s26 + $0xd8] sm:$0xff] %vm6184_vm8, %v6179_v4  ;;  %v6084_v53 = vadd.f32 %v10592_v56, %v6045_v22  ;;  %v5479_v41 = vrot.slane %v5345_v43, 2 }
 0x654   : > { %v6046_v31 = vadd.f32 %v10573_v57, %v5544_v13 }
 0x655   : > { %vm6116_vm5 = vcmp.ge.f32.partialorder %v6084_v53, 0.0  ;;  %v6148_v36 = vmul.f32 0.2, %v6084_v53  ;;  %v5480_v45 = vsel %vm5402_vm4, %v5478_v14, %v5479_v41  ;;  %v5482_v32 = vsel %vm5402_vm4, %v5479_v41, %v5481_v38 }
 0x656   : > { %v6085_v16 = vadd.f32 %v10592_v56, %v6046_v31  ;;  %v5545_v8 = vadd.f32 %v5480_v45, %v10576_v5  ;;  %v5546_v21 = vadd.f32 %v5482_v32, %v10579_v3 }
 0x657   : > { %v6180_v34 = vsel %vm6116_vm5, %v6084_v53, %v6148_v36 }
 0x658   : > { %6213 = vst.msk [vmem:[%s7622_s26 + $0xe0] sm:$0xff] %vm6184_vm8, %v6180_v34  ;;  %vm6117_vm9 = vcmp.ge.f32.partialorder %v6085_v16, 0.0  ;;  %v6149_v57 = vmul.f32 0.2, %v6085_v16  ;;  %v6047_v0 = vadd.f32 %v10582_v51, %v5545_v8  ;;  %v6048_v26 = vadd.f32 %v10861_v29, %v5546_v21 }
 0x65a   : > { %v6181_v9 = vsel %vm6117_vm9, %v6085_v16, %v6149_v57  ;;  %v6086_v55 = vadd.f32 %v10592_v56, %v6047_v0  ;;  %v6087_v46 = vadd.f32 %v10592_v56, %v6048_v26 }
 0x65b   : > { %6214 = vst.msk [vmem:[%s7622_s26 + $0xe8] sm:$0xff] %vm6184_vm8, %v6181_v9 }
 0x65c   : > { %vm6118_vm4 = vcmp.ge.f32.partialorder %v6086_v55, 0.0  ;;  %vm6119_vm10 = vcmp.ge.f32.partialorder %v6087_v46, 0.0  ;;  %v6150_v5 = vmul.f32 0.2, %v6086_v55  ;;  %v6151_v3 = vmul.f32 0.2, %v6087_v46 }
 0x65e   : > { %v6182_v17 = vsel %vm6118_vm4, %v6086_v55, %v6150_v5  ;;  %v6183_v54 = vsel %vm6119_vm10, %v6087_v46, %v6151_v3 }
 0x65f   : > { %6215 = vst.msk [vmem:[%s7622_s26 + $0xf0] sm:$0xff] %vm6184_vm8, %v6182_v17  ;;  %6216 = vst.msk [vmem:[%s7622_s26 + $0xf8] sm:$0xff] %vm6184_vm8, %v6183_v54 }
 0x660 PF: > { %s15_s20 = sadd.s32 1, %s7560_s20   ;;  %s10862_s18 = smov %s7556_s19 }
 0x661   : > { %p12_p5 = scmp.ge.s32.totalorder %s15_s20, 4   ;;  %s10863_s19 = smov %s10865_s21 }
 0x663   :  { %14 = sbr.rel (!%p12_p5) target bundleno = 2 (0x2), region = 83 }

</bundles_post_ra>
